<compile_context>
chip_gen: v6e
topology: v6e:2x2x1
jax: 0.10.0
libtpu: 0.0.40
codegen_flags: <defaults>
</compile_context>

<pallas_src>
import math

import numpy as np
import jax
import jax.numpy as jnp
from jax import lax
from jax.experimental import pallas as pl
from jax.experimental.pallas import tpu as pltpu

LN_EPS = 1e-5  # timm LayerNormAct2d / nn.LayerNorm default


# ----------------------------- elementwise helpers ------------------------------

def _erf(x):
    # Abramowitz & Stegun 7.1.26 polynomial erf (|err| < 1.5e-7 ~ f32 eps): matches
    # PyTorch's exact (erf-based) nn.GELU while only using exp/abs/where.
    p = 0.3275911
    a1, a2, a3, a4, a5 = (0.254829592, -0.284496736, 1.421413741,
                          -1.453152027, 1.061405429)
    sign = jnp.where(x >= 0.0, 1.0, -1.0)
    ax = jnp.abs(x)
    t = 1.0 / (1.0 + p * ax)
    poly = t * (a1 + t * (a2 + t * (a3 + t * (a4 + t * a5))))
    return sign * (1.0 - poly * jnp.exp(-ax * ax))


def _gelu_exact(x):
    return 0.5 * x * (1.0 + _erf(x * (1.0 / math.sqrt(2.0))))


def _hardswish(x):
    return x * jnp.clip(x + 3.0, 0.0, 6.0) * (1.0 / 6.0)


def _hardsigmoid(x):
    return jnp.clip(x + 3.0, 0.0, 6.0) * (1.0 / 6.0)


def _layernorm(x, w, b):
    mu = jnp.mean(x, axis=-1, keepdims=True)
    var = jnp.mean(jnp.square(x - mu), axis=-1, keepdims=True)
    return (x - mu) * lax.rsqrt(var + LN_EPS) * w + b


def _make_divisible(v, divisor=8):
    new_v = max(divisor, int(v + divisor / 2) // divisor * divisor)
    if new_v < 0.9 * v:
        new_v += divisor
    return new_v


def _build_stride2_select(h):
    # Static 0/1 gather matrix for the stride-2 3x3 depthwise conv (pad=1):
    # row r = k*HWo + i*Wo + j selects unpadded input token (2i+di-1, 2j+dj-1)
    # where k = di*3 + dj; out-of-range taps leave the row all-zero (= zero pad).
    H = W = h
    Ho = Wo = h // 2
    HWo = Ho * Wo
    sel = np.zeros((9 * HWo, H * W), np.float32)
    for di in range(3):
        for dj in range(3):
            k = di * 3 + dj
            for i in range(Ho):
                for j in range(Wo):
                    ri, ci = 2 * i + di - 1, 2 * j + dj - 1
                    if 0 <= ri < H and 0 <= ci < W:
                        sel[k * HWo + i * Wo + j, ri * W + ci] = 1.0
    return sel


# ----------------------------- fused forward kernel -----------------------------

def _make_fused_kernel(h, C):
    H = W = h
    Ho = Wo = h // 2
    HW = H * W
    HWo = Ho * Wo

    def se_scale(y, w1_ref, b1_ref, w2_ref, b2_ref):
        # Squeeze-Excitation: avgpool -> fc1 -> ReLU -> fc2 -> Hardsigmoid.
        # The two 1-row matmuls are only ~C*S MACs, so they run on the VPU/XLU as
        # broadcast-multiply + reduce (no MXU push/pop on the pool->scale path).
        pooled = jnp.mean(y, axis=0, keepdims=True)                              # (1, C)
        s = jnp.sum(w1_ref[...] * pooled, axis=1, keepdims=True) + b1_ref[...]   # (S, 1)
        s = jnp.maximum(s, 0.0)
        z = jnp.sum(s * w2_ref[...], axis=0, keepdims=True) + b2_ref[...]        # (1, C)
        return _hardsigmoid(z)

    def kernel(x_ref, w1_ref, b1_ref, w2_ref, b2_ref,
               dw1_ref, l1aw_ref, l1ab_ref, s1w1_ref, s1b1_ref, s1w2_ref,
               s1b2_ref, p1_ref, l1bw_ref, l1bb_ref,
               dw2_ref, l2aw_ref, l2ab_ref, s2w1_ref, s2b1_ref, s2w2_ref,
               s2b2_ref, p2_ref, l2bw_ref, l2bb_ref,
               sel2_ref,
               o_ref, pad_ref):
        # ---------------- MLP: Linear -> GELU(exact) -> Linear ----------------
        xt = x_ref[...]                                                          # (HW, inc)
        hmid = jnp.dot(xt, w1_ref[...], preferred_element_type=jnp.float32) + b1_ref[...]
        hmid = _gelu_exact(hmid)
        y0 = jnp.dot(hmid, w2_ref[...], preferred_element_type=jnp.float32) + b2_ref[...]

        # ---- InvertedResidual 1: dw3x3(s=1) + LN + HSwish + SE + 1x1 + LN + residual ----
        # Re-zero the padded scratch every program (12.8 KB): keeps the zero border
        # valid even when the batch grid is megacore-sharded (scratch is per-core).
        pad_ref[...] = jnp.zeros_like(pad_ref)
        pad_ref[1:1 + H, 1:1 + W, :] = y0.reshape(H, W, C)
        dw1 = dw1_ref[...]                                                       # (9, C), loaded once
        conv = None
        for di in range(3):
            for dj in range(3):
                k = di * 3 + dj
                # shifted-view tap straight from VMEM scratch (no HBM tap materialization)
                term = pad_ref[di:di + H, dj:dj + W, :] * dw1[k:k + 1, :]
                conv = term if conv is None else conv + term
        y = conv.reshape(HW, C)
        y = _hardswish(_layernorm(y, l1aw_ref[...], l1ab_ref[...]))
        y = y * se_scale(y, s1w1_ref, s1b1_ref, s1w2_ref, s1b2_ref)
        y = jnp.dot(y, p1_ref[...], preferred_element_type=jnp.float32)          # 1x1 proj
        y = _layernorm(y, l1bw_ref[...], l1bb_ref[...])
        y1 = y + y0                                                              # residual (stride 1)

        # ---- InvertedResidual 2: dw3x3(s=2) + LN + HSwish + SE + 1x1 + LN (no residual) ----
        # All 9 strided taps in ONE tiny MXU matmul against the precomputed 0/1
        # selection matrix (zero padding folded in); no second scratch image needed.
        g = jnp.dot(sel2_ref[...], y1, preferred_element_type=jnp.float32)       # (9*HWo, C)
        dw2 = dw2_ref[...]                                                       # (9, C), loaded once
        conv2 = None
        for k in range(9):
            term = g[k * HWo:(k + 1) * HWo, :] * dw2[k:k + 1, :]
            conv2 = term if conv2 is None else conv2 + term
        y2 = _hardswish(_layernorm(conv2, l2aw_ref[...], l2ab_ref[...]))
        y2 = y2 * se_scale(y2, s2w1_ref, s2b1_ref, s2w2_ref, s2b2_ref)
        y2 = jnp.dot(y2, p2_ref[...], preferred_element_type=jnp.float32)        # 1x1 proj
        y2 = _layernorm(y2, l2bw_ref[...], l2bb_ref[...])

        # Only HBM write of the whole forward: 512 floats/batch -> store directly
        # (lane-densifying it would cost more relayout ops than the masked stores).
        o_ref[...] = y2

    return kernel


def ldp_projector_forward(x, params):
    B, N, inc = x.shape
    h = int(math.sqrt(N))
    assert h * h == N and h % 2 == 0, "square token grid with even side required"
    C = params["w1"].shape[1]
    S = params["blk1"]["se_w1"].shape[0]
    HWo = (h // 2) ** 2

    kernel = _make_fused_kernel(h, C)
    sel2 = jnp.asarray(_build_stride2_select(h))                 # (9*HWo, h*h) constant

    def _full(shape):
        return pl.BlockSpec(shape, lambda b: (0,) * len(shape))

    blk_specs = [
        _full((9, C)),                          # depthwise 3x3 weight, tap-major, no bias
        _full((1, C)), _full((1, C)),           # LayerNormAct2d #1 weight / bias
        _full((S, C)), _full((S, 1)),           # SE fc1 weight (out,in) / bias
        _full((S, C)), _full((1, C)),           # SE fc2 weight transposed (S,C) / bias
        _full((C, C)),                          # 1x1 projection weight (in, out), no bias
        _full((1, C)), _full((1, C)),           # LayerNormAct2d #2 weight / bias
    ]
    in_specs = (
        [pl.BlockSpec((None, N, inc), lambda b: (b, 0, 0)),
         _full((inc, C)), _full((1, C)), _full((C, C)), _full((1, C))]
        + blk_specs + blk_specs
        + [_full((9 * HWo, h * h))])            # stride-2 gather selection matrix

    def blk_args(blk):
        return [blk["dw_w"], blk["ln1_w"], blk["ln1_b"],
                blk["se_w1"], blk["se_b1"], blk["se_w2"], blk["se_b2"],
                blk["proj_w"], blk["ln2_w"], blk["ln2_b"]]

    args = ([x, params["w1"], params["b1"], params["w2"], params["b2"]]
            + blk_args(params["blk1"]) + blk_args(params["blk2"]) + [sel2])

    return pl.pallas_call(
        kernel,
        out_shape=jax.ShapeDtypeStruct((B, HWo, C), jnp.float32),
        grid=(B,),                               # one program per batch element
        in_specs=in_specs,
        out_specs=pl.BlockSpec((None, HWo, C), lambda b: (b, 0, 0)),
        scratch_shapes=[
            pltpu.VMEM((h + 2, h + 2, C), jnp.float32),        # block-1 padded image
        ],
        compiler_params=pltpu.CompilerParams(dimension_semantics=("parallel",)),
    )(*args)


# ----------------------------- pure-JAX reference (check) -----------------------

def reference_forward(x, params):
    B, N, inc = x.shape
    h = int(math.sqrt(N))
    y = jax.nn.gelu(x @ params["w1"] + params["b1"][0], approximate=False)
    y = y @ params["w2"] + params["b2"][0]
    y = y.reshape(B, h, h, -1)

    def mb(xh, blk, stride):
        Bq, H, W, C = xh.shape
        Ho, Wo = H // stride, W // stride
        xp = jnp.pad(xh, ((0, 0), (1, 1), (1, 1), (0, 0)))
        acc = jnp.zeros((Bq, Ho, Wo, C), jnp.float32)
        for di in range(3):
            for dj in range(3):
                acc = acc + (xp[:, di:di + stride * Ho:stride,
                                dj:dj + stride * Wo:stride, :] * blk["dw_w"][di * 3 + dj])
        y2 = _hardswish(_layernorm(acc, blk["ln1_w"][0], blk["ln1_b"][0]))
        pooled = jnp.mean(y2, axis=(1, 2), keepdims=True)                        # (B,1,1,C)
        s = jnp.maximum(jnp.einsum("bijc,sc->bijs", pooled, blk["se_w1"])
                        + blk["se_b1"][:, 0], 0.0)
        z = jnp.einsum("bijs,sc->bijc", s, blk["se_w2"]) + blk["se_b2"][0]
        y2 = y2 * _hardsigmoid(z)
        y2 = y2 @ blk["proj_w"]
        y2 = _layernorm(y2, blk["ln2_w"][0], blk["ln2_b"][0])
        if stride == 1:
            y2 = y2 + xh
        return y2

    y = mb(y, params["blk1"], 1)
    y = mb(y, params["blk2"], 2)
    return y.reshape(B, -1, y.shape[-1])


# ----------------------------- deterministic parameter init ---------------------

def init_params(key, inc, ouc):
    keys = jax.random.split(key, 32)
    it = iter(keys)

    def nrm(shape, scale):
        return scale * jax.random.normal(next(it), shape, jnp.float32)

    sq = _make_divisible(ouc // 4, 8)   # SE squeeze channels

    def block():
        return dict(
            dw_w=nrm((9, ouc), 0.1),            # depthwise 3x3 weight, tap-major
            ln1_w=1.0 + nrm((1, ouc), 0.05),
            ln1_b=nrm((1, ouc), 0.05),
            se_w1=nrm((sq, ouc), 0.1),          # SE fc1: torch Conv2d weight (S, C)
            se_b1=nrm((sq, 1), 0.05),
            se_w2=nrm((sq, ouc), 0.1),          # SE fc2: torch Conv2d weight transposed (S, C)
            se_b2=nrm((1, ouc), 0.05),
            proj_w=nrm((ouc, ouc), 0.1),        # 1x1 projection conv (in, out), no bias
            ln2_w=1.0 + nrm((1, ouc), 0.05),
            ln2_b=nrm((1, ouc), 0.05),
        )

    return dict(
        w1=nrm((inc, ouc), 0.1), b1=nrm((1, ouc), 0.05),
        w2=nrm((ouc, ouc), 0.1), b2=nrm((1, ouc), 0.05),
        blk1=block(), blk2=block(),
    )


if __name__ == "__main__":
    # config.mm_hidden_size = 48, config.hidden_size = 32, 64 tokens (h = 8), batch 2
    B, num_tokens, inc, ouc = 2, 64, 48, 32
    key = jax.random.PRNGKey(0)
    kx, kp = jax.random.split(key)
    x = jax.random.normal(kx, (B, num_tokens, inc), jnp.float32)
    params = init_params(kp, inc, ouc)

    fwd = jax.jit(ldp_projector_forward)
    out = jax.block_until_ready(fwd(x, params))
    ref = jax.block_until_ready(reference_forward(x, params))

    h = int(math.sqrt(num_tokens))
    assert out.shape == (B, (h // 2) ** 2, ouc), out.shape
    err = float(jnp.max(jnp.abs(out - ref)))
    assert err < 2e-3, f"mismatch vs reference: {err}"
    print("KERNEL_OK")
</pallas_src>

<mosaic_0001>
module attributes {stable_mosaic.version = 11 : i64} {
  func.func @kernel(%arg0: i32, %arg1: memref<1x64x48xf32, #tpu.memory_space<vmem>>, %arg2: memref<48x32xf32, #tpu.memory_space<vmem>>, %arg3: memref<1x32xf32, #tpu.memory_space<vmem>>, %arg4: memref<32x32xf32, #tpu.memory_space<vmem>>, %arg5: memref<1x32xf32, #tpu.memory_space<vmem>>, %arg6: memref<9x32xf32, #tpu.memory_space<vmem>>, %arg7: memref<1x32xf32, #tpu.memory_space<vmem>>, %arg8: memref<1x32xf32, #tpu.memory_space<vmem>>, %arg9: memref<8x32xf32, #tpu.memory_space<vmem>>, %arg10: memref<8x1xf32, #tpu.memory_space<vmem>>, %arg11: memref<8x32xf32, #tpu.memory_space<vmem>>, %arg12: memref<1x32xf32, #tpu.memory_space<vmem>>, %arg13: memref<32x32xf32, #tpu.memory_space<vmem>>, %arg14: memref<1x32xf32, #tpu.memory_space<vmem>>, %arg15: memref<1x32xf32, #tpu.memory_space<vmem>>, %arg16: memref<9x32xf32, #tpu.memory_space<vmem>>, %arg17: memref<1x32xf32, #tpu.memory_space<vmem>>, %arg18: memref<1x32xf32, #tpu.memory_space<vmem>>, %arg19: memref<8x32xf32, #tpu.memory_space<vmem>>, %arg20: memref<8x1xf32, #tpu.memory_space<vmem>>, %arg21: memref<8x32xf32, #tpu.memory_space<vmem>>, %arg22: memref<1x32xf32, #tpu.memory_space<vmem>>, %arg23: memref<32x32xf32, #tpu.memory_space<vmem>>, %arg24: memref<1x32xf32, #tpu.memory_space<vmem>>, %arg25: memref<1x32xf32, #tpu.memory_space<vmem>>, %arg26: memref<144x64xf32, #tpu.memory_space<vmem>>, %arg27: memref<1x16x32xf32, #tpu.memory_space<vmem>>, %arg28: memref<10x10x32xf32, #tpu.memory_space<vmem>>) attributes {dimension_semantics = [#tpu.dimension_semantics<parallel>], iteration_bounds = array<i64: 2>, scalar_prefetch = 0 : i64, scratch_operands = 1 : i64, tpu.core_type = #tpu.core_type<tc>, window_params = [{transform_indices = @transform_0, window_bounds = array<i64: 1, 64, 48>}, {pipeline_mode = #tpu.pipeline_mode<synchronous>, transform_indices = @transform_1, window_bounds = array<i64: 48, 32>}, {pipeline_mode = #tpu.pipeline_mode<synchronous>, transform_indices = @transform_2, window_bounds = array<i64: 1, 32>}, {pipeline_mode = #tpu.pipeline_mode<synchronous>, transform_indices = @transform_3, window_bounds = array<i64: 32, 32>}, {pipeline_mode = #tpu.pipeline_mode<synchronous>, transform_indices = @transform_4, window_bounds = array<i64: 1, 32>}, {pipeline_mode = #tpu.pipeline_mode<synchronous>, transform_indices = @transform_5, window_bounds = array<i64: 9, 32>}, {pipeline_mode = #tpu.pipeline_mode<synchronous>, transform_indices = @transform_6, window_bounds = array<i64: 1, 32>}, {pipeline_mode = #tpu.pipeline_mode<synchronous>, transform_indices = @transform_7, window_bounds = array<i64: 1, 32>}, {pipeline_mode = #tpu.pipeline_mode<synchronous>, transform_indices = @transform_8, window_bounds = array<i64: 8, 32>}, {pipeline_mode = #tpu.pipeline_mode<synchronous>, transform_indices = @transform_9, window_bounds = array<i64: 8, 1>}, {pipeline_mode = #tpu.pipeline_mode<synchronous>, transform_indices = @transform_10, window_bounds = array<i64: 8, 32>}, {pipeline_mode = #tpu.pipeline_mode<synchronous>, transform_indices = @transform_11, window_bounds = array<i64: 1, 32>}, {pipeline_mode = #tpu.pipeline_mode<synchronous>, transform_indices = @transform_12, window_bounds = array<i64: 32, 32>}, {pipeline_mode = #tpu.pipeline_mode<synchronous>, transform_indices = @transform_13, window_bounds = array<i64: 1, 32>}, {pipeline_mode = #tpu.pipeline_mode<synchronous>, transform_indices = @transform_14, window_bounds = array<i64: 1, 32>}, {pipeline_mode = #tpu.pipeline_mode<synchronous>, transform_indices = @transform_15, window_bounds = array<i64: 9, 32>}, {pipeline_mode = #tpu.pipeline_mode<synchronous>, transform_indices = @transform_16, window_bounds = array<i64: 1, 32>}, {pipeline_mode = #tpu.pipeline_mode<synchronous>, transform_indices = @transform_17, window_bounds = array<i64: 1, 32>}, {pipeline_mode = #tpu.pipeline_mode<synchronous>, transform_indices = @transform_18, window_bounds = array<i64: 8, 32>}, {pipeline_mode = #tpu.pipeline_mode<synchronous>, transform_indices = @transform_19, window_bounds = array<i64: 8, 1>}, {pipeline_mode = #tpu.pipeline_mode<synchronous>, transform_indices = @transform_20, window_bounds = array<i64: 8, 32>}, {pipeline_mode = #tpu.pipeline_mode<synchronous>, transform_indices = @transform_21, window_bounds = array<i64: 1, 32>}, {pipeline_mode = #tpu.pipeline_mode<synchronous>, transform_indices = @transform_22, window_bounds = array<i64: 32, 32>}, {pipeline_mode = #tpu.pipeline_mode<synchronous>, transform_indices = @transform_23, window_bounds = array<i64: 1, 32>}, {pipeline_mode = #tpu.pipeline_mode<synchronous>, transform_indices = @transform_24, window_bounds = array<i64: 1, 32>}, {pipeline_mode = #tpu.pipeline_mode<synchronous>, transform_indices = @transform_25, window_bounds = array<i64: 144, 64>}, {transform_indices = @transform_26, window_bounds = array<i64: 1, 16, 32>}]} {
    %c0 = arith.constant 0 : index
    %c0_0 = arith.constant 0 : index
    %c0_1 = arith.constant 0 : index
    %0 = vector.load %arg1[%c0, %c0_0, %c0_1] : memref<1x64x48xf32, #tpu.memory_space<vmem>>, vector<1x64x48xf32>
    %1 = vector.shape_cast %0 : vector<1x64x48xf32> to vector<64x48xf32>
    %c0_2 = arith.constant 0 : index
    %c0_3 = arith.constant 0 : index
    %2 = vector.load %arg2[%c0_2, %c0_3] : memref<48x32xf32, #tpu.memory_space<vmem>>, vector<48x32xf32>
    %cst = arith.constant dense<0.000000e+00> : vector<64x32xf32>
    %3 = tpu.matmul %1, %2, %cst {dimension_numbers = #tpu.dot_dimension_numbers<[1], [0], [0], [1], [0, 0, 1, 1], [], []>} : vector<64x48xf32>, vector<48x32xf32>, vector<64x32xf32> -> vector<64x32xf32>
    %c0_4 = arith.constant 0 : index
    %c0_5 = arith.constant 0 : index
    %4 = vector.load %arg3[%c0_4, %c0_5] : memref<1x32xf32, #tpu.memory_space<vmem>>, vector<1x32xf32>
    %5 = vector.broadcast %4 : vector<1x32xf32> to vector<64x32xf32>
    %6 = arith.addf %3, %5 : vector<64x32xf32>
    %cst_6 = arith.constant 5.000000e-01 : f32
    %7 = vector.broadcast %cst_6 : f32 to vector<64x32xf32>
    %8 = arith.mulf %7, %6 : vector<64x32xf32>
    %cst_7 = arith.constant 0.707106769 : f32
    %9 = vector.broadcast %cst_7 : f32 to vector<64x32xf32>
    %10 = arith.mulf %6, %9 : vector<64x32xf32>
    %cst_8 = arith.constant 0.000000e+00 : f32
    %11 = vector.broadcast %cst_8 : f32 to vector<64x32xf32>
    %12 = arith.cmpf oge, %10, %11 : vector<64x32xf32>
    %cst_9 = arith.constant 1.000000e+00 : f32
    %cst_10 = arith.constant -1.000000e+00 : f32
    %13 = vector.broadcast %cst_9 : f32 to vector<64x32xf32>
    %14 = vector.broadcast %cst_10 : f32 to vector<64x32xf32>
    %15 = arith.select %12, %13, %14 : vector<64x32xi1>, vector<64x32xf32>
    %16 = math.absf %10 : vector<64x32xf32>
    %cst_11 = arith.constant 0.327591091 : f32
    %17 = vector.broadcast %cst_11 : f32 to vector<64x32xf32>
    %18 = arith.mulf %17, %16 : vector<64x32xf32>
    %cst_12 = arith.constant 1.000000e+00 : f32
    %19 = vector.broadcast %cst_12 : f32 to vector<64x32xf32>
    %20 = arith.addf %19, %18 : vector<64x32xf32>
    %cst_13 = arith.constant 1.000000e+00 : f32
    %21 = vector.broadcast %cst_13 : f32 to vector<64x32xf32>
    %22 = arith.divf %21, %20 : vector<64x32xf32>
    %cst_14 = arith.constant 1.06140542 : f32
    %23 = vector.broadcast %cst_14 : f32 to vector<64x32xf32>
    %24 = arith.mulf %22, %23 : vector<64x32xf32>
    %cst_15 = arith.constant -1.45315206 : f32
    %25 = vector.broadcast %cst_15 : f32 to vector<64x32xf32>
    %26 = arith.addf %25, %24 : vector<64x32xf32>
    %27 = arith.mulf %22, %26 : vector<64x32xf32>
    %cst_16 = arith.constant 1.42141378 : f32
    %28 = vector.broadcast %cst_16 : f32 to vector<64x32xf32>
    %29 = arith.addf %28, %27 : vector<64x32xf32>
    %30 = arith.mulf %22, %29 : vector<64x32xf32>
    %cst_17 = arith.constant -0.284496725 : f32
    %31 = vector.broadcast %cst_17 : f32 to vector<64x32xf32>
    %32 = arith.addf %31, %30 : vector<64x32xf32>
    %33 = arith.mulf %22, %32 : vector<64x32xf32>
    %cst_18 = arith.constant 0.254829586 : f32
    %34 = vector.broadcast %cst_18 : f32 to vector<64x32xf32>
    %35 = arith.addf %34, %33 : vector<64x32xf32>
    %36 = arith.mulf %22, %35 : vector<64x32xf32>
    %cst_19 = arith.constant 0.000000e+00 : f32
    %37 = vector.broadcast %cst_19 : f32 to vector<64x32xf32>
    %38 = arith.subf %37, %16 : vector<64x32xf32>
    %39 = arith.mulf %38, %16 : vector<64x32xf32>
    %40 = math.exp %39 : vector<64x32xf32>
    %41 = arith.mulf %36, %40 : vector<64x32xf32>
    %cst_20 = arith.constant 1.000000e+00 : f32
    %42 = vector.broadcast %cst_20 : f32 to vector<64x32xf32>
    %43 = arith.subf %42, %41 : vector<64x32xf32>
    %44 = arith.mulf %15, %43 : vector<64x32xf32>
    %cst_21 = arith.constant 1.000000e+00 : f32
    %45 = vector.broadcast %cst_21 : f32 to vector<64x32xf32>
    %46 = arith.addf %45, %44 : vector<64x32xf32>
    %47 = arith.mulf %8, %46 : vector<64x32xf32>
    %c0_22 = arith.constant 0 : index
    %c0_23 = arith.constant 0 : index
    %48 = vector.load %arg4[%c0_22, %c0_23] : memref<32x32xf32, #tpu.memory_space<vmem>>, vector<32x32xf32>
    %cst_24 = arith.constant dense<0.000000e+00> : vector<64x32xf32>
    %49 = tpu.matmul %47, %48, %cst_24 {dimension_numbers = #tpu.dot_dimension_numbers<[1], [0], [0], [1], [0, 0, 1, 1], [], []>} : vector<64x32xf32>, vector<32x32xf32>, vector<64x32xf32> -> vector<64x32xf32>
    %c0_25 = arith.constant 0 : index
    %c0_26 = arith.constant 0 : index
    %50 = vector.load %arg5[%c0_25, %c0_26] : memref<1x32xf32, #tpu.memory_space<vmem>>, vector<1x32xf32>
    %51 = vector.broadcast %50 : vector<1x32xf32> to vector<64x32xf32>
    %52 = arith.addf %49, %51 : vector<64x32xf32>
    %cst_27 = arith.constant 0.000000e+00 : f32
    %53 = vector.broadcast %cst_27 : f32 to vector<10x10x32xf32>
    %c0_28 = arith.constant 0 : index
    %c0_29 = arith.constant 0 : index
    %c0_30 = arith.constant 0 : index
    %54 = vector.load %arg28[%c0_28, %c0_29, %c0_30] : memref<10x10x32xf32, #tpu.memory_space<vmem>>, vector<10x10x32xf32>
    tpu.vector_store %arg28[%c0_28, %c0_29, %c0_30], %53 {strides = array<i32>} : memref<10x10x32xf32, #tpu.memory_space<vmem>>, vector<10x10x32xf32>,
    %55 = vector.shape_cast %52 : vector<64x32xf32> to vector<8x8x32xf32>
    %c1 = arith.constant 1 : index
    %c1_31 = arith.constant 1 : index
    %c0_32 = arith.constant 0 : index
    %56 = vector.load %arg28[%c1, %c1_31, %c0_32] : memref<10x10x32xf32, #tpu.memory_space<vmem>>, vector<8x8x32xf32>
    tpu.vector_store %arg28[%c1, %c1_31, %c0_32], %55 {strides = array<i32>} : memref<10x10x32xf32, #tpu.memory_space<vmem>>, vector<8x8x32xf32>,
    %c0_33 = arith.constant 0 : index
    %c0_34 = arith.constant 0 : index
    %57 = vector.load %arg6[%c0_33, %c0_34] : memref<9x32xf32, #tpu.memory_space<vmem>>, vector<9x32xf32>
    %c0_35 = arith.constant 0 : index
    %c0_36 = arith.constant 0 : index
    %c0_37 = arith.constant 0 : index
    %58 = vector.load %arg28[%c0_35, %c0_36, %c0_37] : memref<10x10x32xf32, #tpu.memory_space<vmem>>, vector<8x8x32xf32>
    %59 = vector.extract_strided_slice %57 {offsets = [0, 0], sizes = [1, 32], strides = [1, 1]} : vector<9x32xf32> to vector<1x32xf32>
    %60 = vector.shape_cast %59 : vector<1x32xf32> to vector<1x1x32xf32>
    %61 = vector.broadcast %60 : vector<1x1x32xf32> to vector<8x8x32xf32>
    %62 = arith.mulf %58, %61 : vector<8x8x32xf32>
    %c0_38 = arith.constant 0 : index
    %c1_39 = arith.constant 1 : index
    %c0_40 = arith.constant 0 : index
    %63 = vector.load %arg28[%c0_38, %c1_39, %c0_40] : memref<10x10x32xf32, #tpu.memory_space<vmem>>, vector<8x8x32xf32>
    %64 = vector.extract_strided_slice %57 {offsets = [1, 0], sizes = [1, 32], strides = [1, 1]} : vector<9x32xf32> to vector<1x32xf32>
    %65 = vector.shape_cast %64 : vector<1x32xf32> to vector<1x1x32xf32>
    %66 = vector.broadcast %65 : vector<1x1x32xf32> to vector<8x8x32xf32>
    %67 = arith.mulf %63, %66 : vector<8x8x32xf32>
    %68 = arith.addf %62, %67 : vector<8x8x32xf32>
    %c0_41 = arith.constant 0 : index
    %c2 = arith.constant 2 : index
    %c0_42 = arith.constant 0 : index
    %69 = vector.load %arg28[%c0_41, %c2, %c0_42] : memref<10x10x32xf32, #tpu.memory_space<vmem>>, vector<8x8x32xf32>
    %70 = vector.extract_strided_slice %57 {offsets = [2, 0], sizes = [1, 32], strides = [1, 1]} : vector<9x32xf32> to vector<1x32xf32>
    %71 = vector.shape_cast %70 : vector<1x32xf32> to vector<1x1x32xf32>
    %72 = vector.broadcast %71 : vector<1x1x32xf32> to vector<8x8x32xf32>
    %73 = arith.mulf %69, %72 : vector<8x8x32xf32>
    %74 = arith.addf %68, %73 : vector<8x8x32xf32>
    %c1_43 = arith.constant 1 : index
    %c0_44 = arith.constant 0 : index
    %c0_45 = arith.constant 0 : index
    %75 = vector.load %arg28[%c1_43, %c0_44, %c0_45] : memref<10x10x32xf32, #tpu.memory_space<vmem>>, vector<8x8x32xf32>
    %76 = vector.extract_strided_slice %57 {offsets = [3, 0], sizes = [1, 32], strides = [1, 1]} : vector<9x32xf32> to vector<1x32xf32>
    %77 = vector.shape_cast %76 : vector<1x32xf32> to vector<1x1x32xf32>
    %78 = vector.broadcast %77 : vector<1x1x32xf32> to vector<8x8x32xf32>
    %79 = arith.mulf %75, %78 : vector<8x8x32xf32>
    %80 = arith.addf %74, %79 : vector<8x8x32xf32>
    %c1_46 = arith.constant 1 : index
    %c1_47 = arith.constant 1 : index
    %c0_48 = arith.constant 0 : index
    %81 = vector.load %arg28[%c1_46, %c1_47, %c0_48] : memref<10x10x32xf32, #tpu.memory_space<vmem>>, vector<8x8x32xf32>
    %82 = vector.extract_strided_slice %57 {offsets = [4, 0], sizes = [1, 32], strides = [1, 1]} : vector<9x32xf32> to vector<1x32xf32>
    %83 = vector.shape_cast %82 : vector<1x32xf32> to vector<1x1x32xf32>
    %84 = vector.broadcast %83 : vector<1x1x32xf32> to vector<8x8x32xf32>
    %85 = arith.mulf %81, %84 : vector<8x8x32xf32>
    %86 = arith.addf %80, %85 : vector<8x8x32xf32>
    %c1_49 = arith.constant 1 : index
    %c2_50 = arith.constant 2 : index
    %c0_51 = arith.constant 0 : index
    %87 = vector.load %arg28[%c1_49, %c2_50, %c0_51] : memref<10x10x32xf32, #tpu.memory_space<vmem>>, vector<8x8x32xf32>
    %88 = vector.extract_strided_slice %57 {offsets = [5, 0], sizes = [1, 32], strides = [1, 1]} : vector<9x32xf32> to vector<1x32xf32>
    %89 = vector.shape_cast %88 : vector<1x32xf32> to vector<1x1x32xf32>
    %90 = vector.broadcast %89 : vector<1x1x32xf32> to vector<8x8x32xf32>
    %91 = arith.mulf %87, %90 : vector<8x8x32xf32>
    %92 = arith.addf %86, %91 : vector<8x8x32xf32>
    %c2_52 = arith.constant 2 : index
    %c0_53 = arith.constant 0 : index
    %c0_54 = arith.constant 0 : index
    %93 = vector.load %arg28[%c2_52, %c0_53, %c0_54] : memref<10x10x32xf32, #tpu.memory_space<vmem>>, vector<8x8x32xf32>
    %94 = vector.extract_strided_slice %57 {offsets = [6, 0], sizes = [1, 32], strides = [1, 1]} : vector<9x32xf32> to vector<1x32xf32>
    %95 = vector.shape_cast %94 : vector<1x32xf32> to vector<1x1x32xf32>
    %96 = vector.broadcast %95 : vector<1x1x32xf32> to vector<8x8x32xf32>
    %97 = arith.mulf %93, %96 : vector<8x8x32xf32>
    %98 = arith.addf %92, %97 : vector<8x8x32xf32>
    %c2_55 = arith.constant 2 : index
    %c1_56 = arith.constant 1 : index
    %c0_57 = arith.constant 0 : index
    %99 = vector.load %arg28[%c2_55, %c1_56, %c0_57] : memref<10x10x32xf32, #tpu.memory_space<vmem>>, vector<8x8x32xf32>
    %100 = vector.extract_strided_slice %57 {offsets = [7, 0], sizes = [1, 32], strides = [1, 1]} : vector<9x32xf32> to vector<1x32xf32>
    %101 = vector.shape_cast %100 : vector<1x32xf32> to vector<1x1x32xf32>
    %102 = vector.broadcast %101 : vector<1x1x32xf32> to vector<8x8x32xf32>
    %103 = arith.mulf %99, %102 : vector<8x8x32xf32>
    %104 = arith.addf %98, %103 : vector<8x8x32xf32>
    %c2_58 = arith.constant 2 : index
    %c2_59 = arith.constant 2 : index
    %c0_60 = arith.constant 0 : index
    %105 = vector.load %arg28[%c2_58, %c2_59, %c0_60] : memref<10x10x32xf32, #tpu.memory_space<vmem>>, vector<8x8x32xf32>
    %106 = vector.extract_strided_slice %57 {offsets = [8, 0], sizes = [1, 32], strides = [1, 1]} : vector<9x32xf32> to vector<1x32xf32>
    %107 = vector.shape_cast %106 : vector<1x32xf32> to vector<1x1x32xf32>
    %108 = vector.broadcast %107 : vector<1x1x32xf32> to vector<8x8x32xf32>
    %109 = arith.mulf %105, %108 : vector<8x8x32xf32>
    %110 = arith.addf %104, %109 : vector<8x8x32xf32>
    %111 = vector.shape_cast %110 : vector<8x8x32xf32> to vector<64x32xf32>
    %c0_61 = arith.constant 0 : index
    %c0_62 = arith.constant 0 : index
    %112 = vector.load %arg7[%c0_61, %c0_62] : memref<1x32xf32, #tpu.memory_space<vmem>>, vector<1x32xf32>
    %c0_63 = arith.constant 0 : index
    %c0_64 = arith.constant 0 : index
    %113 = vector.load %arg8[%c0_63, %c0_64] : memref<1x32xf32, #tpu.memory_space<vmem>>, vector<1x32xf32>
    %cst_65 = arith.constant dense<0.000000e+00> : vector<64xf32>
    %114 = vector.multi_reduction <add>, %111, %cst_65 [1] : vector<64x32xf32> to vector<64xf32>
    %115 = vector.shape_cast %114 : vector<64xf32> to vector<64x1xf32>
    %cst_66 = arith.constant 3.200000e+01 : f32
    %116 = vector.broadcast %cst_66 : f32 to vector<64x1xf32>
    %117 = arith.divf %115, %116 : vector<64x1xf32>
    %118 = vector.broadcast %117 : vector<64x1xf32> to vector<64x32xf32>
    %119 = arith.subf %111, %118 : vector<64x32xf32>
    %120 = arith.mulf %119, %119 : vector<64x32xf32>
    %cst_67 = arith.constant dense<0.000000e+00> : vector<64xf32>
    %121 = vector.multi_reduction <add>, %120, %cst_67 [1] : vector<64x32xf32> to vector<64xf32>
    %122 = vector.shape_cast %121 : vector<64xf32> to vector<64x1xf32>
    %cst_68 = arith.constant 3.200000e+01 : f32
    %123 = vector.broadcast %cst_68 : f32 to vector<64x1xf32>
    %124 = arith.divf %122, %123 : vector<64x1xf32>
    %125 = vector.broadcast %117 : vector<64x1xf32> to vector<64x32xf32>
    %126 = arith.subf %111, %125 : vector<64x32xf32>
    %cst_69 = arith.constant 9.99999974E-6 : f32
    %127 = vector.broadcast %cst_69 : f32 to vector<64x1xf32>
    %128 = arith.addf %124, %127 : vector<64x1xf32>
    %129 = math.rsqrt %128 : vector<64x1xf32>
    %130 = vector.broadcast %129 : vector<64x1xf32> to vector<64x32xf32>
    %131 = arith.mulf %126, %130 : vector<64x32xf32>
    %132 = vector.broadcast %112 : vector<1x32xf32> to vector<64x32xf32>
    %133 = arith.mulf %131, %132 : vector<64x32xf32>
    %134 = vector.broadcast %113 : vector<1x32xf32> to vector<64x32xf32>
    %135 = arith.addf %133, %134 : vector<64x32xf32>
    %cst_70 = arith.constant 3.000000e+00 : f32
    %136 = vector.broadcast %cst_70 : f32 to vector<64x32xf32>
    %137 = arith.addf %135, %136 : vector<64x32xf32>
    %cst_71 = arith.constant 0.000000e+00 : f32
    %cst_72 = arith.constant 6.000000e+00 : f32
    %138 = vector.broadcast %cst_71 : f32 to vector<64x32xf32>
    %139 = arith.maximumf %138, %137 : vector<64x32xf32>
    %140 = vector.broadcast %cst_72 : f32 to vector<64x32xf32>
    %141 = arith.minimumf %140, %139 : vector<64x32xf32>
    %142 = arith.mulf %135, %141 : vector<64x32xf32>
    %cst_73 = arith.constant 0.166666672 : f32
    %143 = vector.broadcast %cst_73 : f32 to vector<64x32xf32>
    %144 = arith.mulf %142, %143 : vector<64x32xf32>
    %cst_74 = arith.constant dense<0.000000e+00> : vector<32xf32>
    %145 = vector.multi_reduction <add>, %144, %cst_74 [0] : vector<64x32xf32> to vector<32xf32>
    %146 = vector.shape_cast %145 : vector<32xf32> to vector<1x32xf32>
    %cst_75 = arith.constant 6.400000e+01 : f32
    %147 = vector.broadcast %cst_75 : f32 to vector<1x32xf32>
    %148 = arith.divf %146, %147 : vector<1x32xf32>
    %c0_76 = arith.constant 0 : index
    %c0_77 = arith.constant 0 : index
    %149 = vector.load %arg9[%c0_76, %c0_77] : memref<8x32xf32, #tpu.memory_space<vmem>>, vector<8x32xf32>
    %150 = vector.broadcast %148 : vector<1x32xf32> to vector<8x32xf32>
    %151 = arith.mulf %149, %150 : vector<8x32xf32>
    %cst_78 = arith.constant dense<0.000000e+00> : vector<8xf32>
    %152 = vector.multi_reduction <add>, %151, %cst_78 [1] : vector<8x32xf32> to vector<8xf32>
    %153 = vector.shape_cast %152 : vector<8xf32> to vector<8x1xf32>
    %c0_79 = arith.constant 0 : index
    %c0_80 = arith.constant 0 : index
    %154 = vector.load %arg10[%c0_79, %c0_80] : memref<8x1xf32, #tpu.memory_space<vmem>>, vector<8x1xf32>
    %155 = arith.addf %153, %154 : vector<8x1xf32>
    %cst_81 = arith.constant 0.000000e+00 : f32
    %156 = vector.broadcast %cst_81 : f32 to vector<8x1xf32>
    %157 = arith.maximumf %155, %156 : vector<8x1xf32>
    %c0_82 = arith.constant 0 : index
    %c0_83 = arith.constant 0 : index
    %158 = vector.load %arg11[%c0_82, %c0_83] : memref<8x32xf32, #tpu.memory_space<vmem>>, vector<8x32xf32>
    %159 = vector.broadcast %157 : vector<8x1xf32> to vector<8x32xf32>
    %160 = arith.mulf %159, %158 : vector<8x32xf32>
    %cst_84 = arith.constant dense<0.000000e+00> : vector<32xf32>
    %161 = vector.multi_reduction <add>, %160, %cst_84 [0] : vector<8x32xf32> to vector<32xf32>
    %162 = vector.shape_cast %161 : vector<32xf32> to vector<1x32xf32>
    %c0_85 = arith.constant 0 : index
    %c0_86 = arith.constant 0 : index
    %163 = vector.load %arg12[%c0_85, %c0_86] : memref<1x32xf32, #tpu.memory_space<vmem>>, vector<1x32xf32>
    %164 = arith.addf %162, %163 : vector<1x32xf32>
    %cst_87 = arith.constant 3.000000e+00 : f32
    %165 = vector.broadcast %cst_87 : f32 to vector<1x32xf32>
    %166 = arith.addf %164, %165 : vector<1x32xf32>
    %cst_88 = arith.constant 0.000000e+00 : f32
    %cst_89 = arith.constant 6.000000e+00 : f32
    %167 = vector.broadcast %cst_88 : f32 to vector<1x32xf32>
    %168 = arith.maximumf %167, %166 : vector<1x32xf32>
    %169 = vector.broadcast %cst_89 : f32 to vector<1x32xf32>
    %170 = arith.minimumf %169, %168 : vector<1x32xf32>
    %cst_90 = arith.constant 0.166666672 : f32
    %171 = vector.broadcast %cst_90 : f32 to vector<1x32xf32>
    %172 = arith.mulf %170, %171 : vector<1x32xf32>
    %173 = vector.broadcast %172 : vector<1x32xf32> to vector<64x32xf32>
    %174 = arith.mulf %144, %173 : vector<64x32xf32>
    %c0_91 = arith.constant 0 : index
    %c0_92 = arith.constant 0 : index
    %175 = vector.load %arg13[%c0_91, %c0_92] : memref<32x32xf32, #tpu.memory_space<vmem>>, vector<32x32xf32>
    %cst_93 = arith.constant dense<0.000000e+00> : vector<64x32xf32>
    %176 = tpu.matmul %174, %175, %cst_93 {dimension_numbers = #tpu.dot_dimension_numbers<[1], [0], [0], [1], [0, 0, 1, 1], [], []>} : vector<64x32xf32>, vector<32x32xf32>, vector<64x32xf32> -> vector<64x32xf32>
    %c0_94 = arith.constant 0 : index
    %c0_95 = arith.constant 0 : index
    %177 = vector.load %arg14[%c0_94, %c0_95] : memref<1x32xf32, #tpu.memory_space<vmem>>, vector<1x32xf32>
    %c0_96 = arith.constant 0 : index
    %c0_97 = arith.constant 0 : index
    %178 = vector.load %arg15[%c0_96, %c0_97] : memref<1x32xf32, #tpu.memory_space<vmem>>, vector<1x32xf32>
    %cst_98 = arith.constant dense<0.000000e+00> : vector<64xf32>
    %179 = vector.multi_reduction <add>, %176, %cst_98 [1] : vector<64x32xf32> to vector<64xf32>
    %180 = vector.shape_cast %179 : vector<64xf32> to vector<64x1xf32>
    %cst_99 = arith.constant 3.200000e+01 : f32
    %181 = vector.broadcast %cst_99 : f32 to vector<64x1xf32>
    %182 = arith.divf %180, %181 : vector<64x1xf32>
    %183 = vector.broadcast %182 : vector<64x1xf32> to vector<64x32xf32>
    %184 = arith.subf %176, %183 : vector<64x32xf32>
    %185 = arith.mulf %184, %184 : vector<64x32xf32>
    %cst_100 = arith.constant dense<0.000000e+00> : vector<64xf32>
    %186 = vector.multi_reduction <add>, %185, %cst_100 [1] : vector<64x32xf32> to vector<64xf32>
    %187 = vector.shape_cast %186 : vector<64xf32> to vector<64x1xf32>
    %cst_101 = arith.constant 3.200000e+01 : f32
    %188 = vector.broadcast %cst_101 : f32 to vector<64x1xf32>
    %189 = arith.divf %187, %188 : vector<64x1xf32>
    %190 = vector.broadcast %182 : vector<64x1xf32> to vector<64x32xf32>
    %191 = arith.subf %176, %190 : vector<64x32xf32>
    %cst_102 = arith.constant 9.99999974E-6 : f32
    %192 = vector.broadcast %cst_102 : f32 to vector<64x1xf32>
    %193 = arith.addf %189, %192 : vector<64x1xf32>
    %194 = math.rsqrt %193 : vector<64x1xf32>
    %195 = vector.broadcast %194 : vector<64x1xf32> to vector<64x32xf32>
    %196 = arith.mulf %191, %195 : vector<64x32xf32>
    %197 = vector.broadcast %177 : vector<1x32xf32> to vector<64x32xf32>
    %198 = arith.mulf %196, %197 : vector<64x32xf32>
    %199 = vector.broadcast %178 : vector<1x32xf32> to vector<64x32xf32>
    %200 = arith.addf %198, %199 : vector<64x32xf32>
    %201 = arith.addf %200, %52 : vector<64x32xf32>
    %c0_103 = arith.constant 0 : index
    %c0_104 = arith.constant 0 : index
    %202 = vector.load %arg26[%c0_103, %c0_104] : memref<144x64xf32, #tpu.memory_space<vmem>>, vector<144x64xf32>
    %cst_105 = arith.constant dense<0.000000e+00> : vector<144x32xf32>
    %203 = tpu.matmul %202, %201, %cst_105 {dimension_numbers = #tpu.dot_dimension_numbers<[1], [0], [0], [1], [0, 0, 1, 1], [], []>} : vector<144x64xf32>, vector<64x32xf32>, vector<144x32xf32> -> vector<144x32xf32>
    %c0_106 = arith.constant 0 : index
    %c0_107 = arith.constant 0 : index
    %204 = vector.load %arg16[%c0_106, %c0_107] : memref<9x32xf32, #tpu.memory_space<vmem>>, vector<9x32xf32>
    %205 = vector.extract_strided_slice %203 {offsets = [0, 0], sizes = [16, 32], strides = [1, 1]} : vector<144x32xf32> to vector<16x32xf32>
    %206 = vector.extract_strided_slice %204 {offsets = [0, 0], sizes = [1, 32], strides = [1, 1]} : vector<9x32xf32> to vector<1x32xf32>
    %207 = vector.broadcast %206 : vector<1x32xf32> to vector<16x32xf32>
    %208 = arith.mulf %205, %207 : vector<16x32xf32>
    %209 = vector.extract_strided_slice %203 {offsets = [16, 0], sizes = [16, 32], strides = [1, 1]} : vector<144x32xf32> to vector<16x32xf32>
    %210 = vector.extract_strided_slice %204 {offsets = [1, 0], sizes = [1, 32], strides = [1, 1]} : vector<9x32xf32> to vector<1x32xf32>
    %211 = vector.broadcast %210 : vector<1x32xf32> to vector<16x32xf32>
    %212 = arith.mulf %209, %211 : vector<16x32xf32>
    %213 = arith.addf %208, %212 : vector<16x32xf32>
    %214 = vector.extract_strided_slice %203 {offsets = [32, 0], sizes = [16, 32], strides = [1, 1]} : vector<144x32xf32> to vector<16x32xf32>
    %215 = vector.extract_strided_slice %204 {offsets = [2, 0], sizes = [1, 32], strides = [1, 1]} : vector<9x32xf32> to vector<1x32xf32>
    %216 = vector.broadcast %215 : vector<1x32xf32> to vector<16x32xf32>
    %217 = arith.mulf %214, %216 : vector<16x32xf32>
    %218 = arith.addf %213, %217 : vector<16x32xf32>
    %219 = vector.extract_strided_slice %203 {offsets = [48, 0], sizes = [16, 32], strides = [1, 1]} : vector<144x32xf32> to vector<16x32xf32>
    %220 = vector.extract_strided_slice %204 {offsets = [3, 0], sizes = [1, 32], strides = [1, 1]} : vector<9x32xf32> to vector<1x32xf32>
    %221 = vector.broadcast %220 : vector<1x32xf32> to vector<16x32xf32>
    %222 = arith.mulf %219, %221 : vector<16x32xf32>
    %223 = arith.addf %218, %222 : vector<16x32xf32>
    %224 = vector.extract_strided_slice %203 {offsets = [64, 0], sizes = [16, 32], strides = [1, 1]} : vector<144x32xf32> to vector<16x32xf32>
    %225 = vector.extract_strided_slice %204 {offsets = [4, 0], sizes = [1, 32], strides = [1, 1]} : vector<9x32xf32> to vector<1x32xf32>
    %226 = vector.broadcast %225 : vector<1x32xf32> to vector<16x32xf32>
    %227 = arith.mulf %224, %226 : vector<16x32xf32>
    %228 = arith.addf %223, %227 : vector<16x32xf32>
    %229 = vector.extract_strided_slice %203 {offsets = [80, 0], sizes = [16, 32], strides = [1, 1]} : vector<144x32xf32> to vector<16x32xf32>
    %230 = vector.extract_strided_slice %204 {offsets = [5, 0], sizes = [1, 32], strides = [1, 1]} : vector<9x32xf32> to vector<1x32xf32>
    %231 = vector.broadcast %230 : vector<1x32xf32> to vector<16x32xf32>
    %232 = arith.mulf %229, %231 : vector<16x32xf32>
    %233 = arith.addf %228, %232 : vector<16x32xf32>
    %234 = vector.extract_strided_slice %203 {offsets = [96, 0], sizes = [16, 32], strides = [1, 1]} : vector<144x32xf32> to vector<16x32xf32>
    %235 = vector.extract_strided_slice %204 {offsets = [6, 0], sizes = [1, 32], strides = [1, 1]} : vector<9x32xf32> to vector<1x32xf32>
    %236 = vector.broadcast %235 : vector<1x32xf32> to vector<16x32xf32>
    %237 = arith.mulf %234, %236 : vector<16x32xf32>
    %238 = arith.addf %233, %237 : vector<16x32xf32>
    %239 = vector.extract_strided_slice %203 {offsets = [112, 0], sizes = [16, 32], strides = [1, 1]} : vector<144x32xf32> to vector<16x32xf32>
    %240 = vector.extract_strided_slice %204 {offsets = [7, 0], sizes = [1, 32], strides = [1, 1]} : vector<9x32xf32> to vector<1x32xf32>
    %241 = vector.broadcast %240 : vector<1x32xf32> to vector<16x32xf32>
    %242 = arith.mulf %239, %241 : vector<16x32xf32>
    %243 = arith.addf %238, %242 : vector<16x32xf32>
    %244 = vector.extract_strided_slice %203 {offsets = [128, 0], sizes = [16, 32], strides = [1, 1]} : vector<144x32xf32> to vector<16x32xf32>
    %245 = vector.extract_strided_slice %204 {offsets = [8, 0], sizes = [1, 32], strides = [1, 1]} : vector<9x32xf32> to vector<1x32xf32>
    %246 = vector.broadcast %245 : vector<1x32xf32> to vector<16x32xf32>
    %247 = arith.mulf %244, %246 : vector<16x32xf32>
    %248 = arith.addf %243, %247 : vector<16x32xf32>
    %c0_108 = arith.constant 0 : index
    %c0_109 = arith.constant 0 : index
    %249 = vector.load %arg17[%c0_108, %c0_109] : memref<1x32xf32, #tpu.memory_space<vmem>>, vector<1x32xf32>
    %c0_110 = arith.constant 0 : index
    %c0_111 = arith.constant 0 : index
    %250 = vector.load %arg18[%c0_110, %c0_111] : memref<1x32xf32, #tpu.memory_space<vmem>>, vector<1x32xf32>
    %cst_112 = arith.constant dense<0.000000e+00> : vector<16xf32>
    %251 = vector.multi_reduction <add>, %248, %cst_112 [1] : vector<16x32xf32> to vector<16xf32>
    %252 = vector.shape_cast %251 : vector<16xf32> to vector<16x1xf32>
    %cst_113 = arith.constant 3.200000e+01 : f32
    %253 = vector.broadcast %cst_113 : f32 to vector<16x1xf32>
    %254 = arith.divf %252, %253 : vector<16x1xf32>
    %255 = vector.broadcast %254 : vector<16x1xf32> to vector<16x32xf32>
    %256 = arith.subf %248, %255 : vector<16x32xf32>
    %257 = arith.mulf %256, %256 : vector<16x32xf32>
    %cst_114 = arith.constant dense<0.000000e+00> : vector<16xf32>
    %258 = vector.multi_reduction <add>, %257, %cst_114 [1] : vector<16x32xf32> to vector<16xf32>
    %259 = vector.shape_cast %258 : vector<16xf32> to vector<16x1xf32>
    %cst_115 = arith.constant 3.200000e+01 : f32
    %260 = vector.broadcast %cst_115 : f32 to vector<16x1xf32>
    %261 = arith.divf %259, %260 : vector<16x1xf32>
    %262 = vector.broadcast %254 : vector<16x1xf32> to vector<16x32xf32>
    %263 = arith.subf %248, %262 : vector<16x32xf32>
    %cst_116 = arith.constant 9.99999974E-6 : f32
    %264 = vector.broadcast %cst_116 : f32 to vector<16x1xf32>
    %265 = arith.addf %261, %264 : vector<16x1xf32>
    %266 = math.rsqrt %265 : vector<16x1xf32>
    %267 = vector.broadcast %266 : vector<16x1xf32> to vector<16x32xf32>
    %268 = arith.mulf %263, %267 : vector<16x32xf32>
    %269 = vector.broadcast %249 : vector<1x32xf32> to vector<16x32xf32>
    %270 = arith.mulf %268, %269 : vector<16x32xf32>
    %271 = vector.broadcast %250 : vector<1x32xf32> to vector<16x32xf32>
    %272 = arith.addf %270, %271 : vector<16x32xf32>
    %cst_117 = arith.constant 3.000000e+00 : f32
    %273 = vector.broadcast %cst_117 : f32 to vector<16x32xf32>
    %274 = arith.addf %272, %273 : vector<16x32xf32>
    %cst_118 = arith.constant 0.000000e+00 : f32
    %cst_119 = arith.constant 6.000000e+00 : f32
    %275 = vector.broadcast %cst_118 : f32 to vector<16x32xf32>
    %276 = arith.maximumf %275, %274 : vector<16x32xf32>
    %277 = vector.broadcast %cst_119 : f32 to vector<16x32xf32>
    %278 = arith.minimumf %277, %276 : vector<16x32xf32>
    %279 = arith.mulf %272, %278 : vector<16x32xf32>
    %cst_120 = arith.constant 0.166666672 : f32
    %280 = vector.broadcast %cst_120 : f32 to vector<16x32xf32>
    %281 = arith.mulf %279, %280 : vector<16x32xf32>
    %cst_121 = arith.constant dense<0.000000e+00> : vector<32xf32>
    %282 = vector.multi_reduction <add>, %281, %cst_121 [0] : vector<16x32xf32> to vector<32xf32>
    %283 = vector.shape_cast %282 : vector<32xf32> to vector<1x32xf32>
    %cst_122 = arith.constant 1.600000e+01 : f32
    %284 = vector.broadcast %cst_122 : f32 to vector<1x32xf32>
    %285 = arith.divf %283, %284 : vector<1x32xf32>
    %c0_123 = arith.constant 0 : index
    %c0_124 = arith.constant 0 : index
    %286 = vector.load %arg19[%c0_123, %c0_124] : memref<8x32xf32, #tpu.memory_space<vmem>>, vector<8x32xf32>
    %287 = vector.broadcast %285 : vector<1x32xf32> to vector<8x32xf32>
    %288 = arith.mulf %286, %287 : vector<8x32xf32>
    %cst_125 = arith.constant dense<0.000000e+00> : vector<8xf32>
    %289 = vector.multi_reduction <add>, %288, %cst_125 [1] : vector<8x32xf32> to vector<8xf32>
    %290 = vector.shape_cast %289 : vector<8xf32> to vector<8x1xf32>
    %c0_126 = arith.constant 0 : index
    %c0_127 = arith.constant 0 : index
    %291 = vector.load %arg20[%c0_126, %c0_127] : memref<8x1xf32, #tpu.memory_space<vmem>>, vector<8x1xf32>
    %292 = arith.addf %290, %291 : vector<8x1xf32>
    %cst_128 = arith.constant 0.000000e+00 : f32
    %293 = vector.broadcast %cst_128 : f32 to vector<8x1xf32>
    %294 = arith.maximumf %292, %293 : vector<8x1xf32>
    %c0_129 = arith.constant 0 : index
    %c0_130 = arith.constant 0 : index
    %295 = vector.load %arg21[%c0_129, %c0_130] : memref<8x32xf32, #tpu.memory_space<vmem>>, vector<8x32xf32>
    %296 = vector.broadcast %294 : vector<8x1xf32> to vector<8x32xf32>
    %297 = arith.mulf %296, %295 : vector<8x32xf32>
    %cst_131 = arith.constant dense<0.000000e+00> : vector<32xf32>
    %298 = vector.multi_reduction <add>, %297, %cst_131 [0] : vector<8x32xf32> to vector<32xf32>
    %299 = vector.shape_cast %298 : vector<32xf32> to vector<1x32xf32>
    %c0_132 = arith.constant 0 : index
    %c0_133 = arith.constant 0 : index
    %300 = vector.load %arg22[%c0_132, %c0_133] : memref<1x32xf32, #tpu.memory_space<vmem>>, vector<1x32xf32>
    %301 = arith.addf %299, %300 : vector<1x32xf32>
    %cst_134 = arith.constant 3.000000e+00 : f32
    %302 = vector.broadcast %cst_134 : f32 to vector<1x32xf32>
    %303 = arith.addf %301, %302 : vector<1x32xf32>
    %cst_135 = arith.constant 0.000000e+00 : f32
    %cst_136 = arith.constant 6.000000e+00 : f32
    %304 = vector.broadcast %cst_135 : f32 to vector<1x32xf32>
    %305 = arith.maximumf %304, %303 : vector<1x32xf32>
    %306 = vector.broadcast %cst_136 : f32 to vector<1x32xf32>
    %307 = arith.minimumf %306, %305 : vector<1x32xf32>
    %cst_137 = arith.constant 0.166666672 : f32
    %308 = vector.broadcast %cst_137 : f32 to vector<1x32xf32>
    %309 = arith.mulf %307, %308 : vector<1x32xf32>
    %310 = vector.broadcast %309 : vector<1x32xf32> to vector<16x32xf32>
    %311 = arith.mulf %281, %310 : vector<16x32xf32>
    %c0_138 = arith.constant 0 : index
    %c0_139 = arith.constant 0 : index
    %312 = vector.load %arg23[%c0_138, %c0_139] : memref<32x32xf32, #tpu.memory_space<vmem>>, vector<32x32xf32>
    %cst_140 = arith.constant dense<0.000000e+00> : vector<16x32xf32>
    %313 = tpu.matmul %311, %312, %cst_140 {dimension_numbers = #tpu.dot_dimension_numbers<[1], [0], [0], [1], [0, 0, 1, 1], [], []>} : vector<16x32xf32>, vector<32x32xf32>, vector<16x32xf32> -> vector<16x32xf32>
    %c0_141 = arith.constant 0 : index
    %c0_142 = arith.constant 0 : index
    %314 = vector.load %arg24[%c0_141, %c0_142] : memref<1x32xf32, #tpu.memory_space<vmem>>, vector<1x32xf32>
    %c0_143 = arith.constant 0 : index
    %c0_144 = arith.constant 0 : index
    %315 = vector.load %arg25[%c0_143, %c0_144] : memref<1x32xf32, #tpu.memory_space<vmem>>, vector<1x32xf32>
    %cst_145 = arith.constant dense<0.000000e+00> : vector<16xf32>
    %316 = vector.multi_reduction <add>, %313, %cst_145 [1] : vector<16x32xf32> to vector<16xf32>
    %317 = vector.shape_cast %316 : vector<16xf32> to vector<16x1xf32>
    %cst_146 = arith.constant 3.200000e+01 : f32
    %318 = vector.broadcast %cst_146 : f32 to vector<16x1xf32>
    %319 = arith.divf %317, %318 : vector<16x1xf32>
    %320 = vector.broadcast %319 : vector<16x1xf32> to vector<16x32xf32>
    %321 = arith.subf %313, %320 : vector<16x32xf32>
    %322 = arith.mulf %321, %321 : vector<16x32xf32>
    %cst_147 = arith.constant dense<0.000000e+00> : vector<16xf32>
    %323 = vector.multi_reduction <add>, %322, %cst_147 [1] : vector<16x32xf32> to vector<16xf32>
    %324 = vector.shape_cast %323 : vector<16xf32> to vector<16x1xf32>
    %cst_148 = arith.constant 3.200000e+01 : f32
    %325 = vector.broadcast %cst_148 : f32 to vector<16x1xf32>
    %326 = arith.divf %324, %325 : vector<16x1xf32>
    %327 = vector.broadcast %319 : vector<16x1xf32> to vector<16x32xf32>
    %328 = arith.subf %313, %327 : vector<16x32xf32>
    %cst_149 = arith.constant 9.99999974E-6 : f32
    %329 = vector.broadcast %cst_149 : f32 to vector<16x1xf32>
    %330 = arith.addf %326, %329 : vector<16x1xf32>
    %331 = math.rsqrt %330 : vector<16x1xf32>
    %332 = vector.broadcast %331 : vector<16x1xf32> to vector<16x32xf32>
    %333 = arith.mulf %328, %332 : vector<16x32xf32>
    %334 = vector.broadcast %314 : vector<1x32xf32> to vector<16x32xf32>
    %335 = arith.mulf %333, %334 : vector<16x32xf32>
    %336 = vector.broadcast %315 : vector<1x32xf32> to vector<16x32xf32>
    %337 = arith.addf %335, %336 : vector<16x32xf32>
    %c0_150 = arith.constant 0 : index
    %c0_151 = arith.constant 0 : index
    %c0_152 = arith.constant 0 : index
    %338 = vector.load %arg27[%c0_150, %c0_151, %c0_152] : memref<1x16x32xf32, #tpu.memory_space<vmem>>, vector<1x16x32xf32>
    %339 = vector.shape_cast %338 : vector<1x16x32xf32> to vector<16x32xf32>
    %340 = vector.shape_cast %337 : vector<16x32xf32> to vector<1x16x32xf32>
    tpu.vector_store %arg27[%c0_150, %c0_151, %c0_152], %340 {strides = array<i32>} : memref<1x16x32xf32, #tpu.memory_space<vmem>>, vector<1x16x32xf32>,
    return
  }
  func.func @transform_0(%arg0: i32) -> (i32, i32, i32) {
    %c0_i32 = arith.constant 0 : i32
    %c0_i32_0 = arith.constant 0 : i32
    %c0_i32_1 = arith.constant 0 : i32
    return %arg0, %c0_i32, %c0_i32_0 : i32, i32, i32
  }
  func.func @transform_1(%arg0: i32) -> (i32, i32) {
    %c0_i32 = arith.constant 0 : i32
    %c0_i32_0 = arith.constant 0 : i32
    %c0_i32_1 = arith.constant 0 : i32
    return %c0_i32, %c0_i32_0 : i32, i32
  }
  func.func @transform_2(%arg0: i32) -> (i32, i32) {
    %c0_i32 = arith.constant 0 : i32
    %c0_i32_0 = arith.constant 0 : i32
    %c0_i32_1 = arith.constant 0 : i32
    return %c0_i32, %c0_i32_0 : i32, i32
  }
  func.func @transform_3(%arg0: i32) -> (i32, i32) {
    %c0_i32 = arith.constant 0 : i32
    %c0_i32_0 = arith.constant 0 : i32
    %c0_i32_1 = arith.constant 0 : i32
    return %c0_i32, %c0_i32_0 : i32, i32
  }
  func.func @transform_4(%arg0: i32) -> (i32, i32) {
    %c0_i32 = arith.constant 0 : i32
    %c0_i32_0 = arith.constant 0 : i32
    %c0_i32_1 = arith.constant 0 : i32
    return %c0_i32, %c0_i32_0 : i32, i32
  }
  func.func @transform_5(%arg0: i32) -> (i32, i32) {
    %c0_i32 = arith.constant 0 : i32
    %c0_i32_0 = arith.constant 0 : i32
    %c0_i32_1 = arith.constant 0 : i32
    return %c0_i32, %c0_i32_0 : i32, i32
  }
  func.func @transform_6(%arg0: i32) -> (i32, i32) {
    %c0_i32 = arith.constant 0 : i32
    %c0_i32_0 = arith.constant 0 : i32
    %c0_i32_1 = arith.constant 0 : i32
    return %c0_i32, %c0_i32_0 : i32, i32
  }
  func.func @transform_7(%arg0: i32) -> (i32, i32) {
    %c0_i32 = arith.constant 0 : i32
    %c0_i32_0 = arith.constant 0 : i32
    %c0_i32_1 = arith.constant 0 : i32
    return %c0_i32, %c0_i32_0 : i32, i32
  }
  func.func @transform_8(%arg0: i32) -> (i32, i32) {
    %c0_i32 = arith.constant 0 : i32
    %c0_i32_0 = arith.constant 0 : i32
    %c0_i32_1 = arith.constant 0 : i32
    return %c0_i32, %c0_i32_0 : i32, i32
  }
  func.func @transform_9(%arg0: i32) -> (i32, i32) {
    %c0_i32 = arith.constant 0 : i32
    %c0_i32_0 = arith.constant 0 : i32
    %c0_i32_1 = arith.constant 0 : i32
    return %c0_i32, %c0_i32_0 : i32, i32
  }
  func.func @transform_10(%arg0: i32) -> (i32, i32) {
    %c0_i32 = arith.constant 0 : i32
    %c0_i32_0 = arith.constant 0 : i32
    %c0_i32_1 = arith.constant 0 : i32
    return %c0_i32, %c0_i32_0 : i32, i32
  }
  func.func @transform_11(%arg0: i32) -> (i32, i32) {
    %c0_i32 = arith.constant 0 : i32
    %c0_i32_0 = arith.constant 0 : i32
    %c0_i32_1 = arith.constant 0 : i32
    return %c0_i32, %c0_i32_0 : i32, i32
  }
  func.func @transform_12(%arg0: i32) -> (i32, i32) {
    %c0_i32 = arith.constant 0 : i32
    %c0_i32_0 = arith.constant 0 : i32
    %c0_i32_1 = arith.constant 0 : i32
    return %c0_i32, %c0_i32_0 : i32, i32
  }
  func.func @transform_13(%arg0: i32) -> (i32, i32) {
    %c0_i32 = arith.constant 0 : i32
    %c0_i32_0 = arith.constant 0 : i32
    %c0_i32_1 = arith.constant 0 : i32
    return %c0_i32, %c0_i32_0 : i32, i32
  }
  func.func @transform_14(%arg0: i32) -> (i32, i32) {
    %c0_i32 = arith.constant 0 : i32
    %c0_i32_0 = arith.constant 0 : i32
    %c0_i32_1 = arith.constant 0 : i32
    return %c0_i32, %c0_i32_0 : i32, i32
  }
  func.func @transform_15(%arg0: i32) -> (i32, i32) {
    %c0_i32 = arith.constant 0 : i32
    %c0_i32_0 = arith.constant 0 : i32
    %c0_i32_1 = arith.constant 0 : i32
    return %c0_i32, %c0_i32_0 : i32, i32
  }
  func.func @transform_16(%arg0: i32) -> (i32, i32) {
    %c0_i32 = arith.constant 0 : i32
    %c0_i32_0 = arith.constant 0 : i32
    %c0_i32_1 = arith.constant 0 : i32
    return %c0_i32, %c0_i32_0 : i32, i32
  }
  func.func @transform_17(%arg0: i32) -> (i32, i32) {
    %c0_i32 = arith.constant 0 : i32
    %c0_i32_0 = arith.constant 0 : i32
    %c0_i32_1 = arith.constant 0 : i32
    return %c0_i32, %c0_i32_0 : i32, i32
  }
  func.func @transform_18(%arg0: i32) -> (i32, i32) {
    %c0_i32 = arith.constant 0 : i32
    %c0_i32_0 = arith.constant 0 : i32
    %c0_i32_1 = arith.constant 0 : i32
    return %c0_i32, %c0_i32_0 : i32, i32
  }
  func.func @transform_19(%arg0: i32) -> (i32, i32) {
    %c0_i32 = arith.constant 0 : i32
    %c0_i32_0 = arith.constant 0 : i32
    %c0_i32_1 = arith.constant 0 : i32
    return %c0_i32, %c0_i32_0 : i32, i32
  }
  func.func @transform_20(%arg0: i32) -> (i32, i32) {
    %c0_i32 = arith.constant 0 : i32
    %c0_i32_0 = arith.constant 0 : i32
    %c0_i32_1 = arith.constant 0 : i32
    return %c0_i32, %c0_i32_0 : i32, i32
  }
  func.func @transform_21(%arg0: i32) -> (i32, i32) {
    %c0_i32 = arith.constant 0 : i32
    %c0_i32_0 = arith.constant 0 : i32
    %c0_i32_1 = arith.constant 0 : i32
    return %c0_i32, %c0_i32_0 : i32, i32
  }
  func.func @transform_22(%arg0: i32) -> (i32, i32) {
    %c0_i32 = arith.constant 0 : i32
    %c0_i32_0 = arith.constant 0 : i32
    %c0_i32_1 = arith.constant 0 : i32
    return %c0_i32, %c0_i32_0 : i32, i32
  }
  func.func @transform_23(%arg0: i32) -> (i32, i32) {
    %c0_i32 = arith.constant 0 : i32
    %c0_i32_0 = arith.constant 0 : i32
    %c0_i32_1 = arith.constant 0 : i32
    return %c0_i32, %c0_i32_0 : i32, i32
  }
  func.func @transform_24(%arg0: i32) -> (i32, i32) {
    %c0_i32 = arith.constant 0 : i32
    %c0_i32_0 = arith.constant 0 : i32
    %c0_i32_1 = arith.constant 0 : i32
    return %c0_i32, %c0_i32_0 : i32, i32
  }
  func.func @transform_25(%arg0: i32) -> (i32, i32) {
    %c0_i32 = arith.constant 0 : i32
    %c0_i32_0 = arith.constant 0 : i32
    %c0_i32_1 = arith.constant 0 : i32
    return %c0_i32, %c0_i32_0 : i32, i32
  }
  func.func @transform_26(%arg0: i32) -> (i32, i32, i32) {
    %c0_i32 = arith.constant 0 : i32
    %c0_i32_0 = arith.constant 0 : i32
    %c0_i32_1 = arith.constant 0 : i32
    return %arg0, %c0_i32, %c0_i32_0 : i32, i32, i32
  }
}

</mosaic_0001>

<bundles_post_ra>
// kernel: ldp_projector_forward.1
= control target key start
LH: loop header
LB: loop body
LE: loop exit
PB: predicated region body
PF: predicated region fallthrough
CT: control target
= control target key end

     0   :  { %s5243_s0 = inlined_call_operand.vmem [shape: f32[2,64,48], index: 0, kind: input, shape index: {}]   ;;  %s5244_s1 = inlined_call_operand.vmem [shape: f32[48,32], index: 1, kind: input, shape index: {}]   ;;  %s5245_s2 = inlined_call_operand.hbm [shape: f32[1,32], index: 2, kind: input, shape index: {}]   ;;  %s5246_s3 = inlined_call_operand.vmem [shape: f32[32,32], index: 3, kind: input, shape index: {}]   ;;  %s5247_s4 = inlined_call_operand.hbm [shape: f32[1,32], index: 4, kind: input, shape index: {}]   ;;  %s5248_s5 = inlined_call_operand.vmem [shape: f32[9,32], index: 5, kind: input, shape index: {}]   ;;  %s5249_s6 = inlined_call_operand.hbm [shape: f32[1,32], index: 6, kind: input, shape index: {}]   ;;  %s5250_s7 = inlined_call_operand.hbm [shape: f32[1,32], index: 7, kind: input, shape index: {}]   ;;  %s5251_s8 = inlined_call_operand.vmem [shape: f32[8,32], index: 8, kind: input, shape index: {}]   ;;  %s5252_s9 = inlined_call_operand.vmem [shape: f32[8,1], index: 9, kind: input, shape index: {}]   ;;  %s5253_s10 = inlined_call_operand.hbm [shape: f32[8,32], index: 10, kind: input, shape index: {}]   ;;  %s5254_s11 = inlined_call_operand.vmem [shape: f32[1,32], index: 11, kind: input, shape index: {}]   ;;  %s5255_s12 = inlined_call_operand.vmem [shape: f32[32,32], index: 12, kind: input, shape index: {}]   ;;  %s5256_s13 = inlined_call_operand.vmem [shape: f32[1,32], index: 13, kind: input, shape index: {}]   ;;  %s5257_s14 = inlined_call_operand.hbm [shape: f32[1,32], index: 14, kind: input, shape index: {}]   ;;  %s5258_s15 = inlined_call_operand.hbm [shape: f32[9,32], index: 15, kind: input, shape index: {}]   ;;  %s5259_s16 = inlined_call_operand.hbm [shape: f32[1,32], index: 16, kind: input, shape index: {}]   ;;  %s5260_s17 = inlined_call_operand.hbm [shape: f32[1,32], index: 17, kind: input, shape index: {}]   ;;  %s5261_s18 = inlined_call_operand.hbm [shape: f32[8,32], index: 18, kind: input, shape index: {}]   ;;  %s5262_s19 = inlined_call_operand.vmem [shape: f32[8,1], index: 19, kind: input, shape index: {}]   ;;  %s5263_s20 = inlined_call_operand.hbm [shape: f32[8,32], index: 20, kind: input, shape index: {}]   ;;  %s5264_s21 = inlined_call_operand.hbm [shape: f32[1,32], index: 21, kind: input, shape index: {}]   ;;  %s5265_s22 = inlined_call_operand.hbm [shape: f32[32,32], index: 22, kind: input, shape index: {}]   ;;  %s5266_s23 = inlined_call_operand.hbm [shape: f32[1,32], index: 23, kind: input, shape index: {}]   ;;  %s5267_s24 = inlined_call_operand.hbm [shape: f32[1,32], index: 24, kind: input, shape index: {}]   ;;  %s5268_s25 = inlined_call_operand.vmem [shape: f32[144,64], index: 25, kind: input, shape index: {}]   ;;  %s5269_s26 = inlined_call_operand.hbm [shape: f32[2,16,32], index: 26, kind: output, shape index: {}]  }
   0x1   :  { %5287 = sst [smem:[#allocation44_spill]] %s5243_s0 }
   0x2   :  { %5288 = sst [smem:[#allocation45_spill]] %s5244_s1 }
   0x3   :  { %5289 = sst [smem:[#allocation46_spill]] %s5245_s2 }
   0x4   :  { %5290 = sst [smem:[#allocation47_spill]] %s5246_s3 }
   0x5   :  { %5291 = sst [smem:[#allocation48_spill]] %s5247_s4 }
   0x6   :  { %5292 = sst [smem:[#allocation49_spill]] %s5248_s5 }
   0x7   :  { %5293 = sst [smem:[#allocation50_spill]] %s5249_s6 }
   0x8   :  { %5294 = sst [smem:[#allocation51_spill]] %s5250_s7 }
   0x9   :  { %5295 = sst [smem:[#allocation52_spill]] %s5251_s8 }
   0xa   :  { %5296 = sst [smem:[#allocation53_spill]] %s5252_s9 }
   0xb   :  { %5297 = sst [smem:[#allocation54_spill]] %s5253_s10 }
   0xc   :  { %5298 = sst [smem:[#allocation55_spill]] %s5254_s11 }
   0xd   :  { %5299 = sst [smem:[#allocation56_spill]] %s5269_s26 }
   0xe   :  { %31 = vsyncpa [#allocation4], 0 }
   0xf   :  { %32 = vsyncpa [#allocation7], 0 }
  0x10   :  { %33 = vsyncpa [#allocation10], 0 }
  0x11   :  { %34 = vsyncpa [#allocation13], 0 }
  0x12   :  { %35 = vsyncpa [#allocation16], 0 }
  0x13   :  { %36 = vsyncpa [#allocation19], 0 }
  0x14   :  { %37 = vsyncpa [#allocation22], 0 }
  0x15   :  { %38 = vsyncpa [#allocation25], 0 }
  0x16   :  { %39 = vsyncpa [#allocation5], 0 }
  0x17   :  { %41 = vsyncpa [#allocation5 + $0x1], 0  ;;  %s4248_s27 = smov 0   ;;  %s4250_s3 = smov 0  }
  0x18   :  { %s4252_s7 = smov 0   ;;  %s4254_s28 = smov 0  }
  0x19 LB: > { %5300 = sst [smem:[#allocation37_spill]] %s4076_s27  ;;  %s4269_s8 = sadd.s32 4294967295, %s4088_s28   ;;  %s4088_s28 = sphi %s4254_s28, %s5349_s28   ;;  %s4084_s7 = sphi %s4252_s7, %s5351_s7   ;;  %s4080_s3 = sphi %s4250_s3, %s5353_s3   ;;  %s4076_s27 = sphi %s4248_s27, %s5352_s27  }
  0x1a   : > { %5301 = sst [smem:[#allocation38_spill]] %s4084_s7  ;;  %s3031_s4 = sadd.s32 4294967294, %s4088_s28  }
  0x1b   : > { %5302 = sst [smem:[#allocation39_spill]] %s4088_s28  ;;  %s4273_s29 = sadd.s32 1, %s4088_s28  }
  0x1c   : > { %5303 = sst [smem:[#allocation40_spill]] %s4273_s29  ;;  %s605_s0 = sadd.s32 1, %s4084_s7 }
  0x1d   : > { %s602_s9 = ssub.s32 %s4088_s28, %s4273_s29  ;;  %p615_p0 = scmp.ne.s32.totalorder %s4084_s7, %s4080_s3 }
  0x1e   : > { %p603_p1 = scmp.eq.s32.totalorder %s602_s9, 0  ;;  %p616_p2 = scmp.eq.s32.totalorder %s4269_s8, 1 }
  0x1f   : > { %p621_p3 = scmp.ne.s32.totalorder %s4080_s3, %s4076_s27  ;;  %p622_p4 = scmp.eq.s32.totalorder %s3031_s4, 1 }
  0x20   : > { %s4284_s30 = scalar_select %p603_p1, %s4084_s7, %s605_s0  }
  0x21   : > { %p4286_p5 = por %p616_p2, %p615_p0  ;;  %p4290_p6 = por %p622_p4, %p621_p3 }
  0x22   : > { %5304 = sst [smem:[#allocation41_spill]] %s4284_s30  ;;  %p3032_p7 = scmp.ge.s32.totalorder %s4088_s28, 1 }
  0x23   : > { %s5305_s2 = scalar_select %p4286_p5, 1, 0 }
  0x24   : > { %s5307_s5 = scalar_select %p4290_p6, 1, 0 }
  0x25   : > { %5306 = sst [smem:[#allocation42_spill]] %s5305_s2  ;;  %p629_p8 = scmp.lt.s32.totalorder %s4088_s28, 3 }
  0x26   : > { %5308 = sst [smem:[#allocation43_spill]] %s5307_s5  ;;  %p5279_p9 = scmp.eq.s32.totalorder %s4269_s8, 0 }
  0x27   : > { %p4297_p10 = pnand %p3032_p7, %p629_p8  ;;  %s4090_s6 = smov [#allocation6]  }
  0x28   : > { %s659_s1 = sshll.u32 %s4090_s6, 4  ;;  %s4091_s4 = smov [#allocation9]   ;;  %s660_s1 = int_to_ptr.vmem [resolvable:$true] %s659_s1 }
  0x29   : > { %s5309_s10 = scalar_select %p4297_p10, 1, 0 }
  0x2a   : > { %p3397_p11 = pneg %p4297_p10  ;;  %s684_s0 = sshll.u32 %s4091_s4, 4  ;;  %s685_s0 = int_to_ptr.vmem [resolvable:$true] %s684_s0 }
  0x2b   : > { %s4092_s30 = smov [#allocation12]   ;;  %s3617_s6 = scalar_lea.vmem %s660_s1, 16 }
  0x2c   : > { %p4305_p12 = pnand %p5279_p9, %p3397_p11  ;;  %s721_s7 = sshll.u32 %s4092_s30, 4  ;;  %s4309_s7 = int_to_ptr.vmem [resolvable:$true] %s721_s7 }
  0x2d   : > { %p3618_p0 = scmp.ne.s32.totalorder %s660_s1, %s3617_s6  ;;  %s3624_s4 = scalar_lea.vmem %s660_s1, 32 }
  0x2e   : > { %p4313_p13 = pneg %p4305_p12  ;;  %p3625_p3 = scmp.lt.s32.totalorder %s660_s1, %s660_s1 }
  0x2f   : > { %p3626_p4 = scmp.lt.s32.totalorder %s3624_s4, %s3617_s6 }
  0x30   : > { %p3620_p1 = pnand %p3618_p0, %p4313_p13 }
  0x31   : > { %p3627_p7 = por %p3626_p4, %p3625_p3 }
  0x32   : > { %p3621_p2 = pneg %p3620_p1 }
  0x34   : > { %p3628_p8 = pnand %p3627_p7, %p3621_p2 }
  0x36   : > { %3631 = shalt.err (!%p3628_p8)
}
  0x37   : > { %s5312_s27 = sld [smem:[#allocation48_spill]]  ;;  %s3643_s28 = scalar_lea.vmem %s685_s0, 16 }
  0x38   : > { %p3644_p11 = scmp.ne.s32.totalorder %s685_s0, %s3643_s28  ;;  %s3650_s26 = scalar_lea.vmem %s685_s0, 32 }
  0x39   : > { %p3651_p0 = scmp.lt.s32.totalorder %s685_s0, %s685_s0  ;;  %p3652_p1 = scmp.lt.s32.totalorder %s3650_s26, %s3643_s28 }
  0x3a   : > { %p3646_p9 = pnand %p3644_p11, %p4313_p13 }
  0x3b   : > { %p3653_p5 = por %p3652_p1, %p3651_p0 }
  0x3c   : > { %p3647_p6 = pneg %p3646_p9 }
  0x3d   : > { %3403 = dma.hbm_to_vmem [thread:$0]  (!%p4305_p12), %s5312_s27, 16, %s660_s1, [#allocation7]  }
  0x3e   : > { %p3654_p10 = pnand %p3653_p5, %p3647_p6 }
  0x40   : > { %3657 = shalt.err (!%p3654_p10)
}
  0x41   : > { %s5313_s2 = sld [smem:[#allocation51_spill]]  ;;  %s3669_s27 = scalar_lea.vmem %s4309_s7, 16 }
  0x42   : > { %p3670_p2 = scmp.ne.s32.totalorder %s4309_s7, %s3669_s27  ;;  %s3676_s26 = scalar_lea.vmem %s4309_s7, 32 }
  0x43   : > { %p3677_p5 = scmp.lt.s32.totalorder %s4309_s7, %s4309_s7  ;;  %p3678_p6 = scmp.lt.s32.totalorder %s3676_s26, %s3669_s27 }
  0x44   : > { %p3672_p9 = pnand %p3670_p2, %p4313_p13 }
  0x45   : > { %p3679_p10 = por %p3678_p6, %p3677_p5 }
  0x46   : > { %p3673_p3 = pneg %p3672_p9 }
  0x47   : > { %3409 = dma.hbm_to_vmem [thread:$0]  (!%p4305_p12), %s5313_s2, 16, %s685_s0, [#allocation10]  }
  0x48   : > { %p3680_p4 = pnand %p3679_p10, %p3673_p3 }
  0x4a   : > { %3683 = shalt.err (!%p3680_p4)
}
  0x4b   : > { %3415 = dma.hbm_to_vmem [thread:$0]  (!%p4305_p12), %s5257_s14, 16, %s4309_s7, [#allocation13]  }
  0x4c   : > { %s4093_s2 = smov [#allocation15]   ;;  %s4094_s0 = smov [#allocation18]  }
  0x4d   : > { %s745_s1 = sshll.u32 %s4093_s2, 4  ;;  %s767_s30 = sshll.u32 %s4094_s0, 4  ;;  %s746_s1 = int_to_ptr.vmem [resolvable:$true] %s745_s1  ;;  %s768_s30 = int_to_ptr.vmem [resolvable:$true] %s767_s30 }
  0x4e   : > { %s3695_s6 = scalar_lea.vmem %s746_s1, 16  ;;  %s3702_s4 = scalar_lea.vmem %s746_s1, 32 }
  0x4f   : > { %p3696_p7 = scmp.ne.s32.totalorder %s746_s1, %s3695_s6  ;;  %p3703_p0 = scmp.lt.s32.totalorder %s746_s1, %s746_s1 }
  0x50   : > { %p3704_p1 = scmp.lt.s32.totalorder %s3702_s4, %s3695_s6 }
  0x51   : > { %p3698_p8 = pnand %p3696_p7, %p4313_p13 }
  0x52   : > { %p3705_p2 = por %p3704_p1, %p3703_p0 }
  0x53   : > { %p3699_p11 = pneg %p3698_p8 }
  0x55   : > { %p3706_p9 = pnand %p3705_p2, %p3699_p11 }
  0x57   : > { %3709 = shalt.err (!%p3706_p9)
}
  0x58   : > { %3421 = dma.hbm_to_vmem [thread:$0]  (!%p4305_p12), %s5259_s16, 16, %s746_s1, [#allocation16]  }
  0x59   : > { %s3721_s26 = scalar_lea.vmem %s768_s30, 128  ;;  %p3729_p10 = scmp.lt.s32.totalorder %s768_s30, %s768_s30 }
  0x5a   : > { %p3722_p3 = scmp.ne.s32.totalorder %s768_s30, %s3721_s26  ;;  %p3730_p4 = scmp.lt.s32.totalorder %s3721_s26, %s3721_s26 }
  0x5c   : > { %p3724_p5 = pnand %p3722_p3, %p4313_p13  ;;  %p3731_p7 = por %p3730_p4, %p3729_p10 }
  0x5e   : > { %p3725_p6 = pneg %p3724_p5 }
  0x60   : > { %p3732_p8 = pnand %p3731_p7, %p3725_p6 }
  0x62   : > { %3735 = shalt.err (!%p3732_p8)
}
  0x63   : > { %3427 = dma.hbm_to_vmem [thread:$0]  (!%p4305_p12), %s5261_s18, 128, %s768_s30, [#allocation19]  }
  0x64   : > { %s4095_s2 = smov [#allocation21]   ;;  %s4096_s0 = smov [#allocation24]  }
  0x65   : > { %s792_s1 = sshll.u32 %s4095_s2, 4  ;;  %s816_s6 = sshll.u32 %s4096_s0, 4  ;;  %s793_s1 = int_to_ptr.vmem [resolvable:$true] %s792_s1  ;;  %s817_s6 = int_to_ptr.vmem [resolvable:$true] %s816_s6 }
  0x66   : > { %s3747_s4 = scalar_lea.vmem %s793_s1, 16  ;;  %s3754_s27 = scalar_lea.vmem %s793_s1, 32 }
  0x67   : > { %p3748_p11 = scmp.ne.s32.totalorder %s793_s1, %s3747_s4  ;;  %p3755_p2 = scmp.lt.s32.totalorder %s793_s1, %s793_s1 }
  0x68   : > { %p3756_p9 = scmp.lt.s32.totalorder %s3754_s27, %s3747_s4 }
  0x69   : > { %p3750_p0 = pnand %p3748_p11, %p4313_p13 }
  0x6a   : > { %p3757_p3 = por %p3756_p9, %p3755_p2 }
  0x6b   : > { %p3751_p1 = pneg %p3750_p0 }
  0x6d   : > { %p3758_p5 = pnand %p3757_p3, %p3751_p1 }
  0x6f   : > { %3761 = shalt.err (!%p3758_p5)
}
  0x70   : > { %3433 = dma.hbm_to_vmem [thread:$0]  (!%p4305_p12), %s5264_s21, 16, %s793_s1, [#allocation22]  }
  0x71   : > { %s3773_s26 = scalar_lea.vmem %s817_s6, 16  ;;  %s3780_s28 = scalar_lea.vmem %s817_s6, 32 }
  0x72   : > { %p3774_p6 = scmp.ne.s32.totalorder %s817_s6, %s3773_s26  ;;  %p3781_p7 = scmp.lt.s32.totalorder %s817_s6, %s817_s6 }
  0x73   : > { %p3782_p8 = scmp.lt.s32.totalorder %s3780_s28, %s3773_s26 }
  0x74   : > { %p3776_p10 = pnand %p3774_p6, %p4313_p13 }
  0x75   : > { %p3783_p11 = por %p3782_p8, %p3781_p7 }
  0x76   : > { %p3777_p4 = pneg %p3776_p10 }
  0x78   : > { %p3784_p0 = pnand %p3783_p11, %p3777_p4 }
  0x7a   : > { %3787 = shalt.err (!%p3784_p0)
}
  0x7b   : > { %3439 = dma.hbm_to_vmem [thread:$0]  (!%p4305_p12), %s5266_s23, 16, %s817_s6, [#allocation25]  }
  0x7c   : > { %s4097_s1 = smov [#allocation3]   ;;  %s4098_s4 = smov [#allocation8]  }
  0x7d   : > { %s645_s0 = sshll.u32 %s4097_s1, 4  ;;  %s673_s27 = sshll.u32 %s4098_s4, 4  ;;  %s646_s0 = int_to_ptr.vmem [resolvable:$true] %s645_s0  ;;  %s674_s27 = int_to_ptr.vmem [resolvable:$true] %s673_s27 }
  0x7e   : > { %s3799_s7 = scalar_lea.vmem %s646_s0, 16  ;;  %s3806_s30 = scalar_lea.vmem %s646_s0, 32 }
  0x7f   : > { %p3800_p1 = scmp.ne.s32.totalorder %s646_s0, %s3799_s7  ;;  %p3807_p3 = scmp.lt.s32.totalorder %s646_s0, %s646_s0 }
  0x80   : > { %p3808_p5 = scmp.lt.s32.totalorder %s3806_s30, %s3799_s7 }
  0x81   : > { %p3802_p2 = pnand %p3800_p1, %p4313_p13 }
  0x82   : > { %p3809_p6 = por %p3808_p5, %p3807_p3 }
  0x83   : > { %p3803_p9 = pneg %p3802_p2 }
  0x85   : > { %p3810_p10 = pnand %p3809_p6, %p3803_p9 }
  0x87   : > { %3813 = shalt.err (!%p3810_p10)
}
  0x88   : > { %s5314_s28 = sld [smem:[#allocation46_spill]]  ;;  %s3825_s5 = scalar_lea.vmem %s674_s27, 16 }
  0x89   : > { %p3826_p4 = scmp.ne.s32.totalorder %s674_s27, %s3825_s5  ;;  %s3832_s2 = scalar_lea.vmem %s674_s27, 32 }
  0x8a   : > { %p3833_p11 = scmp.lt.s32.totalorder %s674_s27, %s674_s27  ;;  %p3834_p0 = scmp.lt.s32.totalorder %s3832_s2, %s3825_s5 }
  0x8b   : > { %p3828_p7 = pnand %p3826_p4, %p4313_p13 }
  0x8c   : > { %p3835_p1 = por %p3834_p0, %p3833_p11 }
  0x8d   : > { %p3829_p8 = pneg %p3828_p7 }
  0x8e   : > { %3400 = dma.hbm_to_vmem [thread:$0]  (!%p4305_p12), %s5314_s28, 16, %s646_s0, [#allocation4]  }
  0x8f   : > { %p3836_p2 = pnand %p3835_p1, %p3829_p8 }
  0x91   : > { %3839 = shalt.err (!%p3836_p2)
}
  0x92   : > { %s5315_s7 = sld [smem:[#allocation50_spill]]  ;;  %s4099_s0 = smov [#allocation11]  }
  0x93   : > { %s701_s30 = sshll.u32 %s4099_s0, 4  ;;  %s4100_s26 = smov [#allocation14]   ;;  %s702_s30 = int_to_ptr.vmem [resolvable:$true] %s701_s30 }
  0x94   : > { %s731_s6 = sshll.u32 %s4100_s26, 4  ;;  %s3851_s28 = scalar_lea.vmem %s702_s30, 128  ;;  %s732_s6 = int_to_ptr.vmem [resolvable:$true] %s731_s6 }
  0x95   : > { %p3852_p9 = scmp.ne.s32.totalorder %s702_s30, %s3851_s28  ;;  %p3859_p6 = scmp.lt.s32.totalorder %s702_s30, %s702_s30 }
  0x96   : > { %p3860_p10 = scmp.lt.s32.totalorder %s3851_s28, %s3851_s28 }
  0x97   : > { %p3854_p3 = pnand %p3852_p9, %p4313_p13 }
  0x98   : > { %3406 = dma.hbm_to_vmem [thread:$0]  (!%p4305_p12), %s5315_s7, 16, %s674_s27, [#allocation7]  }
  0x99   : > { %p3855_p5 = pneg %p3854_p3  ;;  %p3861_p4 = por %p3860_p10, %p3859_p6 }
  0x9b   : > { %p3862_p7 = pnand %p3861_p4, %p3855_p5 }
  0x9d   : > { %3865 = shalt.err (!%p3862_p7)
}
  0x9e   : > { %s5316_s27 = sld [smem:[#allocation54_spill]]  ;;  %s3877_s1 = scalar_lea.vmem %s732_s6, 256 }
  0x9f   : > { %p3878_p8 = scmp.ne.s32.totalorder %s732_s6, %s3877_s1  ;;  %p3885_p1 = scmp.lt.s32.totalorder %s732_s6, %s732_s6 }
  0xa0   : > { %p3886_p2 = scmp.lt.s32.totalorder %s3877_s1, %s3877_s1 }
  0xa1   : > { %p3880_p11 = pnand %p3878_p8, %p4313_p13 }
  0xa2   : > { %p3887_p9 = por %p3886_p2, %p3885_p1 }
  0xa3   : > { %p3881_p0 = pneg %p3880_p11 }
  0xa4   : > { %3412 = dma.hbm_to_vmem [thread:$0]  (!%p4305_p12), %s5316_s27, 128, %s702_s30, [#allocation10]  }
  0xa5   : > { %p3888_p3 = pnand %p3887_p9, %p3881_p0 }
  0xa7   : > { %3891 = shalt.err (!%p3888_p3)
}
  0xa8   : > { %s4101_s4 = smov 128   ;;  %s4102_s7 = smov 8  }
  0xa9   : > { %3418 = dma.hbm_to_vmem [thread:$0]  (!%p4305_p12), %s5258_s15, 256, %s732_s6, [#allocation13], %s4101_s4, %s4101_s4, %s4102_s7  }
  0xaa   : > { %s4103_s26 = smov [#allocation17]   ;;  %s4104_s5 = smov [#allocation20]  }
  0xab   : > { %s756_s28 = sshll.u32 %s4103_s26, 4  ;;  %s781_s2 = sshll.u32 %s4104_s5, 4  ;;  %s757_s28 = int_to_ptr.vmem [resolvable:$true] %s756_s28  ;;  %s782_s2 = int_to_ptr.vmem [resolvable:$true] %s781_s2 }
  0xac   : > { %s3903_s27 = scalar_lea.vmem %s757_s28, 16  ;;  %s3910_s1 = scalar_lea.vmem %s757_s28, 32 }
  0xad   : > { %p3904_p5 = scmp.ne.s32.totalorder %s757_s28, %s3903_s27  ;;  %p3911_p4 = scmp.lt.s32.totalorder %s757_s28, %s757_s28 }
  0xae   : > { %p3912_p7 = scmp.lt.s32.totalorder %s3910_s1, %s3903_s27 }
  0xaf   : > { %p3906_p6 = pnand %p3904_p5, %p4313_p13 }
  0xb0   : > { %p3913_p8 = por %p3912_p7, %p3911_p4 }
  0xb1   : > { %p3907_p10 = pneg %p3906_p6 }
  0xb3   : > { %p3914_p11 = pnand %p3913_p8, %p3907_p10 }
  0xb5   : > { %3917 = shalt.err (!%p3914_p11)
}
  0xb6   : > { %3424 = dma.hbm_to_vmem [thread:$0]  (!%p4305_p12), %s5260_s17, 16, %s757_s28, [#allocation16]  }
  0xb7   : > { %s3929_s30 = scalar_lea.vmem %s782_s2, 128  ;;  %p3937_p9 = scmp.lt.s32.totalorder %s782_s2, %s782_s2 }
  0xb8   : > { %p3930_p0 = scmp.ne.s32.totalorder %s782_s2, %s3929_s30  ;;  %p3938_p3 = scmp.lt.s32.totalorder %s3929_s30, %s3929_s30 }
  0xba   : > { %p3932_p1 = pnand %p3930_p0, %p4313_p13  ;;  %p3939_p5 = por %p3938_p3, %p3937_p9 }
  0xbc   : > { %p3933_p2 = pneg %p3932_p1 }
  0xbe   : > { %p3940_p6 = pnand %p3939_p5, %p3933_p2 }
  0xc0   : > { %3943 = shalt.err (!%p3940_p6)
}
  0xc1   : > { %3430 = dma.hbm_to_vmem [thread:$0]  (!%p4305_p12), %s5263_s20, 128, %s782_s2, [#allocation19]  }
  0xc2   : > { %s4105_s27 = smov [#allocation23]   ;;  %s4106_s1 = smov [#allocation26]  }
  0xc3   : > { %s802_s28 = sshll.u32 %s4105_s27, 4  ;;  %s827_s0 = sshll.u32 %s4106_s1, 4  ;;  %s803_s28 = int_to_ptr.vmem [resolvable:$true] %s802_s28  ;;  %s828_s0 = int_to_ptr.vmem [resolvable:$true] %s827_s0 }
  0xc4   : > { %s3955_s6 = scalar_lea.vmem %s803_s28, 512  ;;  %p3963_p8 = scmp.lt.s32.totalorder %s803_s28, %s803_s28 }
  0xc5   : > { %p3956_p10 = scmp.ne.s32.totalorder %s803_s28, %s3955_s6  ;;  %p3964_p11 = scmp.lt.s32.totalorder %s3955_s6, %s3955_s6 }
  0xc7   : > { %p3958_p4 = pnand %p3956_p10, %p4313_p13  ;;  %p3965_p0 = por %p3964_p11, %p3963_p8 }
  0xc9   : > { %p3959_p7 = pneg %p3958_p4 }
  0xcb   : > { %p3966_p1 = pnand %p3965_p0, %p3959_p7 }
  0xcd   : > { %3969 = shalt.err (!%p3966_p1)
}
  0xce   : > { %3436 = dma.hbm_to_vmem [thread:$0]  (!%p4305_p12), %s5265_s22, 512, %s803_s28, [#allocation22], %s4101_s4, %s4101_s4, %s4102_s7  }
  0xcf   : > { %s3981_s26 = scalar_lea.vmem %s828_s0, 16  ;;  %s3988_s5 = scalar_lea.vmem %s828_s0, 32 }
  0xd0   : > { %p3982_p2 = scmp.ne.s32.totalorder %s828_s0, %s3981_s26  ;;  %p3989_p5 = scmp.lt.s32.totalorder %s828_s0, %s828_s0 }
  0xd1   : > { %p3990_p6 = scmp.lt.s32.totalorder %s3988_s5, %s3981_s26 }
  0xd2   : > { %p3984_p9 = pnand %p3982_p2, %p4313_p13 }
  0xd3   : > { %p3991_p10 = por %p3990_p6, %p3989_p5 }
  0xd4   : > { %p3985_p3 = pneg %p3984_p9 }
  0xd6   : > { %p3992_p4 = pnand %p3991_p10, %p3985_p3 }
  0xd8   : > { %3995 = shalt.err (!%p3992_p4)
}
  0xd9   : > { %3442 = dma.hbm_to_vmem [thread:$0]  (!%p4305_p12), %s5267_s24, 16, %s828_s0, [#allocation25]  }
  0xda   : > { %p5317_p7 = scmp.ne.s32.totalorder %s5309_s10, 0 }
  0xdb   : > { %p5318_p8 = scmp.eq.s32.totalorder (!%p5317_p7), %s4269_s8, 0 }
  0xdc   : > { %851 = sbr.rel (%p5317_p7) target bundleno = 3317 (0xcf5), region = 124 }
  0xe1   : > { %4039 = dma.done.wait (%p5318_p8), [#allocation4], 16   ;;  %p5319_p13 = pmov %p5318_p8 }
  0xe2   : > { %p5320_p11 = pmov %p5318_p8 }
  0xe3   : > { %4041 = vsyncadd (%p5319_p13), [#allocation4], 4294967280 }
  0xe4   : > { %4043 = dma.done.wait (%p5320_p11), [#allocation7], 32   ;;  %p5321_p0 = pmov %p5318_p8 }
  0xe6   : > { %4045 = vsyncadd (%p5321_p0), [#allocation7], 4294967264  ;;  %p5322_p1 = pmov %p5321_p0 }
  0xe7   : > { %p5323_p12 = pmov %p5321_p0 }
  0xe8   : > { %4047 = dma.done.wait (%p5322_p1), [#allocation10], 144  }
  0xe9   : > { %4049 = vsyncadd (%p5323_p12), [#allocation10], 4294967152  ;;  %p5324_p2 = pmov %p5321_p0 }
  0xea   : > { %p5325_p9 = pmov %p5321_p0 }
  0xeb   : > { %4051 = dma.done.wait (%p5324_p2), [#allocation13], 272  }
  0xec   : > { %4053 = vsyncadd (%p5325_p9), [#allocation13], 4294967024  ;;  %p5326_p3 = pmov %p5321_p0 }
  0xed   : > { %p5327_p5 = pmov %p5321_p0 }
  0xee   : > { %4055 = dma.done.wait (%p5326_p3), [#allocation16], 32  }
  0xef   : > { %4057 = vsyncadd (%p5327_p5), [#allocation16], 4294967264  ;;  %p5328_p6 = pmov %p5321_p0 }
  0xf0   : > { %p5329_p10 = pmov %p5321_p0 }
  0xf1   : > { %4059 = dma.done.wait (%p5328_p6), [#allocation19], 256  }
  0xf2   : > { %4061 = vsyncadd (%p5329_p10), [#allocation19], 4294967040  ;;  %p5330_p4 = pmov %p5321_p0 }
  0xf3   : > { %p5331_p7 = pmov %p5321_p0 }
  0xf4   : > { %4063 = dma.done.wait (%p5330_p4), [#allocation22], 528  }
  0xf5   : > { %4065 = vsyncadd (%p5331_p7), [#allocation22], 4294966768  ;;  %p5332_p8 = pmov %p5321_p0 }
  0xf6   : > { %p5333_p13 = pmov %p5321_p0 }
  0xf7   : > { %4067 = dma.done.wait (%p5332_p8), [#allocation25], 32  }
  0xf8   : > { %4069 = vsyncadd (%p5333_p13), [#allocation25], 4294967264  ;;  %p977_p11 = scmp.lt.s32.totalorder %s4269_s8, 1  ;;  %s5334_s7 = sld [smem:[#allocation44_spill]]  ;;  %vm1003_vm0 = vcmask 392192   ;;  %vm1360_vm4 = vcmask 261120  }
  0xf9   : > { %s5335_s2 = sld [smem:[#allocation45_spill]]  ;;  %v3068_v18 = vld [vmem:[#allocation3] ss:$0 sm:$0xff]  ;;  %vm1491_vm10 = vcmask 254976   ;;  %vm2298_vm11 = vcmask 523264   ;;  %s974_s26 = sand.u32 1, %s4080_s3  }
  0xfa   : > { %s978_s29 = scalar_select %p977_p11, %s4269_s8, 1 }
  0xfb   : > { %s5336_s30 = sld [smem:[#allocation47_spill]]  ;;  %s3130_s1 = sshll.u32 %s4269_s8, 8 }
  0xfc   : > { %s3129_s10 = sshll.u32 %s978_s29, 6  ;;  %s5337_s4 = sld [smem:[#allocation49_spill]] }
  0xfd   : > { %s5338_s5 = sld [smem:[#allocation52_spill]] }
  0xfe   : > { %s4473_s28 = scalar_lea.vmem %s5334_s7, %s3129_s10  ;;  %s5340_s11 = sld [smem:[#allocation55_spill]] }
  0xff   : > { %v995_v0 = vld [vmem:[%s5335_s2 + $0x28] sm:$0xff]  ;;  %v994_v1 = vld [vmem:[%s5335_s2 + $0x20] sm:$0xff]  ;;  %v993_v2 = vld [vmem:[%s5335_s2 + $0x18] sm:$0xff]  ;;  %s5341_s27 = sld [smem:[#allocation42_spill]] }
 0x100   : > { %3201 = vmatprep.subr.mxu0 %v995_v0  ;;  %v982_v3 = vld [vmem:[%s4473_s28] sm:$0xff]  ;;  %v992_v4 = vld [vmem:[%s5335_s2 + $0x10] sm:$0xff]  ;;  %v991_v5 = vld [vmem:[%s5335_s2 + $0x8] sm:$0xff]  ;;  %s5342_s7 = sld [smem:[#allocation56_spill]] }
 0x101   : > { %3202 = vmatpush3.msra.mxu0 %v995_v0  ;;  %3213 = vmatprep.mubr.msk.f32.mxu0 %vm1003_vm0, %v982_v3  ;;  %v990_v6 = vld [vmem:[%s5335_s2] sm:$0xff]  ;;  %v983_v7 = vld [vmem:[%s4473_s28 + $0x8] sm:$0xff]  ;;  %v984_v8 = vld [vmem:[%s4473_s28 + $0x10] sm:$0xff]  ;;  %s5203_s2 = scalar_lea.sflag [#allocation5], %s974_s26 }
 0x102   : > { %3203 = vmatprep.subr.mxu0 %v994_v1  ;;  %v985_v9 = vld [vmem:[%s4473_s28 + $0x18] sm:$0xff]  ;;  %v986_v10 = vld [vmem:[%s4473_s28 + $0x20] sm:$0xff]  ;;  %v987_v11 = vld [vmem:[%s4473_s28 + $0x28] sm:$0xff] }
 0x103   : > { %3204 = vmatpush3.msra.mxu0 %v994_v1  ;;  %v988_v12 = vld [vmem:[%s4473_s28 + $0x30] sm:$0xff]  ;;  %v989_v13 = vld [vmem:[%s4473_s28 + $0x38] sm:$0xff]  ;;  %v1350_v16 = vld [vmem:[%s5336_s30 + $0x8] sm:$0xff]  ;;  %s5339_s28 = sld [smem:[#allocation53_spill]] }
 0x104   : > { %3205 = vmatprep.subr.mxu0 %v993_v2  ;;  %v1352_v14 = vld [vmem:[%s5336_s30 + $0x18] sm:$0xff]  ;;  %v1351_v15 = vld [vmem:[%s5336_s30 + $0x10] sm:$0xff]  ;;  %v1349_v17 = vld [vmem:[%s5336_s30] sm:$0xff] }
 0x105   : > { %3206 = vmatpush3.msra.mxu0 %v993_v2  ;;  %3225 = vmatprep.subr.mxu1 %v1352_v14  ;;  %p5344_p1 = scmp.ne.s32.totalorder %s5341_s27, 0 }
 0x106   : > { %3207 = vmatprep.subr.mxu0 %v992_v4  ;;  %3226 = vmatpush3.msra.mxu1 %v1352_v14  ;;  %s5343_s0 = smov %s5342_s7  ;;  %s5198_s6 = scalar_lea.hbm %s5342_s7, %s3130_s1 }
 0x107   : > { %3208 = vmatpush3.msra.mxu0 %v992_v4  ;;  %3227 = vmatprep.subr.mxu1 %v1351_v15 }
 0x108   : > { %3209 = vmatprep.subr.mxu0 %v991_v5  ;;  %3228 = vmatpush3.msra.mxu1 %v1351_v15 }
 0x109   : > { %3210 = vmatpush3.msra.mxu0 %v991_v5  ;;  %3229 = vmatprep.subr.mxu1 %v1350_v16 }
 0x10a   : > { %3211 = vmatprep.subr.mxu0 %v990_v6  ;;  %3230 = vmatpush3.msra.mxu1 %v1350_v16 }
 0x10b   : > { %3212 = vmatpush3.msra.mxu0 %v990_v6  ;;  %3231 = vmatprep.subr.mxu1 %v1349_v17 }
 0x10c   : > { %3214 = vmatmul.mubr.msk.f32.vlgmr.msra.gmra.mxu0 %vm1003_vm0, %v983_v7  ;;  %3232 = vmatpush3.msra.mxu1 %v1349_v17 }
 0x10d   : > { %3216 = vmatprep.mubr.msk.f32.mxu0 %vm1003_vm0, %v984_v8 }
 0x110   : > { %3217 = vmatmul.mubr.msk.f32.gmra.mxu0 %vm1003_vm0, %v985_v9 }
 0x111   : > { %3219 = vmatprep.mubr.msk.f32.mxu0 %vm1003_vm0, %v986_v10  ;;  %v4107_v10 = vmov -1.0  }
 0x114   : > { %3220 = vmatmul.mubr.msk.f32.gmra.mxu0 %vm1003_vm0, %v987_v11 }
 0x115   : > { %3222 = vmatprep.mubr.msk.f32.mxu0 %vm1003_vm0, %v988_v12 }
 0x118   : > { %3223 = vmatmul.mubr.msk.f32.gmra.mxu0 %vm1003_vm0, %v989_v13 }
 0x1cc   : > { %v3215_v19 = vpop.f32.mrf.mxu0 }
 0x1cd   : > { %v1100_v20 = vadd.f32 %v3215_v19, %v3068_v18 }
 0x1ce   : > { %v1094_v21 = vpop.f32.mrf.mxu0 }
 0x1cf   : > { %v1142_v22 = vmul.f32 0.70710677, %v1100_v20  ;;  %v1095_v23 = vadd.f32 %v3068_v18, %v1094_v21  ;;  %v4558_v3 = vmul.f32 0.5, %v1100_v20 }
 0x1d0   : > { %v3218_v24 = vpop.f32.mrf.mxu0 }
 0x1d1   : > { %v1166_v25 = vand.u32 2147483647, %v1142_v22  ;;  %v1141_v26 = vmul.f32 0.70710677, %v1095_v23  ;;  %v4521_v27 = vadd.f32 %v3218_v24, %v3068_v18  ;;  %vm1150_vm1 = vcmp.ge.f32.partialorder %v1142_v22, 0.0 }
 0x1d2   : > { %v1104_v28 = vpop.f32.mrf.mxu0  ;;  %v4561_v7 = vmul.f32 0.5, %v1095_v23  ;;  %v4565_v11 = vsel %vm1150_vm1, 1.0, %v4107_v10 }
 0x1d3   : > { %v1174_v29 = vmul.f32 0.3275911, %v1166_v25  ;;  %v1165_v30 = vand.u32 2147483647, %v1141_v26  ;;  %v4524_v31 = vmul.f32 0.70710677, %v4521_v27  ;;  %v4526_v32 = vadd.f32 %v3068_v18, %v1104_v28 }
 0x1d4   : > { %v3221_v33 = vpop.f32.mrf.mxu0  ;;  %v1278_v47 = vsub.f32 0.0, %v1166_v25  ;;  %vm1149_vm2 = vcmp.ge.f32.partialorder %v1141_v26, 0.0 }
 0x1d5   : > { %v1182_v34 = vadd.f32 1.0, %v1174_v29  ;;  %v1173_v35 = vmul.f32 0.3275911, %v1165_v30  ;;  %v1168_v36 = vand.u32 2147483647, %v4524_v31  ;;  %v4533_v43 = vadd.f32 %v3221_v33, %v3068_v18 }
 0x1d6   : > { %v4530_v37 = vmul.f32 0.70710677, %v4526_v32  ;;  %v1114_v38 = vpop.f32.mrf.mxu0  ;;  %v1277_v54 = vsub.f32 0.0, %v1165_v30  ;;  %v1286_v55 = vmul.f32 %v1278_v47, %v1166_v25  ;;  %v4570_v14 = vsel %vm1149_vm2, 1.0, %v4107_v10 }
 0x1d7   : > { %3534 = vrcp.f32 %v1182_v34  ;;  %v1181_v39 = vadd.f32 1.0, %v1173_v35  ;;  %v1176_v40 = vmul.f32 0.3275911, %v1168_v36  ;;  %v4535_v46 = vadd.f32 %v3068_v18, %v1114_v38 }
 0x1d8   : > { %v1167_v41 = vand.u32 2147483647, %v4530_v37  ;;  %v3224_v44 = vpop.f32.mrf.mxu0  ;;  %v4538_v48 = vmul.f32 0.70710677, %v4533_v43  ;;  %v1280_v60 = vsub.f32 0.0, %v1168_v36  ;;  %v1285_v63 = vmul.f32 %v1277_v54, %v1165_v30 }
 0x1d9   : > { %3536 = vrcp.f32 %v1181_v39  ;;  %v1184_v42 = vadd.f32 1.0, %v1176_v40  ;;  %v4541_v50 = vmul.f32 0.70710677, %v4535_v46  ;;  %v4544_v52 = vadd.f32 %v3224_v44, %v3068_v18 }
 0x1da   : > { %v1175_v45 = vmul.f32 0.3275911, %v1167_v41  ;;  %v1170_v51 = vand.u32 2147483647, %v4538_v48  ;;  %v1124_v53 = vpop.f32.mrf.mxu0  ;;  %v1295_v4 = vmul.f32 1.442695, %v1286_v55  ;;  %v1288_v12 = vmul.f32 %v1280_v60, %v1168_v36 }
 0x1db   : > { %3538 = vrcp.f32 %v1184_v42  ;;  %v1169_v57 = vand.u32 2147483647, %v4541_v50  ;;  %v4548_v58 = vmul.f32 0.70710677, %v4544_v52  ;;  %v4550_v59 = vadd.f32 %v3068_v18, %v1124_v53 }
 0x1dc   : > { %v1183_v49 = vadd.f32 1.0, %v1175_v45  ;;  %v1178_v56 = vmul.f32 0.3275911, %v1170_v51  ;;  %v1279_v8 = vsub.f32 0.0, %v1167_v41  ;;  %v1293_v17 = vmul.f32 1.442695, %v1285_v63 }
 0x1dd   : > { %v1177_v62 = vmul.f32 0.3275911, %v1169_v57  ;;  %v1172_v0 = vand.u32 2147483647, %v4548_v58  ;;  %v4554_v1 = vmul.f32 0.70710677, %v4550_v59 }
 0x1de   : > { %3540 = vrcp.f32 %v1183_v49  ;;  %v1186_v61 = vadd.f32 1.0, %v1178_v56  ;;  %vm1152_vm3 = vcmp.ge.f32.partialorder %v4524_v31, 0.0  ;;  %v1282_v19 = vsub.f32 0.0, %v1170_v51 }
 0x1df   : > { %v1185_v5 = vadd.f32 1.0, %v1177_v62  ;;  %v1180_v9 = vmul.f32 0.3275911, %v1172_v0  ;;  %v1171_v13 = vand.u32 2147483647, %v4554_v1  ;;  %v1287_v23 = vmul.f32 %v1279_v8, %v1167_v41 }
 0x1e0   : > { %3542 = vrcp.f32 %v1186_v61  ;;  %v1299_v26 = vmul.f32 1.442695, %v1288_v12  ;;  %v1281_v28 = vsub.f32 0.0, %v1169_v57  ;;  %v4581_v33 = vmul.f32 0.5, %v4526_v32 }
 0x1e1   : > { %3544 = vrcp.f32 %v1185_v5  ;;  %v1188_v18 = vadd.f32 1.0, %v1180_v9  ;;  %v1179_v20 = vmul.f32 0.3275911, %v1171_v13  ;;  %v1290_v38 = vmul.f32 %v1282_v19, %v1170_v51 }
 0x1e2   : > { %3546 = vpow2.f32 %v1295_v4  ;;  %v1284_v39 = vsub.f32 0.0, %v1172_v0  ;;  %v1297_v42 = vmul.f32 1.442695, %v1287_v23  ;;  %v1289_v47 = vmul.f32 %v1281_v28, %v1169_v57 }
 0x1e3   : > { %3548 = vrcp.f32 %v1188_v18  ;;  %v1187_v29 = vadd.f32 1.0, %v1179_v20  ;;  %v1283_v32 = vsub.f32 0.0, %v1171_v13  ;;  %v4592_v51 = vsel %vm1152_vm3, 1.0, %v4107_v10 }
 0x1e4   : > { %v4556_v2 = vpop.eup %3534  ;;  %3550 = vpow2.f32 %v1293_v17  ;;  %v1303_v56 = vmul.f32 1.442695, %v1290_v38  ;;  %v1292_v60 = vmul.f32 %v1284_v39, %v1172_v0  ;;  %vm1151_vm5 = vcmp.ge.f32.partialorder %v4530_v37, 0.0 }
 0x1e5   : > { %v1206_v6 = vmul.f32 1.0614054, %v4556_v2  ;;  %3552 = vrcp.f32 %v1187_v29  ;;  %v1291_v31 = vmul.f32 %v1283_v32, %v1171_v13  ;;  %vm1154_vm6 = vcmp.ge.f32.partialorder %v4538_v48, 0.0 }
 0x1e6   : > { %v4572_v15 = vpop.eup %3536  ;;  %3554 = vpow2.f32 %v1299_v26  ;;  %v1307_v18 = vmul.f32 1.442695, %v1292_v60  ;;  %vm1153_vm7 = vcmp.ge.f32.partialorder %v4541_v50, 0.0  ;;  %vm1156_vm8 = vcmp.ge.f32.partialorder %v4548_v58, 0.0 }
 0x1e7   : > { %v1214_v16 = vadd.f32 -1.4531521, %v1206_v6  ;;  %v1205_v24 = vmul.f32 1.0614054, %v4572_v15  ;;  %3556 = vpow2.f32 %v1297_v42  ;;  %v1301_v6 = vmul.f32 1.442695, %v1289_v47 }
 0x1e8   : > { %v4575_v21 = vpop.eup %3538  ;;  %3558 = vpow2.f32 %v1303_v56  ;;  %v1305_v28 = vmul.f32 1.442695, %v1291_v31  ;;  %vm1155_vm9 = vcmp.ge.f32.partialorder %v4554_v1, 0.0  ;;  %v1137_v58 = vmul.f32 0.5, %v4535_v46 }
 0x1e9   : > { %v1222_v22 = vmul.f32 %v4556_v2, %v1214_v16  ;;  %v1208_v25 = vmul.f32 1.0614054, %v4575_v21  ;;  %v1213_v34 = vadd.f32 -1.4531521, %v1205_v24  ;;  %3560 = vpow2.f32 %v1301_v6 }
 0x1ea   : > { %3562 = vpow2.f32 %v1307_v18  ;;  %v1140_v46 = vmul.f32 0.5, %v4544_v52  ;;  %v1530_v52 = vlaneseq }
 0x1eb   : > { %v1230_v30 = vadd.f32 1.4214138, %v1222_v22  ;;  %v4583_v35 = vpop.eup %3540  ;;  %v1216_v36 = vadd.f32 -1.4531521, %v1208_v25  ;;  %v1221_v44 = vmul.f32 %v4572_v15, %v1213_v34  ;;  %3564 = vpow2.f32 %v1305_v28 }
 0x1ec   : > { %v1207_v41 = vmul.f32 1.0614054, %v4583_v35 }
 0x1ed   : > { %v1238_v40 = vmul.f32 %v4556_v2, %v1230_v30  ;;  %v1224_v45 = vmul.f32 %v4575_v21, %v1216_v36  ;;  %v1229_v54 = vadd.f32 1.4214138, %v1221_v44  ;;  %v4594_v61 = vpop.eup %3542 }
 0x1ee   : > { %v1215_v53 = vadd.f32 -1.4531521, %v1207_v41  ;;  %v1210_v5 = vmul.f32 1.0614054, %v4594_v61  ;;  %v4601_v16 = vpop.eup %3544 }
 0x1ef   : > { %v1246_v49 = vadd.f32 -0.28449672, %v1238_v40  ;;  %v1232_v55 = vadd.f32 1.4214138, %v1224_v45  ;;  %v1237_v57 = vmul.f32 %v4572_v15, %v1229_v54  ;;  %v3547_v19 = vpop.eup %3546  ;;  %v1209_v23 = vmul.f32 1.0614054, %v4601_v16 }
 0x1f0   : > { %v1223_v63 = vmul.f32 %v4583_v35, %v1215_v53  ;;  %v1218_v17 = vadd.f32 -1.4531521, %v1210_v5  ;;  %v4607_v25 = vpop.eup %3548 }
 0x1f1   : > { %v1254_v62 = vmul.f32 %v4556_v2, %v1246_v49  ;;  %v1240_v4 = vmul.f32 %v4575_v21, %v1232_v55  ;;  %v1245_v12 = vadd.f32 -0.28449672, %v1237_v57  ;;  %v1217_v34 = vadd.f32 -1.4531521, %v1209_v23 }
 0x1f2   : > { %v1231_v9 = vadd.f32 1.4214138, %v1223_v63  ;;  %v1226_v26 = vmul.f32 %v4594_v61, %v1218_v17  ;;  %v1212_v36 = vmul.f32 1.0614054, %v4607_v25 }
 0x1f3   : > { %v1262_v8 = vadd.f32 0.2548296, %v1254_v62  ;;  %v1248_v0 = vadd.f32 -0.28449672, %v1240_v4  ;;  %v1253_v24 = vmul.f32 %v4572_v15, %v1245_v12  ;;  %v1225_v45 = vmul.f32 %v4601_v16, %v1217_v34 }
 0x1f4   : > { %v1239_v22 = vmul.f32 %v4583_v35, %v1231_v9  ;;  %v1234_v39 = vadd.f32 1.4214138, %v1226_v26  ;;  %v1220_v47 = vadd.f32 -1.4531521, %v1212_v36 }
 0x1f5   : > { %v1270_v20 = vmul.f32 %v4556_v2, %v1262_v8  ;;  %v1256_v13 = vmul.f32 %v4575_v21, %v1248_v0  ;;  %v3551_v2 = vpop.eup %3550  ;;  %v1261_v40 = vadd.f32 0.2548296, %v1253_v24  ;;  %v1233_v62 = vadd.f32 1.4214138, %v1225_v45 }
 0x1f6   : > { %v1247_v30 = vadd.f32 -0.28449672, %v1239_v22  ;;  %v4612_v41 = vpop.eup %3552  ;;  %v1242_v49 = vmul.f32 %v4594_v61, %v1234_v39  ;;  %v1228_v63 = vmul.f32 %v4607_v25, %v1220_v47 }
 0x1f7   : > { %v1310_v29 = vmul.f32 %v3547_v19, %v1270_v20  ;;  %v1264_v38 = vadd.f32 0.2548296, %v1256_v13  ;;  %v1211_v53 = vmul.f32 1.0614054, %v4612_v41  ;;  %v1269_v54 = vmul.f32 %v4572_v15, %v1261_v40  ;;  %v3555_v55 = vpop.eup %3554 }
 0x1f8   : > { %v1255_v44 = vmul.f32 %v4583_v35, %v1247_v30  ;;  %v1250_v4 = vadd.f32 -0.28449672, %v1242_v49  ;;  %v1241_v31 = vmul.f32 %v4601_v16, %v1233_v62  ;;  %v1236_v8 = vadd.f32 1.4214138, %v1228_v63  ;;  %v3557_v9 = vpop.eup %3556 }
 0x1f9   : > { %v1318_v42 = vsub.f32 1.0, %v1310_v29  ;;  %v1272_v32 = vmul.f32 %v4575_v21, %v1264_v38  ;;  %v1219_v5 = vadd.f32 -1.4531521, %v1211_v53  ;;  %v1309_v6 = vmul.f32 %v3551_v2, %v1269_v54  ;;  %v3559_v24 = vpop.eup %3558 }
 0x1fa   : > { %v1263_v60 = vadd.f32 0.2548296, %v1255_v44  ;;  %v1258_v12 = vmul.f32 %v4594_v61, %v1250_v4  ;;  %v1249_v18 = vadd.f32 -0.28449672, %v1241_v31  ;;  %v1244_v19 = vmul.f32 %v4607_v25, %v1236_v8  ;;  %v3561_v2 = vpop.eup %3560 }
 0x1fb   : > { %v1326_v56 = vmul.f32 %v1318_v42, %v4565_v11  ;;  %v1312_v57 = vmul.f32 %v3555_v55, %v1272_v32  ;;  %v1227_v11 = vmul.f32 %v4612_v41, %v1219_v5  ;;  %v1317_v0 = vsub.f32 1.0, %v1309_v6  ;;  %v3563_v45 = vpop.eup %3562 }
 0x1fc   : > { %v1271_v21 = vmul.f32 %v4583_v35, %v1263_v60  ;;  %v1266_v22 = vadd.f32 0.2548296, %v1258_v12  ;;  %v1257_v28 = vmul.f32 %v4601_v16, %v1249_v18  ;;  %v1252_v29 = vadd.f32 -0.28449672, %v1244_v19 }
 0x1fd   : > { %v1320_v15 = vsub.f32 1.0, %v1312_v57  ;;  %v1334_v20 = vadd.f32 1.0, %v1326_v56  ;;  %v1235_v35 = vadd.f32 1.4214138, %v1227_v11  ;;  %v1325_v23 = vmul.f32 %v1317_v0, %v4570_v14  ;;  %v3565_v57 = vpop.eup %3564 }
 0x1fe   : > { %v1311_v17 = vmul.f32 %v3557_v9, %v1271_v21  ;;  %v1159_v30 = vsel %vm1151_vm5, 1.0, %v4107_v10  ;;  %v1274_v37 = vmul.f32 %v4594_v61, %v1266_v22  ;;  %v1265_v39 = vadd.f32 0.2548296, %v1257_v28 }
 0x1ff   : > { %v1328_v13 = vmul.f32 %v1320_v15, %v4592_v51  ;;  %v1243_v34 = vmul.f32 %v4612_v41, %v1235_v35  ;;  %v1333_v36 = vadd.f32 1.0, %v1325_v23  ;;  %v1260_v14 = vmul.f32 %v4607_v25, %v1252_v29  ;;  %v1520_v35 = vld [vmem:[%s5337_s4] sm:$0xff] }
 0x200   : > { %v1319_v26 = vsub.f32 1.0, %v1311_v17  ;;  %v1342_v51 = vmul.f32 %v1334_v20, %v4558_v3  ;;  %v1314_v40 = vmul.f32 %v3559_v24, %v1274_v37  ;;  %v1273_v61 = vmul.f32 %v4601_v16, %v1265_v39  ;;  %v4692_v23 = vld [vmem:[#allocation6] ss:$0 sm:$0xff] }
 0x201   : > { %v1251_v42 = vadd.f32 -0.28449672, %v1243_v34  ;;  %v1341_v44 = vmul.f32 %v1333_v36, %v4561_v7  ;;  %v1336_v47 = vadd.f32 1.0, %v1328_v13  ;;  %v1268_v49 = vadd.f32 0.2548296, %v1260_v14 }
 0x202   : > { %v1327_v38 = vmul.f32 %v1319_v26, %v1159_v30  ;;  %v1136_v53 = vmul.f32 0.5, %v4521_v27  ;;  %v1162_v54 = vsel %vm1154_vm6, 1.0, %v4107_v10  ;;  %v1322_v48 = vsub.f32 1.0, %v1314_v40 }
 0x203   : > { %v1259_v55 = vmul.f32 %v4612_v41, %v1251_v42  ;;  %3233 = vmatprep.mubr.msk.f32.mxu1 %vm1360_vm4, %v1341_v44  ;;  %v1313_v7 = vmul.f32 %v3561_v2, %v1273_v61  ;;  %v1276_v56 = vmul.f32 %v4607_v25, %v1268_v49  ;;  %v1161_v4 = vsel %vm1153_vm7, 1.0, %v4107_v10 }
 0x204   : > { %v1335_v32 = vadd.f32 1.0, %v1327_v38  ;;  %3234 = vmatmul.mubr.msk.f32.vlgmr.msra.gmra.mxu1 %vm1360_vm4, %v1342_v51  ;;  %v1330_v16 = vmul.f32 %v1322_v48, %v1162_v54  ;;  %v1344_v62 = vmul.f32 %v1336_v47, %v1136_v53  ;;  %v1164_v6 = vsel %vm1156_vm8, 1.0, %v4107_v10 }
 0x205   : > { %v1267_v60 = vadd.f32 0.2548296, %v1259_v55  ;;  %v1321_v27 = vsub.f32 1.0, %v1313_v7  ;;  %v1316_v63 = vmul.f32 %v3563_v45, %v1276_v56  ;;  %v1138_v9 = vmul.f32 0.5, %v4533_v43 }
 0x206   : > { %v1343_v3 = vmul.f32 %v1335_v32, %v4581_v33  ;;  %v1338_v25 = vadd.f32 1.0, %v1330_v16  ;;  %v1139_v18 = vmul.f32 0.5, %v4550_v59  ;;  %v4108_v43 = vmov 0.0  }
 0x207   : > { %v1275_v33 = vmul.f32 %v4612_v41, %v1267_v60  ;;  %v1329_v50 = vmul.f32 %v1321_v27, %v1161_v4  ;;  %v1324_v5 = vsub.f32 1.0, %v1316_v63  ;;  %v1163_v41 = vsel %vm1155_vm9, 1.0, %v4107_v10  ;;  %1495 = vst.msk [vmem:[#allocation2 + $0x20] sm:$0xff] %vm1360_vm4, %v4108_v43  ;;  %1490 = vst.msk [vmem:[#allocation2] sm:$0xff] %vm1360_vm4, %v4108_v43 }
 0x208   : > { %3236 = vmatprep.mubr.msk.f32.mxu1 %vm1360_vm4, %v1343_v3  ;;  %v1346_v11 = vmul.f32 %v1338_v25, %v1138_v9  ;;  %1496 = vst.msk [vmem:[#allocation2 + $0x28] sm:$0x3] %vm1491_vm10, %v4108_v43  ;;  %1492 = vst.msk [vmem:[#allocation2 + $0x8] sm:$0x3] %vm1491_vm10, %v4108_v43  ;;  %v4683_v59 = vshrl.u32 %v1530_v52, 7 }
 0x209   : > { %3237 = vmatmul.mubr.msk.f32.gmra.mxu1 %vm1360_vm4, %v1344_v62  ;;  %v1315_v21 = vmul.f32 %v3565_v57, %v1275_v33  ;;  %v1337_v31 = vadd.f32 1.0, %v1329_v50  ;;  %v1332_v8 = vmul.f32 %v1324_v5, %v1164_v6  ;;  %1493 = vst.msk [vmem:[#allocation2 + $0x10] sm:$0xff] %vm1360_vm4, %v4108_v43  ;;  %1497 = vst.msk [vmem:[#allocation2 + $0x30] sm:$0xff] %vm1360_vm4, %v4108_v43  ;;  %v4754_v5 = vld [vmem:[%s5337_s4 + $0x8] ss:$0 sm:$0xff] }
 0x20a   : > { %1494 = vst.msk [vmem:[#allocation2 + $0x18] sm:$0x3] %vm1491_vm10, %v4108_v43  ;;  %1498 = vst.msk [vmem:[#allocation2 + $0x38] sm:$0x3] %vm1491_vm10, %v4108_v43  ;;  %v4686_v10 = vsub.s32 0, %v4683_v59  ;;  %v1552_v22 = vsub.s32 1, %v4683_v59 }
 0x20b   : > { %v1323_v15 = vsub.f32 1.0, %v1315_v21  ;;  %v1345_v12 = vmul.f32 %v1337_v31, %v1137_v58  ;;  %v1340_v17 = vadd.f32 1.0, %v1332_v8  ;;  %1499 = vst.msk [vmem:[#allocation2 + $0x40] sm:$0xff] %vm1360_vm4, %v4108_v43  ;;  %1501 = vst.msk [vmem:[#allocation2 + $0x50] sm:$0xff] %vm1360_vm4, %v4108_v43  ;;  %v1580_v26 = vsub.s32 2, %v4683_v59 }
 0x20c   : > { %1500 = vst.msk [vmem:[#allocation2 + $0x48] sm:$0x3] %vm1491_vm10, %v4108_v43  ;;  %1502 = vst.msk [vmem:[#allocation2 + $0x58] sm:$0x3] %vm1491_vm10, %v4108_v43  ;;  %v4695_v24 = vrot.slane %v1520_v35, %v4686_v10  ;;  %v4699_v13 = vrot.slane %v1520_v35, %v1552_v22  ;;  %v1608_v44 = vsub.s32 3, %v4683_v59  ;;  %v1693_v45 = vsub.s32 6, %v4683_v59 }
 0x20d   : > { %v1331_v0 = vmul.f32 %v1323_v15, %v1163_v41  ;;  %3239 = vmatprep.mubr.msk.f32.mxu1 %vm1360_vm4, %v1345_v12  ;;  %v1348_v20 = vmul.f32 %v1340_v17, %v1140_v46  ;;  %1503 = vst.msk [vmem:[#allocation2 + $0x60] sm:$0xff] %vm1360_vm4, %v4108_v43  ;;  %1505 = vst.msk [vmem:[#allocation2 + $0x70] sm:$0xff] %vm1360_vm4, %v4108_v43  ;;  %v4714_v39 = vrot.slane %v1520_v35, %v1580_v26 }
 0x20e   : > { %3240 = vmatmul.mubr.msk.f32.gmra.mxu1 %vm1360_vm4, %v1346_v11  ;;  %1504 = vst.msk [vmem:[#allocation2 + $0x68] sm:$0x3] %vm1491_vm10, %v4108_v43  ;;  %1506 = vst.msk [vmem:[#allocation2 + $0x78] sm:$0x3] %vm1491_vm10, %v4108_v43  ;;  %v1522_v29 = vld [vmem:[#allocation2] sm:$0xff]  ;;  %v1721_v49 = vsub.s32 7, %v4683_v59  ;;  %v4736_v55 = vrot.slane %v1520_v35, %v1693_v45  ;;  %v4740_v16 = vrot.slane %v1520_v35, %v1608_v44 }
 0x20f   : > { %v1339_v19 = vadd.f32 1.0, %v1331_v0  ;;  %1507 = vst.msk [vmem:[#allocation2 + $0x80] sm:$0xff] %vm1360_vm4, %v4108_v43  ;;  %1509 = vst.msk [vmem:[#allocation2 + $0x90] sm:$0xff] %vm1360_vm4, %v4108_v43  ;;  %v1542_v30 = vld [vmem:[#allocation2 + $0x1] sm:$0xff]  ;;  %v1534_v2 = vmul.f32 %v4695_v24, %v1522_v29  ;;  %v1636_v53 = vsub.s32 4, %v4683_v59  ;;  %v1664_v54 = vsub.s32 5, %v4683_v59 }
 0x210   : > { %1508 = vst.msk [vmem:[#allocation2 + $0x88] sm:$0x3] %vm1491_vm10, %v4108_v43  ;;  %1510 = vst.msk [vmem:[#allocation2 + $0x98] sm:$0x3] %vm1491_vm10, %v4108_v43  ;;  %v1554_v38 = vmul.f32 %v4699_v13, %v1542_v30  ;;  %v1570_v51 = vld [vmem:[#allocation2 + $0x2] sm:$0xff]  ;;  %v4744_v60 = vrot.slane %v1520_v35, %v1721_v49 }
 0x211   : > { %v1347_v1 = vmul.f32 %v1339_v19, %v1139_v18  ;;  %v1582_v61 = vmul.f32 %v4714_v39, %v1570_v51  ;;  %v4759_v6 = vrot.slane %v1520_v35, %v1636_v53  ;;  %v4763_v58 = vrot.slane %v1520_v35, %v1664_v54 }
 0x212   : > { %v1562_v32 = vadd.f32 %v1554_v38, %v1534_v2 }
 0x213   : > { %3242 = vmatprep.mubr.msk.f32.mxu1 %vm1360_vm4, %v1347_v1 }
 0x214   : > { %3243 = vmatmul.mubr.msk.f32.gmra.mxu1 %vm1360_vm4, %v1348_v20  ;;  %v1590_v56 = vadd.f32 %v1582_v61, %v1562_v32 }
 0x2c4   : > { %v3235_v28 = vpop.f32.mrf.mxu1 }
 0x2c5   : > { %v4703_v37 = vadd.f32 %v3235_v28, %v4692_v23 }
 0x2c6   : > { %v1451_v34 = vpop.f32.mrf.mxu1 }
 0x2c7   : > { %1513 = vst.msk [vmem:[#allocation2 + $0x21] sm:$0xff] %vm1360_vm4, %v4703_v37  ;;  %v4708_v36 = vadd.f32 %v4692_v23, %v1451_v34 }
 0x2c9   : > { %v3238_v14 = vpop.f32.mrf.mxu1  ;;  %1512 = vst.msk [vmem:[#allocation2 + $0x11] sm:$0xff] %vm1360_vm4, %v4708_v36 }
 0x2ca   : > { %v4719_v40 = vadd.f32 %v3238_v14, %v4692_v23 }
 0x2cb   : > { %v1461_v42 = vpop.f32.mrf.mxu1 }
 0x2cc   : > { %1515 = vst.msk [vmem:[#allocation2 + $0x41] sm:$0xff] %vm1360_vm4, %v4719_v40  ;;  %v4726_v47 = vadd.f32 %v4692_v23, %v1461_v42 }
 0x2ce   : > { %1514 = vst.msk [vmem:[#allocation2 + $0x31] sm:$0xff] %vm1360_vm4, %v4726_v47  ;;  %v1683_v48 = vld [vmem:[#allocation2 + $0x20] sm:$0xff]  ;;  %v3241_v7 = vpop.f32.mrf.mxu1 }
 0x2cf   : > { %v1711_v3 = vld [vmem:[#allocation2 + $0x21] sm:$0xff]  ;;  %v1536_v62 = vmul.f32 %v1683_v48, %v4695_v24  ;;  %v4748_v27 = vadd.f32 %v3241_v7, %v4692_v23  ;;  %v1695_v9 = vmul.f32 %v4736_v55, %v1683_v48  ;;  %v1611_v61 = vmul.f32 %v1683_v48, %v4740_v16 }
 0x2d0   : > { %v1598_v63 = vld [vmem:[#allocation2 + $0x10] sm:$0xff]  ;;  %v1739_v4 = vld [vmem:[#allocation2 + $0x22] sm:$0xff]  ;;  %v1556_v33 = vmul.f32 %v1711_v3, %v4699_v13  ;;  %v1471_v50 = vpop.f32.mrf.mxu1  ;;  %v1723_v0 = vmul.f32 %v4744_v60, %v1711_v3 }
 0x2d1   : > { %v1626_v57 = vld [vmem:[#allocation2 + $0x11] sm:$0xff]  ;;  %v1610_v25 = vmul.f32 %v4740_v16, %v1598_v63  ;;  %v1535_v31 = vmul.f32 %v1598_v63, %v4695_v24  ;;  %1517 = vst.msk [vmem:[#allocation2 + $0x61] sm:$0xff] %vm1360_vm4, %v4748_v27  ;;  %v4769_v8 = vadd.f32 %v4692_v23, %v1471_v50  ;;  %v1584_v17 = vmul.f32 %v1739_v4, %v4714_v39 }
 0x2d2   : > { %v1654_v21 = vld [vmem:[#allocation2 + $0x12] sm:$0xff]  ;;  %v1564_v15 = vadd.f32 %v1556_v33, %v1536_v62  ;;  %v1555_v12 = vmul.f32 %v1626_v57, %v4699_v13  ;;  %v1638_v11 = vmul.f32 %v4759_v6, %v1626_v57  ;;  %v1751_v20 = vmul.f32 %v4754_v5, %v1739_v4 }
 0x2d3   : > { %v1618_v41 = vadd.f32 %v1610_v25, %v1590_v56  ;;  %v1685_v18 = vld [vmem:[#allocation2 + $0x40] sm:$0xff]  ;;  %1516 = vst.msk [vmem:[#allocation2 + $0x51] sm:$0xff] %vm1360_vm4, %v4769_v8  ;;  %v1666_v1 = vmul.f32 %v4763_v58, %v1654_v21  ;;  %v1583_v28 = vmul.f32 %v1654_v21, %v4714_v39  ;;  %v1639_v33 = vmul.f32 %v1711_v3, %v4759_v6 }
 0x2d4   : > { %v1713_v19 = vld [vmem:[#allocation2 + $0x41] sm:$0xff]  ;;  %v3244_v46 = vpop.f32.mrf.mxu1  ;;  %v1563_v35 = vadd.f32 %v1555_v12, %v1535_v31  ;;  %v1592_v34 = vadd.f32 %v1584_v17, %v1564_v15  ;;  %v1697_v51 = vmul.f32 %v4736_v55, %v1685_v18  ;;  %v1538_v3 = vmul.f32 %v1685_v18, %v4695_v24 }
 0x2d5   : > { %v1600_v43 = vld [vmem:[#allocation2 + $0x30] sm:$0xff]  ;;  %v4782_v29 = vadd.f32 %v3244_v46, %v4692_v23  ;;  %v1646_v30 = vadd.f32 %v1638_v11, %v1618_v41  ;;  %v1725_v42 = vmul.f32 %v4744_v60, %v1713_v19  ;;  %v1741_v15 = vld [vmem:[#allocation2 + $0x42] sm:$0xff] }
 0x2d6   : > { %v1628_v52 = vld [vmem:[#allocation2 + $0x31] sm:$0xff]  ;;  %v1612_v2 = vmul.f32 %v4740_v16, %v1600_v43  ;;  %v1481_v38 = vpop.f32.mrf.mxu1  ;;  %v1591_v32 = vadd.f32 %v1583_v28, %v1563_v35  ;;  %v1537_v50 = vmul.f32 %v1600_v43, %v4695_v24  ;;  %v1558_v28 = vmul.f32 %v1713_v19, %v4699_v13 }
 0x2d7   : > { %v1656_v14 = vld [vmem:[#allocation2 + $0x32] sm:$0xff]  ;;  %1519 = vst.msk [vmem:[#allocation2 + $0x81] sm:$0xff] %vm1360_vm4, %v4782_v29  ;;  %v4791_v7 = vadd.f32 %v4692_v23, %v1481_v38  ;;  %v1674_v56 = vadd.f32 %v1666_v1, %v1646_v30  ;;  %v1640_v63 = vmul.f32 %v4759_v6, %v1628_v52  ;;  %v1557_v25 = vmul.f32 %v1628_v52, %v4699_v13 }
 0x2d8   : > { %v1620_v62 = vadd.f32 %v1612_v2, %v1592_v34  ;;  %v1619_v57 = vadd.f32 %v1611_v61, %v1591_v32  ;;  %v1668_v31 = vmul.f32 %v4763_v58, %v1656_v14  ;;  %v1667_v23 = vmul.f32 %v1739_v4, %v4763_v58 }
 0x2d9   : > { %1518 = vst.msk [vmem:[#allocation2 + $0x71] sm:$0xff] %vm1360_vm4, %v4791_v7  ;;  %v1703_v48 = vadd.f32 %v1695_v9, %v1674_v56  ;;  %v1565_v41 = vadd.f32 %v1557_v25, %v1537_v50  ;;  %v1585_v11 = vmul.f32 %v1656_v14, %v4714_v39  ;;  %v1696_v1 = vmul.f32 %v4736_v55, %v1600_v43 }
 0x2da   : > { %v1648_v21 = vadd.f32 %v1640_v63, %v1620_v62  ;;  %v1647_v12 = vadd.f32 %v1639_v33, %v1619_v57  ;;  %v1686_v35 = vld [vmem:[#allocation2 + $0x50] sm:$0xff]  ;;  %v1724_v30 = vmul.f32 %v4744_v60, %v1628_v52  ;;  %v1613_v4 = vmul.f32 %v1685_v18, %v4740_v16 }
 0x2db   : > { %v1731_v17 = vadd.f32 %v1723_v0, %v1703_v48  ;;  %v1593_v34 = vadd.f32 %v1585_v11, %v1565_v41  ;;  %v1566_v32 = vadd.f32 %v1558_v28, %v1538_v3  ;;  %v1586_v61 = vmul.f32 %v1741_v15, %v4714_v39  ;;  %v1714_v43 = vld [vmem:[#allocation2 + $0x51] sm:$0xff]  ;;  %v1687_v11 = vld [vmem:[#allocation2 + $0x60] sm:$0xff] }
 0x2dc   : > { %v1676_v46 = vadd.f32 %v1668_v31, %v1648_v21  ;;  %v1675_v9 = vadd.f32 %v1667_v23, %v1647_v12  ;;  %v1641_v62 = vmul.f32 %v1713_v19, %v4759_v6  ;;  %v1614_v63 = vmul.f32 %v1686_v35, %v4740_v16  ;;  %v1742_v48 = vld [vmem:[#allocation2 + $0x52] sm:$0xff] }
 0x2dd   : > { %v4807_v2 = vadd.f32 %v1751_v20, %v1731_v17  ;;  %v1621_v0 = vadd.f32 %v1613_v4, %v1593_v34  ;;  %v1753_v33 = vmul.f32 %v4754_v5, %v1741_v15  ;;  %v1594_v18 = vadd.f32 %v1586_v61, %v1566_v32 }
 0x2de   : > { %v1705_v38 = vadd.f32 %v1697_v51, %v1676_v46  ;;  %v1704_v56 = vadd.f32 %v1696_v1, %v1675_v9  ;;  %v1752_v51 = vmul.f32 %v4754_v5, %v1656_v14  ;;  %v1669_v25 = vmul.f32 %v1741_v15, %v4763_v58  ;;  %v1715_v1 = vld [vmem:[#allocation2 + $0x61] sm:$0xff] }
 0x2df   : > { %v1769_v57 = vsel %vm1360_vm4, %v4807_v2, 0.0  ;;  %v1649_v50 = vadd.f32 %v1641_v62, %v1621_v0  ;;  %v1622_v19 = vadd.f32 %v1614_v63, %v1594_v18  ;;  %v1642_v31 = vmul.f32 %v1714_v43, %v4759_v6 }
 0x2e0   : > { %v1733_v52 = vadd.f32 %v1725_v42, %v1705_v38  ;;  %1770 = vadd.xlane.f32.xlu0 %v1769_v57  ;;  %v1732_v20 = vadd.f32 %v1724_v30, %v1704_v56  ;;  %v1539_v23 = vmul.f32 %v1686_v35, %v4695_v24  ;;  %v1698_v41 = vmul.f32 %v4736_v55, %v1686_v35  ;;  %v1743_v30 = vld [vmem:[#allocation2 + $0x62] sm:$0xff]  ;;  %v1688_v56 = vld [vmem:[#allocation2 + $0x70] sm:$0xff] }
 0x2e1   : > { %v1677_v42 = vadd.f32 %v1669_v25, %v1649_v50  ;;  %v1559_v3 = vmul.f32 %v1714_v43, %v4699_v13  ;;  %v1726_v15 = vmul.f32 %v4744_v60, %v1714_v43  ;;  %v1650_v17 = vadd.f32 %v1642_v31, %v1622_v19  ;;  %v1716_v50 = vld [vmem:[#allocation2 + $0x71] sm:$0xff] }
 0x2e2   : > { %v4817_v21 = vadd.f32 %v1753_v33, %v1733_v52  ;;  %v4821_v12 = vadd.f32 %v1752_v51, %v1732_v20  ;;  %v1670_v46 = vmul.f32 %v1742_v48, %v4763_v58  ;;  %v1587_v35 = vmul.f32 %v1742_v48, %v4714_v39 }
 0x2e3   : > { %v1706_v9 = vadd.f32 %v1698_v41, %v1677_v42  ;;  %v1567_v34 = vadd.f32 %v1559_v3, %v1539_v23  ;;  %v1754_v4 = vmul.f32 %v4754_v5, %v1742_v48  ;;  %v1699_v32 = vmul.f32 %v4736_v55, %v1687_v11 }
 0x2e4   : > { %v1775_v14 = vsel %vm1360_vm4, %v4817_v21, 0.0  ;;  %v1772_v28 = vsel %vm1360_vm4, %v4821_v12, 0.0  ;;  %v1678_v38 = vadd.f32 %v1670_v46, %v1650_v17  ;;  %v1615_v61 = vmul.f32 %v1687_v11, %v4740_v16 }
 0x2e5   : > { %1776 = vadd.xlane.f32.xlu1 %v1775_v14  ;;  %1773 = vadd.xlane.f32.xlu0 %v1772_v28  ;;  %v1734_v0 = vadd.f32 %v1726_v15, %v1706_v9  ;;  %v1595_v62 = vadd.f32 %v1587_v35, %v1567_v34  ;;  %v1540_v43 = vmul.f32 %v1687_v11, %v4695_v24  ;;  %v1744_v11 = vld [vmem:[#allocation2 + $0x72] sm:$0xff] }
 0x2e6   : > { %v1560_v63 = vmul.f32 %v1715_v1, %v4699_v13  ;;  %v1707_v57 = vadd.f32 %v1699_v32, %v1678_v38  ;;  %v1727_v52 = vmul.f32 %v4744_v60, %v1715_v1  ;;  %v1643_v33 = vmul.f32 %v1715_v1, %v4759_v6 }
 0x2e7   : > { %v1588_v18 = vmul.f32 %v1743_v30, %v4714_v39  ;;  %v4840_v20 = vadd.f32 %v1754_v4, %v1734_v0  ;;  %v1623_v51 = vadd.f32 %v1615_v61, %v1595_v62  ;;  %v1616_v48 = vmul.f32 %v1688_v56, %v4740_v16  ;;  %v1717_v61 = vld [vmem:[#allocation2 + $0x81] sm:$0xff] }
 0x2e8   : > { %v1568_v25 = vadd.f32 %v1560_v63, %v1540_v43  ;;  %v1735_v19 = vadd.f32 %v1727_v52, %v1707_v57  ;;  %v1755_v31 = vmul.f32 %v4754_v5, %v1743_v30  ;;  %v1671_v23 = vmul.f32 %v1743_v30, %v4763_v58  ;;  %v1689_v30 = vld [vmem:[#allocation2 + $0x80] sm:$0xff] }
 0x2e9   : > { %v1778_v42 = vsel %vm1360_vm4, %v4840_v20, 0.0  ;;  %v1651_v41 = vadd.f32 %v1643_v33, %v1623_v51  ;;  %v1541_v14 = vmul.f32 %v1688_v56, %v4695_v24  ;;  %v1561_v17 = vmul.f32 %v1716_v50, %v4699_v13  ;;  %v1745_v52 = vld [vmem:[#allocation2 + $0x82] sm:$0xff]  ;;  %v1690_v33 = vld [vmem:[#allocation2 + $0x90] sm:$0xff] }
 0x2ea   : > { %v1596_v3 = vadd.f32 %v1588_v18, %v1568_v25  ;;  %1779 = vadd.xlane.f32.xlu1 %v1778_v42  ;;  %v4848_v15 = vadd.f32 %v1755_v31, %v1735_v19  ;;  %v1700_v1 = vmul.f32 %v4736_v55, %v1688_v56  ;;  %v1644_v9 = vmul.f32 %v1716_v50, %v4759_v6 }
 0x2eb   : > { %v1679_v46 = vadd.f32 %v1671_v23, %v1651_v41  ;;  %v1569_v35 = vadd.f32 %v1561_v17, %v1541_v14  ;;  %v1589_v4 = vmul.f32 %v1744_v11, %v4714_v39  ;;  %v1728_v38 = vmul.f32 %v4744_v60, %v1716_v50 }
 0x2ec   : > { %v1624_v28 = vadd.f32 %v1616_v48, %v1596_v3  ;;  %v1781_v34 = vsel %vm1360_vm4, %v4848_v15, 0.0  ;;  %v1672_v13 = vmul.f32 %v1744_v11, %v4763_v58  ;;  %v1617_v56 = vmul.f32 %v1689_v30, %v4740_v16  ;;  %v1718_v48 = vld [vmem:[#allocation2 + $0x91] sm:$0xff] }
 0x2ed   : > { %1782 = vadd.xlane.f32.xlu0 %v1781_v34  ;;  %v1708_v24 = vadd.f32 %v1700_v1, %v1679_v46  ;;  %v1597_v0 = vadd.f32 %v1589_v4, %v1569_v35  ;;  %v1756_v43 = vmul.f32 %v4754_v5, %v1744_v11  ;;  %v1701_v57 = vmul.f32 %v4736_v55, %v1689_v30  ;;  %v1746_v11 = vld [vmem:[#allocation2 + $0x92] sm:$0xff] }
 0x2ee   : > { %v1652_v32 = vadd.f32 %v1644_v9, %v1624_v28  ;;  %v1645_v18 = vmul.f32 %v1717_v61, %v4759_v6  ;;  %v1729_v25 = vmul.f32 %v4744_v60, %v1717_v61  ;;  %v1673_v31 = vmul.f32 %v1745_v52, %v4763_v58 }
 0x2ef   : > { %v1736_v62 = vadd.f32 %v1728_v38, %v1708_v24  ;;  %v1625_v39 = vadd.f32 %v1617_v56, %v1597_v0  ;;  %v1702_v16 = vmul.f32 %v4736_v55, %v1690_v33  ;;  %v1757_v41 = vmul.f32 %v4754_v5, %v1745_v52 }
 0x2f0   : > { %v1680_v63 = vadd.f32 %v1672_v13, %v1652_v32  ;;  %v1730_v6 = vmul.f32 %v4744_v60, %v1718_v48  ;;  %v1758_v46 = vmul.f32 %v4754_v5, %v1746_v11 }
 0x2f1   : > { %v1764_v51 = vadd.f32 %v1756_v43, %v1736_v62  ;;  %v1653_v19 = vadd.f32 %v1645_v18, %v1625_v39 }
 0x2f2   : > { %v1709_v50 = vadd.f32 %v1701_v57, %v1680_v63 }
 0x2f3   : > { %v1784_v23 = vsel %vm1360_vm4, %v1764_v51, 0.0  ;;  %v1681_v3 = vadd.f32 %v1673_v31, %v1653_v19 }
 0x2f4   : > { %v1737_v42 = vadd.f32 %v1729_v25, %v1709_v50  ;;  %1785 = vadd.xlane.f32.xlu1 %v1784_v23 }
 0x2f5   : > { %v1710_v17 = vadd.f32 %v1702_v16, %v1681_v3 }
 0x2f6   : > { %v1765_v14 = vadd.f32 %v1757_v41, %v1737_v42 }
 0x2f7   : > { %v1738_v58 = vadd.f32 %v1730_v6, %v1710_v17 }
 0x2f8   : > { %v1787_v1 = vsel %vm1360_vm4, %v1765_v14, 0.0 }
 0x2f9   : > { %1788 = vadd.xlane.f32.xlu0 %v1787_v1  ;;  %v1766_v28 = vadd.f32 %v1758_v46, %v1738_v58 }
 0x2fb   : > { %v1790_v55 = vsel %vm1360_vm4, %v1766_v28, 0.0 }
 0x2fc   : > { %1791 = vadd.xlane.f32.xlu1 %v1790_v55 }
 0x369   : > { %v1771_v9 = vpop.xlane.xlu0 %1770 }
 0x36a   : > { %v1794_v30 = vmul.f32 0.03125, %v1771_v9 }
 0x36c   : > { %v4872_v34 = vsub.f32 %v4807_v2, %v1794_v30 }
 0x36e   : > { %v1777_v35 = vpop.xlane.xlu1 %1776  ;;  %v1774_v60 = vpop.xlane.xlu0 %1773  ;;  %v1810_v24 = vmul.f32 %v4872_v34, %v4872_v34 }
 0x36f   : > { %v1796_v4 = vmul.f32 0.03125, %v1777_v35  ;;  %v1795_v5 = vmul.f32 0.03125, %v1774_v60 }
 0x370   : > { %v1818_v32 = vsel %vm1360_vm4, %v1810_v24, 0.0 }
 0x371   : > { %v4877_v38 = vsub.f32 %v4817_v21, %v1796_v4  ;;  %v4881_v13 = vsub.f32 %v4821_v12, %v1795_v5  ;;  %1819 = vadd.xlane.f32.xlu0 %v1818_v32 }
 0x373   : > { %v1812_v2 = vmul.f32 %v4877_v38, %v4877_v38  ;;  %v1811_v61 = vmul.f32 %v4881_v13, %v4881_v13  ;;  %v1780_v0 = vpop.xlane.xlu1 %1779 }
 0x374   : > { %v1797_v62 = vmul.f32 0.03125, %v1780_v0 }
 0x375   : > { %v1824_v56 = vsel %vm1360_vm4, %v1812_v2, 0.0  ;;  %v1821_v21 = vsel %vm1360_vm4, %v1811_v61, 0.0  ;;  %v4916_v61 = vld [vmem:[#allocation8] ss:$0 sm:$0xff] }
 0x376   : > { %1825 = vadd.xlane.f32.xlu0 %v1824_v56  ;;  %1822 = vadd.xlane.f32.xlu1 %v1821_v21  ;;  %v4890_v43 = vsub.f32 %v4840_v20, %v1797_v62  ;;  %v1783_v12 = vpop.xlane.xlu0 %1782  ;;  %v4919_v56 = vld [vmem:[#allocation9] ss:$0 sm:$0xff] }
 0x377   : > { %v1798_v63 = vmul.f32 0.03125, %v1783_v12 }
 0x378   : > { %v1813_v57 = vmul.f32 %v4890_v43, %v4890_v43 }
 0x379   : > { %v4895_v52 = vsub.f32 %v4848_v15, %v1798_v63 }
 0x37a   : > { %v1827_v33 = vsel %vm1360_vm4, %v1813_v57, 0.0 }
 0x37b   : > { %1828 = vadd.xlane.f32.xlu1 %v1827_v33  ;;  %v1814_v39 = vmul.f32 %v4895_v52, %v4895_v52 }
 0x37d   : > { %v1786_v18 = vpop.xlane.xlu1 %1785  ;;  %v1830_v50 = vsel %vm1360_vm4, %v1814_v39, 0.0 }
 0x37e   : > { %v1799_v25 = vmul.f32 0.03125, %v1786_v18  ;;  %1831 = vadd.xlane.f32.xlu0 %v1830_v50 }
 0x380   : > { %v4901_v20 = vsub.f32 %v1764_v51, %v1799_v25 }
 0x382   : > { %v1789_v48 = vpop.xlane.xlu0 %1788  ;;  %v1815_v31 = vmul.f32 %v4901_v20, %v4901_v20 }
 0x383   : > { %v1800_v19 = vmul.f32 0.03125, %v1789_v48 }
 0x384   : > { %v1833_v16 = vsel %vm1360_vm4, %v1815_v31, 0.0 }
 0x385   : > { %v4905_v15 = vsub.f32 %v1765_v14, %v1800_v19  ;;  %1834 = vadd.xlane.f32.xlu1 %v1833_v16  ;;  %v1792_v23 = vpop.xlane.xlu1 %1791 }
 0x386   : > { %v1801_v41 = vmul.f32 0.03125, %v1792_v23 }
 0x387   : > { %v1816_v42 = vmul.f32 %v4905_v15, %v4905_v15 }
 0x388   : > { %v4911_v3 = vsub.f32 %v1766_v28, %v1801_v41 }
 0x389   : > { %v1836_v11 = vsel %vm1360_vm4, %v1816_v42, 0.0 }
 0x38a   : > { %1837 = vadd.xlane.f32.xlu0 %v1836_v11  ;;  %v1817_v51 = vmul.f32 %v4911_v3, %v4911_v3 }
 0x38c   : > { %v1839_v6 = vsel %vm1360_vm4, %v1817_v51, 0.0 }
 0x38d   : > { %1840 = vadd.xlane.f32.xlu1 %v1839_v6 }
 0x3fa   : > { %v1820_v14 = vpop.xlane.xlu0 %1819 }
 0x3fb   : > { %v1842_v17 = vmul.f32 0.03125, %v1820_v14 }
 0x3fd   : > { %v1850_v46 = vadd.f32 1e-05, %v1842_v17 }
 0x3ff   : > { %v1826_v1 = vpop.xlane.xlu0 %1825  ;;  %3566 = vrsqrt.f32 %v1850_v46  ;;  %v1823_v58 = vpop.xlane.xlu1 %1822 }
 0x400   : > { %v1844_v55 = vmul.f32 0.03125, %v1826_v1  ;;  %v1843_v9 = vmul.f32 0.03125, %v1823_v58 }
 0x402   : > { %v1852_v30 = vadd.f32 1e-05, %v1844_v55  ;;  %v1851_v35 = vadd.f32 1e-05, %v1843_v9 }
 0x404   : > { %3568 = vrsqrt.f32 %v1852_v30  ;;  %v1829_v28 = vpop.xlane.xlu1 %1828 }
 0x405   : > { %3570 = vrsqrt.f32 %v1851_v35  ;;  %v1845_v4 = vmul.f32 0.03125, %v1829_v28 }
 0x407   : > { %v1853_v60 = vadd.f32 1e-05, %v1845_v4  ;;  %v1832_v24 = vpop.xlane.xlu0 %1831 }
 0x408   : > { %v1846_v5 = vmul.f32 0.03125, %v1832_v24 }
 0x409   : > { %3572 = vrsqrt.f32 %v1853_v60 }
 0x40a   : > { %v1854_v32 = vadd.f32 1e-05, %v1846_v5 }
 0x40c   : > { %v3567_v2 = vpop.eup %3566  ;;  %3574 = vrsqrt.f32 %v1854_v32 }
 0x40d   : > { %v1866_v0 = vmul.f32 %v3567_v2, %v4872_v34 }
 0x40e   : > { %v1835_v21 = vpop.xlane.xlu1 %1834 }
 0x40f   : > { %v1880_v62 = vmul.f32 %v4916_v61, %v1866_v0  ;;  %v1847_v63 = vmul.f32 0.03125, %v1835_v21 }
 0x411   : > { %v3569_v12 = vpop.eup %3568  ;;  %v1894_v33 = vadd.f32 %v4919_v56, %v1880_v62  ;;  %v1855_v50 = vadd.f32 1e-05, %v1847_v63 }
 0x412   : > { %v3571_v57 = vpop.eup %3570  ;;  %v1868_v39 = vmul.f32 %v3569_v12, %v4877_v38 }
 0x413   : > { %v1867_v18 = vmul.f32 %v3571_v57, %v4881_v13  ;;  %v1902_v25 = vadd.f32 3.0, %v1894_v33  ;;  %v1838_v34 = vpop.xlane.xlu0 %1837  ;;  %3576 = vrsqrt.f32 %v1855_v50 }
 0x414   : > { %v1882_v48 = vmul.f32 %v4916_v61, %v1868_v39  ;;  %v1848_v31 = vmul.f32 0.03125, %v1838_v34 }
 0x415   : > { %v1881_v19 = vmul.f32 %v4916_v61, %v1867_v18  ;;  %v1910_v16 = vmax.f32 %v1902_v25, 0.0 }
 0x416   : > { %v1896_v23 = vadd.f32 %v4919_v56, %v1882_v48  ;;  %v1856_v41 = vadd.f32 1e-05, %v1848_v31  ;;  %v3573_v11 = vpop.eup %3572  ;;  %v1841_v14 = vpop.xlane.xlu1 %1840 }
 0x417   : > { %v1895_v42 = vadd.f32 %v4919_v56, %v1881_v19  ;;  %v1918_v51 = vmin.f32 %v1910_v16, 6.0  ;;  %v1869_v13 = vmul.f32 %v3573_v11, %v4890_v43  ;;  %v1849_v46 = vmul.f32 0.03125, %v1841_v14 }
 0x418   : > { %v1904_v38 = vadd.f32 3.0, %v1896_v23  ;;  %3578 = vrsqrt.f32 %v1856_v41 }
 0x419   : > { %v1903_v6 = vadd.f32 3.0, %v1895_v42  ;;  %v3575_v1 = vpop.eup %3574  ;;  %v1883_v55 = vmul.f32 %v4916_v61, %v1869_v13  ;;  %v1926_v9 = vmul.f32 %v1918_v51, %v1894_v33  ;;  %v1857_v28 = vadd.f32 1e-05, %v1849_v46 }
 0x41a   : > { %v1912_v17 = vmax.f32 %v1904_v38, 0.0  ;;  %v1870_v35 = vmul.f32 %v3575_v1, %v4895_v52 }
 0x41b   : > { %v1911_v58 = vmax.f32 %v1903_v6, 0.0  ;;  %v1897_v60 = vadd.f32 %v4919_v56, %v1883_v55  ;;  %3580 = vrsqrt.f32 %v1857_v28  ;;  %v4934_v32 = vmul.f32 0.16666667, %v1926_v9 }
 0x41c   : > { %v1920_v30 = vmin.f32 %v1912_v17, 6.0  ;;  %v1884_v24 = vmul.f32 %v4916_v61, %v1870_v35 }
 0x41d   : > { %v1919_v4 = vmin.f32 %v1911_v58, 6.0  ;;  %v1905_v5 = vadd.f32 3.0, %v1897_v60  ;;  %v1942_v50 = vsel %vm1360_vm4, %v4934_v32, 0.0 }
 0x41e   : > { %v1928_v2 = vmul.f32 %v1920_v30, %v1896_v23  ;;  %v1898_v0 = vadd.f32 %v4919_v56, %v1884_v24 }
 0x41f   : > { %v1927_v43 = vmul.f32 %v1919_v4, %v1895_v42  ;;  %v1913_v21 = vmax.f32 %v1905_v5, 0.0 }
 0x420   : > { %v3577_v12 = vpop.eup %3576  ;;  %v1906_v63 = vadd.f32 3.0, %v1898_v0  ;;  %v4942_v39 = vmul.f32 0.16666667, %v1928_v2 }
 0x421   : > { %v4937_v62 = vmul.f32 0.16666667, %v1927_v43  ;;  %v1921_v52 = vmin.f32 %v1913_v21, 6.0  ;;  %v1871_v57 = vmul.f32 %v3577_v12, %v4901_v20 }
 0x422   : > { %v1914_v18 = vmax.f32 %v1906_v63, 0.0  ;;  %v1945_v41 = vsel %vm1360_vm4, %v4942_v39, 0.0 }
 0x423   : > { %v1943_v33 = vsel %vm1360_vm4, %v4937_v62, 0.0  ;;  %v1929_v25 = vmul.f32 %v1921_v52, %v1897_v60  ;;  %v1885_v48 = vmul.f32 %v4916_v61, %v1871_v57 }
 0x424   : > { %v1944_v34 = vadd.f32 %v1943_v33, %v1942_v50  ;;  %v1922_v31 = vmin.f32 %v1914_v18, 6.0 }
 0x425   : > { %v3579_v19 = vpop.eup %3578  ;;  %v1899_v16 = vadd.f32 %v4919_v56, %v1885_v48  ;;  %v4949_v20 = vmul.f32 0.16666667, %v1929_v25 }
 0x426   : > { %v1872_v23 = vmul.f32 %v3579_v19, %v4905_v15  ;;  %v1930_v42 = vmul.f32 %v1922_v31, %v1898_v0  ;;  %v1946_v38 = vadd.f32 %v1945_v41, %v1944_v34 }
 0x427   : > { %v1907_v51 = vadd.f32 3.0, %v1899_v16  ;;  %v1947_v6 = vsel %vm1360_vm4, %v4949_v20, 0.0 }
 0x428   : > { %v1886_v11 = vmul.f32 %v4916_v61, %v1872_v23  ;;  %v3581_v13 = vpop.eup %3580  ;;  %v4958_v15 = vmul.f32 0.16666667, %v1930_v42  ;;  %v1948_v55 = vadd.f32 %v1947_v6, %v1946_v38 }
 0x429   : > { %v1915_v17 = vmax.f32 %v1907_v51, 0.0  ;;  %v1873_v46 = vmul.f32 %v3581_v13, %v4911_v3  ;;  %v1970_v51 = vld [vmem:[%s5339_s28] sm:$0xff] }
 0x42a   : > { %v1900_v14 = vadd.f32 %v4919_v56, %v1886_v11  ;;  %v1949_v4 = vsel %vm1360_vm4, %v4958_v15, 0.0  ;;  %v4109_v11 = vmov 0  }
 0x42b   : > { %v1923_v58 = vmin.f32 %v1915_v17, 6.0  ;;  %v1887_v9 = vmul.f32 %v4916_v61, %v1873_v46  ;;  %v1950_v43 = vadd.f32 %v1949_v4, %v1948_v55  ;;  %3532 = vset.pattern.permute.xlu1 %v4109_v11  ;;  %3533 = vset.pattern.permute.xlu0 %v4109_v11  ;;  %v2007_v17 = vld [vmem:[%s5255_s12 + $0x10] sm:$0xff]  ;;  %v2006_v46 = vld [vmem:[%s5255_s12 + $0x8] sm:$0xff] }
 0x42c   : > { %v1908_v1 = vadd.f32 3.0, %v1900_v14 }
 0x42d   : > { %v1931_v35 = vmul.f32 %v1923_v58, %v1899_v16  ;;  %v1901_v28 = vadd.f32 %v4919_v56, %v1887_v9  ;;  %v1965_v16 = vld [vmem:[%s5338_s5] sm:$0xff]  ;;  %v1973_v58 = vld [vmem:[#allocation11] sm:$0xff]  ;;  %s3065_s5 = sshll.u32 %s974_s26, 4 }
 0x42e   : > { %v1916_v30 = vmax.f32 %v1908_v1, 0.0  ;;  %v2005_v1 = vld [vmem:[%s5255_s12] sm:$0xff]  ;;  %s976_s28 = scalar_lea.vmem [#allocation27], %s3065_s5  ;;  %s4110_s5 = smov [#allocation27]  }
 0x42f   : > { %v4964_v24 = vmul.f32 0.16666667, %v1931_v35  ;;  %v1909_v5 = vadd.f32 3.0, %v1901_v28  ;;  %s2824_s29 = sshll.u32 %s976_s28, 4  ;;  %s4000_s4 = sshll.u32 %s4110_s5, 4  ;;  %s5200_s29 = int_to_ptr.vmem [resolvable:$true] %s2824_s29  ;;  %s4001_s4 = int_to_ptr.vmem [resolvable:$false] %s4000_s4 }
 0x430   : > { %v1924_v60 = vmin.f32 %v1916_v30, 6.0  ;;  %s3996_s8 = scalar_lea.vmem %s5200_s29, 256  ;;  %s4002_s1 = scalar_lea.vmem %s4001_s4, 512 }
 0x431   : > { %v1951_v2 = vsel %vm1360_vm4, %v4964_v24, 0.0  ;;  %v1917_v0 = vmax.f32 %v1909_v5, 0.0  ;;  %v1987_v5 = vld [vmem:[%s5340_s11] sm:$0x1]  ;;  %p3997_p0 = scmp.ne.s32.totalorder %s5200_s29, %s3996_s8  ;;  %p4003_p9 = scmp.lt.s32.totalorder %s5200_s29, %s4001_s4 }
 0x432   : > { %v1932_v3 = vmul.f32 %v1924_v60, %v1900_v14  ;;  %v1952_v61 = vadd.f32 %v1951_v2, %v1950_v43  ;;  %v2008_v14 = vld [vmem:[%s5255_s12 + $0x18] sm:$0xff]  ;;  %p4004_p3 = scmp.lt.s32.totalorder %s4002_s1, %s3996_s8 }
 0x433   : > { %v1925_v12 = vmin.f32 %v1917_v0, 6.0  ;;  %3245 = vmatprep.subr.mxu1 %v2008_v14  ;;  %p3998_p12 = pnand %p3997_p0, %p5344_p1 }
 0x434   : > { %v4968_v21 = vmul.f32 0.16666667, %v1932_v3  ;;  %3246 = vmatpush3.msra.mxu1 %v2008_v14  ;;  %p4005_p5 = por %p4004_p3, %p4003_p9 }
 0x435   : > { %v1933_v63 = vmul.f32 %v1925_v12, %v1901_v28  ;;  %3247 = vmatprep.subr.mxu1 %v2007_v17  ;;  %p3999_p2 = pneg %p3998_p12 }
 0x436   : > { %v1953_v56 = vsel %vm1360_vm4, %v4968_v21, 0.0  ;;  %3248 = vmatpush3.msra.mxu1 %v2007_v17 }
 0x437   : > { %v1954_v52 = vadd.f32 %v1953_v56, %v1952_v61  ;;  %v4972_v57 = vmul.f32 0.16666667, %v1933_v63  ;;  %3249 = vmatprep.subr.mxu1 %v2006_v46  ;;  %p4006_p6 = pnand %p4005_p5, %p3999_p2 }
 0x438   : > { %3250 = vmatpush3.msra.mxu1 %v2006_v46 }
 0x439   : > { %v1955_v33 = vsel %vm1360_vm4, %v4972_v57, 0.0  ;;  %3251 = vmatprep.subr.mxu1 %v2005_v1 }
 0x43a   : > { %v1956_v18 = vadd.f32 %v1955_v33, %v1954_v52  ;;  %3252 = vmatpush3.msra.mxu1 %v2005_v1 }
 0x43c   : > { %v1957_v50 = vrot.slane %v1956_v18, 4 }
 0x43e   : > { %v1958_v25 = vadd.f32 %v1957_v50, %v1956_v18 }
 0x440   : > { %v1959_v48 = vrot.slane %v1958_v25, 2 }
 0x442   : > { %v1960_v34 = vadd.f32 %v1959_v48, %v1958_v25 }
 0x444   : > { %v1961_v19 = vrot.slane %v1960_v34, 1 }
 0x446   : > { %v1962_v31 = vadd.f32 %v1961_v19, %v1960_v34 }
 0x448   : > { %v1964_v23 = vmul.f32 0.015625, %v1962_v31 }
 0x44a   : > { %v1966_v42 = vmul.f32 %v1965_v16, %v1964_v23 }
 0x44c   : > { %v1967_v41 = vsel %vm1360_vm4, %v1966_v42, 0.0 }
 0x44d   : > { %1968 = vadd.xlane.f32.xlu0 %v1967_v41 }
 0x4d6   : > { %v1969_v38 = vpop.xlane.xlu0 %1968 }
 0x4d7   : > { %v1971_v6 = vadd.f32 %v1970_v51, %v1969_v38 }
 0x4d9   : > { %v1972_v13 = vmax.f32 %v1971_v6, 0.0 }
 0x4db   : > { %1976 = vperm.xlu1 %3532, %v1972_v13  }
 0x556   : > { %v1977_v55 = vpop.permute.xlu1 %1976 }
 0x557   : > { %v1979_v9 = vmul.f32 %v1977_v55, %v1973_v58 }
 0x559   : > { %v1980_v30 = vsel %vm1360_vm4, %v1979_v9, 0.0 }
 0x55a   : > { %v1981_v35 = vrot.slane %v1980_v30, 4 }
 0x55c   : > { %v1982_v28 = vadd.f32 %v1981_v35, %v1980_v30 }
 0x55e   : > { %v1983_v4 = vrot.slane %v1982_v28, 2 }
 0x560   : > { %v1984_v60 = vadd.f32 %v1983_v4, %v1982_v28 }
 0x562   : > { %v1985_v43 = vrot.slane %v1984_v60, 1 }
 0x564   : > { %v1986_v3 = vadd.f32 %v1985_v43, %v1984_v60 }
 0x566   : > { %v1988_v2 = vadd.f32 %v1987_v5, %v1986_v3 }
 0x568   : > { %v1989_v0 = vadd.f32 3.0, %v1988_v2 }
 0x56a   : > { %v1990_v61 = vmax.f32 %v1989_v0, 0.0 }
 0x56c   : > { %v1991_v12 = vmin.f32 %v1990_v61, 6.0 }
 0x56e   : > { %v1992_v63 = vmul.f32 0.16666667, %v1991_v12 }
 0x570   : > { %v1996_v56 = vrot.slane %v1992_v63, %v4686_v10 }
 0x572   : > { %v1997_v52 = vmul.f32 %v1996_v56, %v4934_v32  ;;  %v1998_v33 = vmul.f32 %v1996_v56, %v4937_v62  ;;  %v1999_v18 = vmul.f32 %v1996_v56, %v4942_v39  ;;  %v2000_v50 = vmul.f32 %v1996_v56, %v4949_v20 }
 0x573   : > { %v2001_v25 = vmul.f32 %v1996_v56, %v4958_v15  ;;  %v2002_v32 = vmul.f32 %v1996_v56, %v4964_v24  ;;  %v2003_v62 = vmul.f32 %v1996_v56, %v4968_v21  ;;  %v2004_v39 = vmul.f32 %v1996_v56, %v4972_v57 }
 0x574   : > { %3253 = vmatprep.mubr.msk.f32.mxu1 %vm1360_vm4, %v1997_v52 }
 0x575   : > { %3254 = vmatmul.mubr.msk.f32.vlgmr.msra.gmra.mxu1 %vm1360_vm4, %v1998_v33 }
 0x576   : > { %3256 = vmatprep.mubr.msk.f32.mxu1 %vm1360_vm4, %v1999_v18 }
 0x579   : > { %3257 = vmatmul.mubr.msk.f32.gmra.mxu1 %vm1360_vm4, %v2000_v50 }
 0x57a   : > { %3259 = vmatprep.mubr.msk.f32.mxu1 %vm1360_vm4, %v2001_v25 }
 0x57d   : > { %3260 = vmatmul.mubr.msk.f32.gmra.mxu1 %vm1360_vm4, %v2002_v32 }
 0x57e   : > { %3262 = vmatprep.mubr.msk.f32.mxu1 %vm1360_vm4, %v2003_v62 }
 0x581   : > { %3263 = vmatmul.mubr.msk.f32.gmra.mxu1 %vm1360_vm4, %v2004_v39 }
 0x635   : > { %v3255_v48 = vpop.f32.mrf.mxu1 }
 0x636   : > { %v2143_v51 = vsel %vm1360_vm4, %v3255_v48, 0.0 }
 0x637   : > { %v5016_v20 = vpop.f32.mrf.mxu1 }
 0x638   : > { %v2140_v38 = vsel %vm1360_vm4, %v5016_v20, 0.0 }
 0x639   : > { %v3258_v15 = vpop.f32.mrf.mxu1 }
 0x63a   : > { %v2149_v34 = vsel %vm1360_vm4, %v3258_v15, 0.0 }
 0x63b   : > { %2150 = vadd.xlane.f32.xlu1 %v2149_v34  ;;  %v2109_v19 = vpop.f32.mrf.mxu1 }
 0x63c   : > { %v2146_v11 = vsel %vm1360_vm4, %v2109_v19, 0.0 }
 0x63d   : > { %v3261_v31 = vpop.f32.mrf.mxu1 }
 0x63e   : > { %v2155_v24 = vsel %vm1360_vm4, %v3261_v31, 0.0 }
 0x63f   : > { %2156 = vadd.xlane.f32.xlu0 %v2155_v24  ;;  %v2119_v21 = vpop.f32.mrf.mxu1 }
 0x640   : > { %v2152_v16 = vsel %vm1360_vm4, %v2119_v21, 0.0 }
 0x641   : > { %v3264_v23 = vpop.f32.mrf.mxu1 }
 0x642   : > { %v2161_v57 = vsel %vm1360_vm4, %v3264_v23, 0.0 }
 0x643   : > { %2153 = vadd.xlane.f32.xlu0 %v2152_v16  ;;  %v2129_v42 = vpop.f32.mrf.mxu1 }
 0x644   : > { %v2158_v41 = vsel %vm1360_vm4, %v2129_v42, 0.0 }
 0x647   : > { %2162 = vadd.xlane.f32.xlu0 %v2161_v57  ;;  %v2280_v57 = vld [vmem:[%s5268_s25] sm:$0xff] }
 0x648   : > { %3281 = vmatprep.mubr.msk.f32.mxu0 %vm2298_vm11, %v2280_v57 }
 0x64b   : > { %2159 = vadd.xlane.f32.xlu0 %v2158_v41 }
 0x64f   : > { %2147 = vadd.xlane.f32.xlu0 %v2146_v11 }
 0x653   : > { %2144 = vadd.xlane.f32.xlu0 %v2143_v51 }
 0x657   : > { %2141 = vadd.xlane.f32.xlu0 %v2140_v38 }
 0x6c4   : > { %v2151_v9 = vpop.xlane.xlu1 %2150 }
 0x6c5   : > { %v2167_v4 = vmul.f32 0.03125, %v2151_v9 }
 0x6c7   : > { %v5041_v0 = vsub.f32 %v3258_v15, %v2167_v4 }
 0x6c8   : > { %v2157_v6 = vpop.xlane.xlu0 %2156 }
 0x6c9   : > { %v2169_v13 = vmul.f32 0.03125, %v2157_v6  ;;  %v2183_v50 = vmul.f32 %v5041_v0, %v5041_v0 }
 0x6cb   : > { %v5027_v14 = vsub.f32 %v3261_v31, %v2169_v13  ;;  %v2197_v39 = vsel %vm1360_vm4, %v2183_v50, 0.0 }
 0x6cc   : > { %v2154_v17 = vpop.xlane.xlu0 %2153 }
 0x6cd   : > { %v2168_v46 = vmul.f32 0.03125, %v2154_v17  ;;  %v2185_v1 = vmul.f32 %v5027_v14, %v5027_v14 }
 0x6cf   : > { %v5031_v58 = vsub.f32 %v2119_v21, %v2168_v46  ;;  %v2203_v55 = vsel %vm1360_vm4, %v2185_v1, 0.0 }
 0x6d0   : > { %v2163_v30 = vpop.xlane.xlu0 %2162  ;;  %2204 = vadd.xlane.f32.xlu0 %v2203_v55 }
 0x6d1   : > { %v2171_v35 = vmul.f32 0.03125, %v2163_v30  ;;  %v2184_v28 = vmul.f32 %v5031_v58, %v5031_v58 }
 0x6d3   : > { %v5036_v60 = vsub.f32 %v3264_v23, %v2171_v35  ;;  %v2200_v43 = vsel %vm1360_vm4, %v2184_v28, 0.0 }
 0x6d4   : > { %2201 = vadd.xlane.f32.xlu0 %v2200_v43  ;;  %v2160_v5 = vpop.xlane.xlu0 %2159 }
 0x6d5   : > { %v2170_v3 = vmul.f32 0.03125, %v2160_v5  ;;  %v2187_v2 = vmul.f32 %v5036_v60, %v5036_v60 }
 0x6d7   : > { %v5043_v61 = vsub.f32 %v2129_v42, %v2170_v3  ;;  %v2209_v12 = vsel %vm1360_vm4, %v2187_v2, 0.0 }
 0x6d8   : > { %2210 = vadd.xlane.f32.xlu0 %v2209_v12  ;;  %v2148_v63 = vpop.xlane.xlu0 %2147 }
 0x6d9   : > { %v2166_v56 = vmul.f32 0.03125, %v2148_v63  ;;  %v2186_v52 = vmul.f32 %v5043_v61, %v5043_v61 }
 0x6db   : > { %v5048_v33 = vsub.f32 %v2109_v19, %v2166_v56  ;;  %v2206_v18 = vsel %vm1360_vm4, %v2186_v52, 0.0 }
 0x6dc   : > { %2207 = vadd.xlane.f32.xlu0 %v2206_v18  ;;  %v2145_v25 = vpop.xlane.xlu0 %2144 }
 0x6dd   : > { %v2165_v32 = vmul.f32 0.03125, %v2145_v25  ;;  %v2182_v15 = vmul.f32 %v5048_v33, %v5048_v33 }
 0x6df   : > { %v5053_v62 = vsub.f32 %v3255_v48, %v2165_v32  ;;  %v2194_v21 = vsel %vm1360_vm4, %v2182_v15, 0.0  ;;  %v3097_v15 = vld [vmem:[%s5256_s13] ss:$0 sm:$0xff] }
 0x6e0   : > { %2198 = vadd.xlane.f32.xlu0 %v2197_v39  ;;  %v2142_v34 = vpop.xlane.xlu0 %2141 }
 0x6e1   : > { %v2164_v31 = vmul.f32 0.03125, %v2142_v34  ;;  %v2181_v19 = vmul.f32 %v5053_v62, %v5053_v62 }
 0x6e3   : > { %v5061_v24 = vsub.f32 %v5016_v20, %v2164_v31  ;;  %v2191_v16 = vsel %vm1360_vm4, %v2181_v19, 0.0  ;;  %v2294_v20 = vld [vmem:[%s5268_s25 + $0x70] sm:$0xff] }
 0x6e4   : > { %2195 = vadd.xlane.f32.xlu0 %v2194_v21  ;;  %2192 = vadd.xlane.f32.xlu1 %v2191_v16  ;;  %v3098_v21 = vld [vmem:[#allocation12] ss:$0 sm:$0xff] }
 0x6e5   : > { %v2180_v48 = vmul.f32 %v5061_v24, %v5061_v24  ;;  %3302 = vmatprep.mubr.msk.f32.mxu1 %vm2298_vm11, %v2294_v20 }
 0x6e7   : > { %v2188_v23 = vsel %vm1360_vm4, %v2180_v48, 0.0 }
 0x6e8   : > { %2189 = vadd.xlane.f32.xlu0 %v2188_v23 }
 0x759   : > { %v2205_v42 = vpop.xlane.xlu0 %2204 }
 0x75a   : > { %v2217_v41 = vmul.f32 0.03125, %v2205_v42 }
 0x75c   : > { %v2225_v38 = vadd.f32 1e-05, %v2217_v41 }
 0x75d   : > { %v2202_v11 = vpop.xlane.xlu0 %2201 }
 0x75e   : > { %v2216_v51 = vmul.f32 0.03125, %v2202_v11  ;;  %3582 = vrsqrt.f32 %v2225_v38 }
 0x760   : > { %v2224_v6 = vadd.f32 1e-05, %v2216_v51 }
 0x761   : > { %v2211_v13 = vpop.xlane.xlu0 %2210 }
 0x762   : > { %v2219_v17 = vmul.f32 0.03125, %v2211_v13  ;;  %3584 = vrsqrt.f32 %v2224_v6 }
 0x764   : > { %v2227_v46 = vadd.f32 1e-05, %v2219_v17 }
 0x765   : > { %v2208_v1 = vpop.xlane.xlu0 %2207 }
 0x766   : > { %3586 = vrsqrt.f32 %v2227_v46  ;;  %v2218_v55 = vmul.f32 0.03125, %v2208_v1 }
 0x768   : > { %v2226_v9 = vadd.f32 1e-05, %v2218_v55 }
 0x769   : > { %v2199_v30 = vpop.xlane.xlu0 %2198 }
 0x76a   : > { %3588 = vrsqrt.f32 %v2226_v9  ;;  %v2215_v35 = vmul.f32 0.03125, %v2199_v30 }
 0x76b   : > { %v3583_v63 = vpop.eup %3582 }
 0x76c   : > { %v2223_v28 = vadd.f32 1e-05, %v2215_v35  ;;  %v2241_v39 = vmul.f32 %v3583_v63, %v5027_v14  ;;  %v2288_v63 = vld [vmem:[%s5268_s25 + $0x40] sm:$0xff] }
 0x76d   : > { %v2193_v4 = vpop.xlane.xlu1 %2192  ;;  %v2196_v43 = vpop.xlane.xlu0 %2195 }
 0x76e   : > { %3590 = vrsqrt.f32 %v2223_v28  ;;  %v2213_v5 = vmul.f32 0.03125, %v2193_v4  ;;  %v2214_v3 = vmul.f32 0.03125, %v2196_v43  ;;  %v2255_v23 = vmul.f32 %v3097_v15, %v2241_v39  ;;  %v2283_v4 = vld [vmem:[%s5268_s25 + $0x18] sm:$0xff]  ;;  %v2297_v43 = vld [vmem:[%s5268_s25 + $0x88] sm:$0xff] }
 0x76f   : > { %v3585_v52 = vpop.eup %3584 }
 0x770   : > { %v2221_v2 = vadd.f32 1e-05, %v2213_v5  ;;  %v2222_v12 = vadd.f32 1e-05, %v2214_v3  ;;  %v2240_v31 = vmul.f32 %v3585_v52, %v5031_v58  ;;  %v2269_v41 = vadd.f32 %v3098_v21, %v2255_v23  ;;  %v2284_v5 = vld [vmem:[%s5268_s25 + $0x20] sm:$0xff]  ;;  %v2285_v3 = vld [vmem:[%s5268_s25 + $0x28] sm:$0xff] }
 0x771   : > { %v2190_v56 = vpop.xlane.xlu0 %2189  ;;  %v2290_v52 = vld [vmem:[%s5268_s25 + $0x50] sm:$0xff] }
 0x772   : > { %3592 = vrsqrt.f32 %v2221_v2  ;;  %v2212_v18 = vmul.f32 0.03125, %v2190_v56  ;;  %v2286_v2 = vld [vmem:[%s5268_s25 + $0x30] sm:$0xff]  ;;  %v2289_v56 = vld [vmem:[%s5268_s25 + $0x48] sm:$0xff] }
 0x773   : > { %v3587_v50 = vpop.eup %3586  ;;  %3594 = vrsqrt.f32 %v2222_v12  ;;  %v2287_v12 = vld [vmem:[%s5268_s25 + $0x38] sm:$0xff] }
 0x774   : > { %v2220_v25 = vadd.f32 1e-05, %v2212_v18  ;;  %v2243_v32 = vmul.f32 %v3587_v50, %v5036_v60  ;;  %v2254_v60 = vmul.f32 %v3097_v15, %v2240_v31  ;;  %v2291_v18 = vld [vmem:[%s5268_s25 + $0x58] sm:$0xff]  ;;  %v2292_v50 = vld [vmem:[%s5268_s25 + $0x60] sm:$0xff] }
 0x775   : > { %v2508_v31 = vld [vmem:[#allocation14] sm:$0xff] }
 0x776   : > { %3596 = vrsqrt.f32 %v2220_v25  ;;  %v2257_v34 = vmul.f32 %v3097_v15, %v2243_v32  ;;  %v2268_v51 = vadd.f32 %v3098_v21, %v2254_v60  ;;  %v2293_v25 = vld [vmem:[%s5268_s25 + $0x68] sm:$0xff]  ;;  %v2527_v23 = vrot.slane %v2508_v31, %v1580_v26 }
 0x777   : > { %v3589_v19 = vpop.eup %3588  ;;  %v2535_v60 = vrot.slane %v2508_v31, %v1608_v44 }
 0x778   : > { %v2271_v16 = vadd.f32 %v3098_v21, %v2257_v34  ;;  %v2242_v48 = vmul.f32 %v3589_v19, %v5043_v61 }
 0x77a   : > { %v2279_v57 = vadd.f32 %v2271_v16, %v4782_v29  ;;  %v2256_v20 = vmul.f32 %v3097_v15, %v2242_v48  ;;  %v2277_v29 = vadd.f32 %v2269_v41, %v4748_v27  ;;  %v2513_v48 = vrot.slane %v2508_v31, %v4686_v10 }
 0x77b   : > { %v3591_v42 = vpop.eup %3590 }
 0x77c   : > { %3265 = vmatprep.subr.mxu0 %v2279_v57  ;;  %3319 = vmatprep.subr.mxu1 %v2279_v57  ;;  %v2270_v14 = vadd.f32 %v3098_v21, %v2256_v20  ;;  %v2239_v11 = vmul.f32 %v3591_v42, %v5041_v0  ;;  %v2276_v0 = vadd.f32 %v2268_v51, %v4769_v8 }
 0x77d   : > { %3266 = vmatpush3.msra.mxu0 %v2279_v57  ;;  %3327 = vmatpush3.msra.mxu1 %v2279_v57 }
 0x77e   : > { %v2278_v58 = vadd.f32 %v2270_v14, %v4791_v7  ;;  %v2253_v38 = vmul.f32 %v3097_v15, %v2239_v11 }
 0x77f   : > { %v3593_v6 = vpop.eup %3592 }
 0x780   : > { %v3595_v61 = vpop.eup %3594  ;;  %3267 = vmatprep.subr.mxu0 %v2278_v58  ;;  %3320 = vmatprep.subr.mxu1 %v2278_v58  ;;  %v2267_v13 = vadd.f32 %v3098_v21, %v2253_v38  ;;  %v2237_v17 = vmul.f32 %v3593_v6, %v5053_v62 }
 0x781   : > { %3268 = vmatpush3.msra.mxu0 %v2278_v58  ;;  %3328 = vmatpush3.msra.mxu1 %v2278_v58  ;;  %v2238_v46 = vmul.f32 %v3595_v61, %v5048_v33  ;;  %v2543_v58 = vrot.slane %v2508_v31, %v1636_v53 }
 0x782   : > { %3269 = vmatprep.subr.mxu0 %v2277_v29  ;;  %3321 = vmatprep.subr.mxu1 %v2277_v29  ;;  %v2251_v7 = vmul.f32 %v3097_v15, %v2237_v17  ;;  %v2275_v27 = vadd.f32 %v2267_v13, %v4719_v40 }
 0x783   : > { %v3597_v1 = vpop.eup %3596  ;;  %3270 = vmatpush3.msra.mxu0 %v2277_v29  ;;  %3329 = vmatpush3.msra.mxu1 %v2277_v29  ;;  %v2252_v55 = vmul.f32 %v3097_v15, %v2238_v46 }
 0x784   : > { %3271 = vmatprep.subr.mxu0 %v2276_v0  ;;  %3322 = vmatprep.subr.mxu1 %v2276_v0  ;;  %v2236_v9 = vmul.f32 %v3597_v1, %v5061_v24  ;;  %v2265_v30 = vadd.f32 %v3098_v21, %v2251_v7  ;;  %v2281_v24 = vld [vmem:[%s5268_s25 + $0x8] sm:$0xff]  ;;  %v2559_v1 = vrot.slane %v2508_v31, %v1693_v45 }
 0x785   : > { %3272 = vmatpush3.msra.mxu0 %v2276_v0  ;;  %3330 = vmatpush3.msra.mxu1 %v2276_v0  ;;  %v2266_v62 = vadd.f32 %v3098_v21, %v2252_v55 }
 0x786   : > { %3273 = vmatprep.subr.mxu0 %v2275_v27  ;;  %3323 = vmatprep.subr.mxu1 %v2275_v27  ;;  %v2250_v33 = vmul.f32 %v3097_v15, %v2236_v9  ;;  %v2273_v28 = vadd.f32 %v2265_v30, %v4703_v37  ;;  %v2282_v37 = vld [vmem:[%s5268_s25 + $0x10] sm:$0xff]  ;;  %v2567_v30 = vrot.slane %v2508_v31, %v1721_v49 }
 0x787   : > { %3274 = vmatpush3.msra.mxu0 %v2275_v27  ;;  %3331 = vmatpush3.msra.mxu1 %v2275_v27  ;;  %v2274_v8 = vadd.f32 %v2266_v62, %v4726_v47  ;;  %v2295_v47 = vld [vmem:[%s5268_s25 + $0x78] sm:$0xff] }
 0x788   : > { %v2264_v35 = vadd.f32 %v3098_v21, %v2250_v33  ;;  %v2519_v21 = vrot.slane %v2508_v31, %v1552_v22  ;;  %v2551_v22 = vrot.slane %v2508_v31, %v1664_v54 }
 0x789   : > { %3275 = vmatprep.subr.mxu0 %v2274_v8  ;;  %3324 = vmatprep.subr.mxu1 %v2274_v8 }
 0x78a   : > { %3276 = vmatpush3.msra.mxu0 %v2274_v8  ;;  %3332 = vmatpush3.msra.mxu1 %v2274_v8  ;;  %v2272_v40 = vadd.f32 %v2264_v35, %v4708_v36  ;;  %v2296_v36 = vld [vmem:[%s5268_s25 + $0x80] sm:$0xff] }
 0x78b   : > { %3277 = vmatprep.subr.mxu0 %v2273_v28  ;;  %3325 = vmatprep.subr.mxu1 %v2273_v28 }
 0x78c   : > { %3278 = vmatpush3.msra.mxu0 %v2273_v28  ;;  %3333 = vmatpush3.msra.mxu1 %v2273_v28 }
 0x78d   : > { %3279 = vmatprep.subr.mxu0 %v2272_v40  ;;  %3326 = vmatprep.subr.mxu1 %v2272_v40 }
 0x78e   : > { %3280 = vmatpush3.msra.mxu0 %v2272_v40  ;;  %3334 = vmatpush3.msra.mxu1 %v2272_v40 }
 0x78f   : > { %3282 = vmatmul.mubr.msk.f32.vlgmr.msra.gmra.mxu0 %vm2298_vm11, %v2281_v24  ;;  %3303 = vmatmul.mubr.msk.f32.vlgmr.msra.gmra.mxu1 %vm2298_vm11, %v2295_v47  ;;  %v3117_v24 = vld [vmem:[#allocation14 + $0x8] ss:$0 sm:$0xff] }
 0x790   : > { %3284 = vmatprep.mubr.msk.f32.mxu0 %vm2298_vm11, %v2282_v37  ;;  %3305 = vmatprep.mubr.msk.f32.mxu1 %vm2298_vm11, %v2296_v36 }
 0x793   : > { %3285 = vmatmul.mubr.msk.f32.gmra.mxu0 %vm2298_vm11, %v2283_v4  ;;  %3306 = vmatmul.mubr.msk.f32.gmra.mxu1 %vm2298_vm11, %v2297_v43 }
 0x794   : > { %3287 = vmatprep.mubr.msk.f32.mxu0 %vm2298_vm11, %v2284_v5 }
 0x797   : > { %3288 = vmatmul.mubr.msk.f32.gmra.mxu0 %vm2298_vm11, %v2285_v3 }
 0x798   : > { %3290 = vmatprep.mubr.msk.f32.mxu0 %vm2298_vm11, %v2286_v2 }
 0x79b   : > { %3291 = vmatmul.mubr.msk.f32.gmra.mxu0 %vm2298_vm11, %v2287_v12 }
 0x79c   : > { %3293 = vmatprep.mubr.msk.f32.mxu0 %vm2298_vm11, %v2288_v63 }
 0x79f   : > { %3294 = vmatmul.mubr.msk.f32.gmra.mxu0 %vm2298_vm11, %v2289_v56 }
 0x7a0   : > { %3296 = vmatprep.mubr.msk.f32.mxu0 %vm2298_vm11, %v2290_v52 }
 0x7a3   : > { %3297 = vmatmul.mubr.msk.f32.gmra.mxu0 %vm2298_vm11, %v2291_v18 }
 0x7a4   : > { %3299 = vmatprep.mubr.msk.f32.mxu0 %vm2298_vm11, %v2292_v50 }
 0x7a7   : > { %3300 = vmatmul.mubr.msk.f32.gmra.mxu0 %vm2298_vm11, %v2293_v25 }
 0x84f   : > { %v3283_v32 = vpop.f32.mrf.mxu0  ;;  %v3304_v38 = vpop.f32.mrf.mxu1 }
 0x850   : > { %v2515_v14 = vmul.f32 %v3283_v32, %v2513_v48  ;;  %v2569_v4 = vmul.f32 %v3304_v38, %v2567_v30 }
 0x851   : > { %v2419_v39 = vpop.f32.mrf.mxu0  ;;  %v2489_v55 = vpop.f32.mrf.mxu1 }
 0x852   : > { %v2514_v6 = vmul.f32 %v2513_v48, %v2419_v39  ;;  %v2568_v63 = vmul.f32 %v2567_v30, %v2489_v55 }
 0x853   : > { %v3286_v15 = vpop.f32.mrf.mxu0  ;;  %v3307_v40 = vpop.f32.mrf.mxu1 }
 0x854   : > { %v2521_v20 = vmul.f32 %v3286_v15, %v2519_v21  ;;  %v2577_v2 = vmul.f32 %v3307_v40, %v3117_v24 }
 0x855   : > { %v2429_v34 = vpop.f32.mrf.mxu0  ;;  %v2499_v12 = vpop.f32.mrf.mxu1 }
 0x856   : > { %v2520_v41 = vmul.f32 %v2519_v21, %v2429_v34  ;;  %v2523_v61 = vadd.f32 %v2521_v20, %v2515_v14  ;;  %v2576_v49 = vmul.f32 %v3117_v24, %v2499_v12  ;;  %v2682_v12 = vld [vmem:[#allocation23 + $0x18] sm:$0xff] }
 0x857   : > { %v3289_v19 = vpop.f32.mrf.mxu0  ;;  %3308 = vmatprep.subr.mxu1 %v2682_v12 }
 0x858   : > { %v2529_v11 = vmul.f32 %v3289_v19, %v2527_v23  ;;  %v2522_v17 = vadd.f32 %v2520_v41, %v2514_v6  ;;  %v3119_v6 = vld [vmem:[#allocation17] ss:$0 sm:$0xff]  ;;  %3309 = vmatpush3.msra.mxu1 %v2682_v12 }
 0x859   : > { %v2439_v16 = vpop.f32.mrf.mxu0 }
 0x85a   : > { %v2528_v26 = vmul.f32 %v2527_v23, %v2439_v16  ;;  %v2531_v46 = vadd.f32 %v2529_v11, %v2523_v61 }
 0x85b   : > { %v3292_v57 = vpop.f32.mrf.mxu0 }
 0x85c   : > { %v2537_v29 = vmul.f32 %v3292_v57, %v2535_v60  ;;  %v2530_v53 = vadd.f32 %v2528_v26, %v2522_v17 }
 0x85d   : > { %v2449_v42 = vpop.f32.mrf.mxu0 }
 0x85e   : > { %v2536_v44 = vmul.f32 %v2535_v60, %v2449_v42  ;;  %v2539_v27 = vadd.f32 %v2537_v29, %v2531_v46 }
 0x85f   : > { %v3295_v51 = vpop.f32.mrf.mxu0 }
 0x860   : > { %v2545_v0 = vmul.f32 %v3295_v51, %v2543_v58  ;;  %v2538_v33 = vadd.f32 %v2536_v44, %v2530_v53  ;;  %v3118_v51 = vld [vmem:[#allocation15] ss:$0 sm:$0xff] }
 0x861   : > { %v2459_v13 = vpop.f32.mrf.mxu0 }
 0x862   : > { %v2544_v9 = vmul.f32 %v2543_v58, %v2459_v13  ;;  %v2547_v8 = vadd.f32 %v2545_v0, %v2539_v27 }
 0x863   : > { %v3298_v7 = vpop.f32.mrf.mxu0 }
 0x864   : > { %v2553_v62 = vmul.f32 %v3298_v7, %v2551_v22  ;;  %v2546_v47 = vadd.f32 %v2544_v9, %v2538_v33 }
 0x865   : > { %v2469_v54 = vpop.f32.mrf.mxu0 }
 0x866   : > { %v2552_v35 = vmul.f32 %v2551_v22, %v2469_v54  ;;  %v2555_v37 = vadd.f32 %v2553_v62, %v2547_v8 }
 0x867   : > { %v3301_v28 = vpop.f32.mrf.mxu0 }
 0x868   : > { %v2561_v36 = vmul.f32 %v3301_v28, %v2559_v1  ;;  %v2554_v43 = vadd.f32 %v2552_v35, %v2546_v47 }
 0x869   : > { %v2479_v45 = vpop.f32.mrf.mxu0 }
 0x86a   : > { %v2563_v5 = vadd.f32 %v2561_v36, %v2555_v37  ;;  %v2560_v3 = vmul.f32 %v2559_v1, %v2479_v45  ;;  %v2645_v37 = vld [vmem:[#allocation18] sm:$0xff] }
 0x86c   : > { %v2562_v56 = vadd.f32 %v2560_v3, %v2554_v43  ;;  %v2571_v59 = vadd.f32 %v2569_v4, %v2563_v5  ;;  %v2650_v43 = vld [vmem:[%s5262_s19] sm:$0xff] }
 0x86e   : > { %v2579_v52 = vadd.f32 %v2577_v2, %v2571_v59  ;;  %v2570_v18 = vadd.f32 %v2568_v63, %v2562_v56  ;;  %v2681_v63 = vld [vmem:[#allocation23 + $0x10] sm:$0xff]  ;;  %v2680_v56 = vld [vmem:[#allocation23 + $0x8] sm:$0xff]  ;;  %v2679_v59 = vld [vmem:[#allocation23] sm:$0xff] }
 0x86f   : > { %3310 = vmatprep.subr.mxu1 %v2681_v63 }
 0x870   : > { %v2585_v50 = vsel %vm1360_vm4, %v2579_v52, 0.0  ;;  %v2578_v25 = vadd.f32 %v2576_v49, %v2570_v18  ;;  %3311 = vmatpush3.msra.mxu1 %v2681_v63  ;;  %v2653_v49 = vld [vmem:[#allocation20] sm:$0xff] }
 0x871   : > { %2586 = vadd.xlane.f32.xlu0 %v2585_v50  ;;  %3312 = vmatprep.subr.mxu1 %v2680_v56 }
 0x872   : > { %v2582_v32 = vsel %vm1360_vm4, %v2578_v25, 0.0  ;;  %3313 = vmatpush3.msra.mxu1 %v2680_v56 }
 0x873   : > { %2583 = vadd.xlane.f32.xlu1 %v2582_v32  ;;  %3314 = vmatprep.subr.mxu1 %v2679_v59 }
 0x874   : > { %3315 = vmatpush3.msra.mxu1 %v2679_v59 }
 0x8fa   : > { %v2587_v39 = vpop.xlane.xlu0 %2586 }
 0x8fb   : > { %v2589_v15 = vmul.f32 0.03125, %v2587_v39 }
 0x8fc   : > { %v2584_v34 = vpop.xlane.xlu1 %2583 }
 0x8fd   : > { %v2591_v31 = vsub.f32 %v2579_v52, %v2589_v15  ;;  %v2588_v19 = vmul.f32 0.03125, %v2584_v34 }
 0x8ff   : > { %v2590_v21 = vsub.f32 %v2578_v25, %v2588_v19  ;;  %v2593_v16 = vmul.f32 %v2591_v31, %v2591_v31 }
 0x901   : > { %v2597_v48 = vsel %vm1360_vm4, %v2593_v16, 0.0  ;;  %v2592_v23 = vmul.f32 %v2590_v21, %v2590_v21 }
 0x902   : > { %2598 = vadd.xlane.f32.xlu0 %v2597_v48 }
 0x903   : > { %v2594_v57 = vsel %vm1360_vm4, %v2592_v23, 0.0 }
 0x904   : > { %2595 = vadd.xlane.f32.xlu1 %v2594_v57 }
 0x98b   : > { %v2599_v20 = vpop.xlane.xlu0 %2598 }
 0x98c   : > { %v2601_v60 = vmul.f32 0.03125, %v2599_v20 }
 0x98d   : > { %v2596_v42 = vpop.xlane.xlu1 %2595 }
 0x98e   : > { %v2603_v14 = vadd.f32 1e-05, %v2601_v60  ;;  %v2600_v41 = vmul.f32 0.03125, %v2596_v42 }
 0x990   : > { %3598 = vrsqrt.f32 %v2603_v14  ;;  %v2602_v11 = vadd.f32 1e-05, %v2600_v41 }
 0x992   : > { %3600 = vrsqrt.f32 %v2602_v11 }
 0x99d   : > { %v3599_v58 = vpop.eup %3598 }
 0x99e   : > { %v2607_v22 = vmul.f32 %v3599_v58, %v2591_v31  ;;  %v2667_v31 = vld [vmem:[#allocation21] sm:$0x1] }
 0x99f   : > { %v3601_v38 = vpop.eup %3600 }
 0x9a0   : > { %v2615_v61 = vmul.f32 %v3118_v51, %v2607_v22  ;;  %v2606_v26 = vmul.f32 %v3601_v38, %v2590_v21 }
 0x9a2   : > { %v2614_v29 = vmul.f32 %v3118_v51, %v2606_v26  ;;  %v2623_v13 = vadd.f32 %v3119_v6, %v2615_v61 }
 0x9a4   : > { %v2622_v17 = vadd.f32 %v3119_v6, %v2614_v29  ;;  %v2625_v46 = vadd.f32 3.0, %v2623_v13 }
 0x9a6   : > { %v2624_v44 = vadd.f32 3.0, %v2622_v17  ;;  %v2627_v0 = vmax.f32 %v2625_v46, 0.0 }
 0x9a8   : > { %v2626_v7 = vmax.f32 %v2624_v44, 0.0  ;;  %v2629_v1 = vmin.f32 %v2627_v0, 6.0 }
 0x9aa   : > { %v2628_v55 = vmin.f32 %v2626_v7, 6.0  ;;  %v2631_v53 = vmul.f32 %v2629_v1, %v2623_v13 }
 0x9ac   : > { %v2630_v27 = vmul.f32 %v2628_v55, %v2622_v17  ;;  %v2633_v9 = vmul.f32 0.16666667, %v2631_v53 }
 0x9ae   : > { %v2632_v62 = vmul.f32 0.16666667, %v2630_v27  ;;  %v2635_v30 = vsel %vm1360_vm4, %v2633_v9, 0.0  ;;  %v3122_v27 = vld [vmem:[#allocation24] ss:$0 sm:$0xff] }
 0x9b0   : > { %v2634_v54 = vsel %vm1360_vm4, %v2632_v62, 0.0 }
 0x9b1   : > { %v2636_v33 = vadd.f32 %v2635_v30, %v2634_v54 }
 0x9b3   : > { %v2637_v8 = vrot.slane %v2636_v33, 4 }
 0x9b5   : > { %v2638_v35 = vadd.f32 %v2637_v8, %v2636_v33 }
 0x9b7   : > { %v2639_v28 = vrot.slane %v2638_v35, 2 }
 0x9b9   : > { %v2640_v40 = vadd.f32 %v2639_v28, %v2638_v35 }
 0x9bb   : > { %v2641_v24 = vrot.slane %v2640_v40, 1 }
 0x9bd   : > { %v2642_v47 = vadd.f32 %v2641_v24, %v2640_v40 }
 0x9bf   : > { %v2644_v36 = vmul.f32 0.0625, %v2642_v47 }
 0x9c1   : > { %v2646_v4 = vmul.f32 %v2645_v37, %v2644_v36 }
 0x9c3   : > { %v2647_v45 = vsel %vm1360_vm4, %v2646_v4, 0.0 }
 0x9c4   : > { %2648 = vadd.xlane.f32.xlu1 %v2647_v45 }
 0xa4d   : > { %v2649_v5 = vpop.xlane.xlu1 %2648 }
 0xa4e   : > { %v2651_v3 = vadd.f32 %v2650_v43, %v2649_v5 }
 0xa50   : > { %v2652_v2 = vmax.f32 %v2651_v3, 0.0 }
 0xa52   : > { %2656 = vperm.xlu0 %3533, %v2652_v2  }
 0xacd   : > { %v2657_v52 = vpop.permute.xlu0 %2656 }
 0xace   : > { %v2659_v18 = vmul.f32 %v2657_v52, %v2653_v49 }
 0xad0   : > { %v2660_v50 = vsel %vm1360_vm4, %v2659_v18, 0.0 }
 0xad1   : > { %v2661_v25 = vrot.slane %v2660_v50, 4 }
 0xad3   : > { %v2662_v32 = vadd.f32 %v2661_v25, %v2660_v50 }
 0xad5   : > { %v2663_v39 = vrot.slane %v2662_v32, 2 }
 0xad7   : > { %v2664_v15 = vadd.f32 %v2663_v39, %v2662_v32 }
 0xad9   : > { %v2665_v34 = vrot.slane %v2664_v15, 1 }
 0xadb   : > { %v2666_v19 = vadd.f32 %v2665_v34, %v2664_v15 }
 0xadd   : > { %v2668_v21 = vadd.f32 %v2667_v31, %v2666_v19 }
 0xadf   : > { %v2669_v16 = vadd.f32 3.0, %v2668_v21 }
 0xae1   : > { %v2670_v48 = vmax.f32 %v2669_v16, 0.0 }
 0xae3   : > { %v2671_v23 = vmin.f32 %v2670_v48, 6.0 }
 0xae5   : > { %v2672_v57 = vmul.f32 0.16666667, %v2671_v23 }
 0xae7   : > { %v2676_v20 = vrot.slane %v2672_v57, %v4686_v10 }
 0xae9   : > { %v2677_v60 = vmul.f32 %v2676_v20, %v2632_v62  ;;  %v2678_v42 = vmul.f32 %v2676_v20, %v2633_v9  ;;  %v3123_v62 = vld [vmem:[#allocation26] ss:$0 sm:$0xff] }
 0xaeb   : > { %3316 = vmatprep.mubr.msk.f32.mxu1 %vm1360_vm4, %v2677_v60 }
 0xaec   : > { %3317 = vmatmul.mubr.msk.f32.vlgmr.msra.gmra.mxu1 %vm1360_vm4, %v2678_v42 }
 0xbac   : > { %v3318_v14 = vpop.f32.mrf.mxu1 }
 0xbad   : > { %v2769_v58 = vsel %vm1360_vm4, %v3318_v14, 0.0 }
 0xbae   : > { %v2755_v41 = vpop.f32.mrf.mxu1 }
 0xbaf   : > { %v2766_v11 = vsel %vm1360_vm4, %v2755_v41, 0.0 }
 0xbb0   : > { %2767 = vadd.xlane.f32.xlu1 %v2766_v11 }
 0xbb4   : > { %2770 = vadd.xlane.f32.xlu1 %v2769_v58 }
 0xc39   : > { %v2768_v51 = vpop.xlane.xlu1 %2767 }
 0xc3a   : > { %v2772_v22 = vmul.f32 0.03125, %v2768_v51 }
 0xc3c   : > { %v2774_v38 = vsub.f32 %v2755_v41, %v2772_v22 }
 0xc3d   : > { %v2771_v6 = vpop.xlane.xlu1 %2770 }
 0xc3e   : > { %v2773_v61 = vmul.f32 0.03125, %v2771_v6  ;;  %v2776_v10 = vmul.f32 %v2774_v38, %v2774_v38 }
 0xc40   : > { %v2775_v26 = vsub.f32 %v3318_v14, %v2773_v61  ;;  %v2778_v29 = vsel %vm1360_vm4, %v2776_v10, 0.0 }
 0xc41   : > { %2779 = vadd.xlane.f32.xlu1 %v2778_v29 }
 0xc42   : > { %v2777_v13 = vmul.f32 %v2775_v26, %v2775_v26 }
 0xc44   : > { %v2781_v17 = vsel %vm1360_vm4, %v2777_v13, 0.0 }
 0xc45   : > { %2782 = vadd.xlane.f32.xlu1 %v2781_v17 }
 0xcca   : > { %v2780_v46 = vpop.xlane.xlu1 %2779 }
 0xccb   : > { %v2784_v44 = vmul.f32 0.03125, %v2780_v46 }
 0xccd   : > { %v2786_v0 = vadd.f32 1e-05, %v2784_v44 }
 0xcce   : > { %v2783_v7 = vpop.xlane.xlu1 %2782 }
 0xccf   : > { %3602 = vrsqrt.f32 %v2786_v0  ;;  %v2785_v1 = vmul.f32 0.03125, %v2783_v7 }
 0xcd1   : > { %v2787_v55 = vadd.f32 1e-05, %v2785_v1 }
 0xcd3   : > { %3604 = vrsqrt.f32 %v2787_v55 }
 0xcdc   : > { %v3603_v53 = vpop.eup %3602 }
 0xcdd   : > { %v2790_v9 = vmul.f32 %v3603_v53, %v2774_v38 }
 0xcdf   : > { %v2798_v54 = vmul.f32 %v3122_v27, %v2790_v9 }
 0xce0   : > { %v3605_v30 = vpop.eup %3604 }
 0xce1   : > { %v2806_v33 = vadd.f32 %v3123_v62, %v2798_v54  ;;  %v2791_v8 = vmul.f32 %v3605_v30, %v2775_v26 }
 0xce3   : > { %v2799_v35 = vmul.f32 %v3122_v27, %v2791_v8  ;;  %2808 = vst.msk [vmem:[%s976_s28] sm:$0xff] %vm1360_vm4, %v2806_v33 }
 0xce5   : > { %v2807_v28 = vadd.f32 %v3123_v62, %v2799_v35 }
 0xce7   : > { %2809 = vst.msk [vmem:[%s976_s28 + $0x8] sm:$0xff] %vm1360_vm4, %v2807_v28 }
 0xce8   : > { %4009 = shalt.err (!%p4006_p6)
}
 0xce9   : > { %s4010_s26 = scalar_lea.hbm %s5198_s6, 256  ;;  %s4014_s9 = scalar_lea.hbm %s5343_s0, 512 }
 0xcea   : > { %p4011_p10 = scmp.ne.s32.totalorder %s5198_s6, %s4010_s26  ;;  %p4015_p8 = scmp.lt.s32.totalorder %s5198_s6, %s5343_s0 }
 0xceb   : > { %p4016_p13 = scmp.lt.s32.totalorder %s4014_s9, %s4010_s26 }
 0xcec   : > { %p4012_p4 = pnand %p4011_p10, %p5344_p1 }
 0xced   : > { %p4017_p11 = por %p4016_p13, %p4015_p8 }
 0xcee   : > { %p4013_p7 = pneg %p4012_p4 }
 0xcf0   : > { %p4018_p0 = pnand %p4017_p11, %p4013_p7 }
 0xcf2   : > { %4021 = shalt.err (!%p4018_p0)
}
 0xcf3   : > { %s4111_s4 = smov 128   ;;  %s4112_s8 = smov 8  }
 0xcf4   : > { %3395 = dma.vmem_to_hbm [thread:$0]  (%p5344_p1), %s5200_s29, 256, %s5198_s6, %s5203_s2, %s4111_s4, %s4111_s4, %s4112_s8  }
 0xcf5 PF: > { %s5345_s1 = sld [smem:[#allocation39_spill]] }
 0xcf6   : > { %s5346_s28 = sld [smem:[#allocation37_spill]] }
 0xcf7   : > { %s5347_s10 = sld [smem:[#allocation43_spill]] }
 0xcfb   : > { %p3477_p12 = scmp.ge.s32.totalorder %s5345_s1, 2 }
 0xcfc   : > { %s2839_s11 = sand.u32 1, %s5346_s28  }
 0xcfd   : > { %p5348_p2 = scmp.ne.s32.totalorder %s5347_s10, 0  ;;  %s2840_s26 = scalar_lea.sflag [#allocation5], %s2839_s11 }
 0xcff   : > { %p3444_p9 = pnand %p3477_p12, %p5348_p2 }
 0xd01   : > { %p3445_p3 = pneg %p3444_p9 }
 0xd03   : > { %4071 = dma.done.wait (%p3445_p3), %s2840_s26, 256  }
 0xd04   : > { %4073 = vsyncadd (%p3445_p3), %s2840_s26, 4294967040  ;;  %s5349_s28 = sld [smem:[#allocation40_spill]]  ;;  %s5352_s27 = smov %s4080_s3 }
 0xd05   : > { %s5350_s9 = sld [smem:[#allocation38_spill]] }
 0xd06   : > { %s5351_s7 = sld [smem:[#allocation41_spill]] }
 0xd0a   : > { %p44_p5 = scmp.ge.s32.totalorder %s5349_s28, 4  }
 0xd0b   : > { %s5353_s3 = smov %s5350_s9 }
 0xd0c   :  { %46 = sbr.rel (!%p44_p5) target bundleno = 25 (0x19), region = 222 }
 0xd11   :  { %2845 = vsyncpa [#allocation4], 1 }
 0xd12   :  { %2847 = vsyncpa [#allocation4 + $0x1], 1 }
 0xd13   :  { %2848 = vsyncpa [#allocation7], 1 }
 0xd14   :  { %2849 = vsyncpa [#allocation10], 1 }
 0xd15   :  { %2850 = vsyncpa [#allocation13], 1 }
 0xd16   :  { %2851 = vsyncpa [#allocation16], 1 }
 0xd17   :  { %2852 = vsyncpa [#allocation19], 1 }
 0xd18   :  { %2853 = vsyncpa [#allocation22], 1 }
 0xd19   :  { %2854 = vsyncpa [#allocation25], 1 }
 0xd1a   :  { %2855 = vsyncpa [#allocation5], 1 }
 0xd1b   :  { %2857 = vsyncpa [#allocation5 + $0x1], 1 }

</bundles_post_ra>
